<compile_context>
chip_gen: v7x
topology: tpu7x:2x2x1
jax: 0.10.0
libtpu: 0.0.40
codegen_flags: <defaults>
</compile_context>

<pallas_src>
import functools

import jax
import jax.numpy as jnp
from jax import lax
from jax.experimental import pallas as pl
from jax.experimental.pallas import tpu as pltpu


def _round_up(x, m):
    return (x + m - 1) // m * m


def _tap_cols(a, offsets, L):
    """im2col matrix of lane-shifted copies of `a`.

    a: (C, L).  For tap offset d, rows [t*C:(t+1)*C] hold v_d with
    v_d[:, j] = a[:, (j + d) % L].  Implemented as static lane slices of
    [a | a]; the circular wrap only touches halo positions, which are masked
    afterwards.  Returns (ks*ks*C, L).
    """
    a2 = jnp.concatenate([a, a], axis=1)                        # (C, 2L)
    views = [a2[:, (d % L):(d % L) + L] for d in offsets]       # each (C, L)
    return jnp.concatenate(views, axis=0)                       # (ks*ks*C, L)


def _conv_flat(a, w, offsets, L):
    """'same' 3x3 conv in the flattened-frame layout.

    a: (Cin_p, L) activations (padded frame flattened row-major on lanes)
    w: (Cout_p, ks*ks*Cin_p) im2col weights (tap-major, channel-minor)
    returns (Cout_p, L) f32 -- valid on interior positions, garbage on halo.
    """
    cols = _tap_cols(a, offsets, L)                              # (ks*ks*Cin_p, L)
    return jnp.dot(w, cols, preferred_element_type=jnp.float32,
                   precision=lax.Precision.HIGHEST)              # MXU


def _block_kernel(x_ref, mask_ref, w1_ref, w2_ref, w3_ref, *rest,
                  offsets, L, identity_skip):
    if identity_skip:
        (o_ref,) = rest
        ws_ref = None
    else:
        ws_ref, o_ref = rest

    a0 = x_ref[0].astype(jnp.float32)                 # (Cin_p, L)
    cout_p = o_ref.shape[1]
    # hoist the sublane broadcast of the interior mask once, reuse twice
    mask = jnp.broadcast_to(mask_ref[...], (cout_p, L))   # 1.0 interior / 0.0 halo

    # conv1 + ReLU; re-zero the halo so conv2 sees proper 'same' zero padding
    y = jnp.maximum(_conv_flat(a0, w1_ref[...], offsets, L), 0.0) * mask
    # conv2 + ReLU
    y = jnp.maximum(_conv_flat(y, w2_ref[...], offsets, L), 0.0) * mask
    # conv3 (no activation yet)
    y = _conv_flat(y, w3_ref[...], offsets, L)

    # skip branch: identity (n_in == n_out) or 1x1 conv
    if identity_skip:
        skip = a0                                      # Cin_p == Cout_p here
    else:
        skip = jnp.dot(ws_ref[...].astype(jnp.float32), a0,
                       preferred_element_type=jnp.float32,
                       precision=lax.Precision.HIGHEST)          # (Cout_p, L)

    # fuse = ReLU(conv_block(x) + skip(x)); halo/channel padding sliced off by wrapper
    o_ref[0] = jnp.maximum(y + skip, 0.0).astype(o_ref.dtype)


def block_forward(x_nchw, params, *, ks=3, pd=1):
    """Pallas forward pass. x_nchw: (N, n_in, H, W); params in torch layout."""
    w1, w2, w3, ws = params          # (Cout,Cin,ks,ks) x3, (Cout,Cin,1,1) or None
    N, Cin, H, W = x_nchw.shape
    Cout = w1.shape[0]
    assert 2 * pd == ks - 1, "residual add requires a 'same' spatial conv"
    identity_skip = ws is None
    if identity_skip:
        assert Cin == Cout, "identity skip requires n_in == n_out"

    # Channel padding to sublane-group multiples (8) -> aligned tap concat / matmul.
    Cin_p = _round_up(Cin, 8)
    Cout_p = _round_up(Cout, 8)

    P = pd
    Hh, Wh = H + 2 * P, W + 2 * P
    frame = Hh * Wh
    L = _round_up(frame, 128)        # lane-dense flattened frame length

    # Zero-pad spatially, flatten the frame onto the lane axis (no transposes),
    # zero-pad channels up to Cin_p.
    xpad = jnp.pad(x_nchw, ((0, 0), (0, 0), (P, P), (P, P)))
    xflat = jnp.pad(xpad.reshape(N, Cin, frame),
                    ((0, 0), (0, Cin_p - Cin), (0, L - frame)))

    # Interior mask: 1 on original HxW positions, 0 on halo / flat tail.
    m2d = jnp.zeros((Hh, Wh), jnp.float32).at[P:P + H, P:P + W].set(1.0)
    mask = jnp.pad(m2d.reshape(1, frame), ((0, 0), (0, L - frame)))

    # torch OIHW -> im2col (Cout_p, ks*ks*Cin_p), tap-major / channel-minor,
    # zero-padded channels.
    def im2col_w(w, ci_p, co_p):
        co, ci = w.shape[0], w.shape[1]
        w = jnp.pad(w, ((0, co_p - co), (0, ci_p - ci), (0, 0), (0, 0)))
        return jnp.transpose(w, (0, 2, 3, 1)).reshape(co_p, ks * ks * ci_p)

    w1m = im2col_w(w1, Cin_p, Cout_p)
    w2m = im2col_w(w2, Cout_p, Cout_p)
    w3m = im2col_w(w3, Cout_p, Cout_p)

    # Flat tap offsets in the (Hh, Wh) frame, same (kh, kw) order as im2col_w.
    offsets = tuple((kh - pd) * Wh + (kw - pd)
                    for kh in range(ks) for kw in range(ks))

    kernel = functools.partial(_block_kernel, offsets=offsets, L=L,
                               identity_skip=identity_skip)

    in_specs = [
        pl.BlockSpec((1, Cin_p, L), lambda n: (n, 0, 0)),      # activations
        pl.BlockSpec((1, L), lambda n: (0, 0)),                # interior mask
        pl.BlockSpec(w1m.shape, lambda n: (0, 0)),             # grid-invariant weights
        pl.BlockSpec(w2m.shape, lambda n: (0, 0)),
        pl.BlockSpec(w3m.shape, lambda n: (0, 0)),
    ]
    args = [xflat, mask, w1m, w2m, w3m]
    if not identity_skip:
        wsm = jnp.pad(ws[:, :, 0, 0], ((0, Cout_p - Cout), (0, Cin_p - Cin)))
        in_specs.append(pl.BlockSpec(wsm.shape, lambda n: (0, 0)))
        args.append(wsm)

    out_full = pl.pallas_call(
        kernel,
        out_shape=jax.ShapeDtypeStruct((N, Cout_p, L), x_nchw.dtype),
        grid_spec=pltpu.PrefetchScalarGridSpec(
            num_scalar_prefetch=0,
            grid=(N,),
            in_specs=in_specs,
            out_specs=pl.BlockSpec((1, Cout_p, L), lambda n: (n, 0, 0)),
        ),
        compiler_params=pltpu.CompilerParams(
            dimension_semantics=("parallel",)),
    )(*args)

    # Strip channel padding, flat tail & halo: (N,Cout_p,L) -> (N,Cout,H,W).
    out = (out_full[:, :Cout, :frame]
           .reshape(N, Cout, Hh, Wh)[:, :, P:P + H, P:P + W])
    return out


def block_reference(x_nchw, params, *, ks=3, pd=1):
    """Pure-JAX reference matching the PyTorch module (NCHW, bias=False)."""
    w1, w2, w3, ws = params
    dn = ("NCHW", "OIHW", "NCHW")

    def conv(x, w, pad):
        return lax.conv_general_dilated(
            x, w, (1, 1), [(pad, pad), (pad, pad)], dimension_numbers=dn)

    y = jax.nn.relu(conv(x_nchw, w1, pd))
    y = jax.nn.relu(conv(y, w2, pd))
    y = conv(y, w3, pd)
    skip = x_nchw if ws is None else conv(x_nchw, ws, 0)
    return jax.nn.relu(y + skip)


if __name__ == "__main__":
    key = jax.random.PRNGKey(0)
    k0, k1, k2, k3, k4, k5 = jax.random.split(key, 6)

    # Case 1: n_in != n_out -> 1x1-conv skip branch.
    n_in, n_out, ks, pd = 4, 8, 3, 1
    N, H, W = 2, 16, 16
    x = jax.random.normal(k0, (N, n_in, H, W), jnp.float32)
    w1 = 0.2 * jax.random.normal(k1, (n_out, n_in, ks, ks), jnp.float32)
    w2 = 0.2 * jax.random.normal(k2, (n_out, n_out, ks, ks), jnp.float32)
    w3 = 0.2 * jax.random.normal(k3, (n_out, n_out, ks, ks), jnp.float32)
    w_skip = 0.2 * jax.random.normal(k4, (n_out, n_in, 1, 1), jnp.float32)
    params = (w1, w2, w3, w_skip)

    out = jax.block_until_ready(block_forward(x, params, ks=ks, pd=pd))
    ref = block_reference(x, params, ks=ks, pd=pd)
    assert out.shape == (N, n_out, H, W), out.shape
    assert jnp.allclose(out, ref, atol=1e-3, rtol=1e-3), \
        float(jnp.max(jnp.abs(out - ref)))

    # Case 2: n_in == n_out -> identity skip (variant without the 1x1-weight input).
    x2 = jax.random.normal(k5, (N, n_out, H, W), jnp.float32)
    params2 = (w2, w3, w2, None)
    out2 = jax.block_until_ready(block_forward(x2, params2, ks=ks, pd=pd))
    ref2 = block_reference(x2, params2, ks=ks, pd=pd)
    assert jnp.allclose(out2, ref2, atol=1e-3, rtol=1e-3), \
        float(jnp.max(jnp.abs(out2 - ref2)))

    print("KERNEL_OK")
</pallas_src>

<mosaic_0001>
module attributes {stable_mosaic.version = 11 : i64} {
  func.func @_block_kernel(%arg0: i32, %arg1: memref<1x8x384xf32, #tpu.memory_space<vmem>>, %arg2: memref<1x384xf32, #tpu.memory_space<vmem>>, %arg3: memref<8x72xf32, #tpu.memory_space<vmem>>, %arg4: memref<8x72xf32, #tpu.memory_space<vmem>>, %arg5: memref<8x72xf32, #tpu.memory_space<vmem>>, %arg6: memref<8x8xf32, #tpu.memory_space<vmem>>, %arg7: memref<1x8x384xf32, #tpu.memory_space<vmem>>) attributes {dimension_semantics = [#tpu.dimension_semantics<parallel>], iteration_bounds = array<i64: 2>, scalar_prefetch = 0 : i64, scratch_operands = 0 : i64, tpu.core_type = #tpu.core_type<tc>, window_params = [{transform_indices = @transform_0, window_bounds = array<i64: 1, 8, 384>}, {pipeline_mode = #tpu.pipeline_mode<synchronous>, transform_indices = @transform_1, window_bounds = array<i64: 1, 384>}, {pipeline_mode = #tpu.pipeline_mode<synchronous>, transform_indices = @transform_2, window_bounds = array<i64: 8, 72>}, {pipeline_mode = #tpu.pipeline_mode<synchronous>, transform_indices = @transform_3, window_bounds = array<i64: 8, 72>}, {pipeline_mode = #tpu.pipeline_mode<synchronous>, transform_indices = @transform_4, window_bounds = array<i64: 8, 72>}, {pipeline_mode = #tpu.pipeline_mode<synchronous>, transform_indices = @transform_5, window_bounds = array<i64: 8, 8>}, {transform_indices = @transform_6, window_bounds = array<i64: 1, 8, 384>}]} {
    %c0 = arith.constant 0 : index
    %c0_0 = arith.constant 0 : index
    %c0_1 = arith.constant 0 : index
    %0 = vector.load %arg1[%c0, %c0_0, %c0_1] : memref<1x8x384xf32, #tpu.memory_space<vmem>>, vector<1x8x384xf32>
    %1 = vector.shape_cast %0 : vector<1x8x384xf32> to vector<8x384xf32>
    %c0_2 = arith.constant 0 : index
    %c0_3 = arith.constant 0 : index
    %2 = vector.load %arg2[%c0_2, %c0_3] : memref<1x384xf32, #tpu.memory_space<vmem>>, vector<1x384xf32>
    %3 = vector.shape_cast %2 : vector<1x384xf32> to vector<1x384xf32>
    %4 = vector.broadcast %3 : vector<1x384xf32> to vector<8x384xf32>
    %c0_4 = arith.constant 0 : index
    %c0_5 = arith.constant 0 : index
    %5 = vector.load %arg3[%c0_4, %c0_5] : memref<8x72xf32, #tpu.memory_space<vmem>>, vector<8x72xf32>
    %6 = tpu.concatenate %1, %1 in 1 : vector<8x384xf32>, vector<8x384xf32> -> vector<8x768xf32>
    %7 = vector.extract_strided_slice %6 {offsets = [0, 365], sizes = [8, 384], strides = [1, 1]} : vector<8x768xf32> to vector<8x384xf32>
    %8 = vector.extract_strided_slice %6 {offsets = [0, 366], sizes = [8, 384], strides = [1, 1]} : vector<8x768xf32> to vector<8x384xf32>
    %9 = vector.extract_strided_slice %6 {offsets = [0, 367], sizes = [8, 384], strides = [1, 1]} : vector<8x768xf32> to vector<8x384xf32>
    %10 = vector.extract_strided_slice %6 {offsets = [0, 383], sizes = [8, 384], strides = [1, 1]} : vector<8x768xf32> to vector<8x384xf32>
    %11 = vector.extract_strided_slice %6 {offsets = [0, 0], sizes = [8, 384], strides = [1, 1]} : vector<8x768xf32> to vector<8x384xf32>
    %12 = vector.extract_strided_slice %6 {offsets = [0, 1], sizes = [8, 384], strides = [1, 1]} : vector<8x768xf32> to vector<8x384xf32>
    %13 = vector.extract_strided_slice %6 {offsets = [0, 17], sizes = [8, 384], strides = [1, 1]} : vector<8x768xf32> to vector<8x384xf32>
    %14 = vector.extract_strided_slice %6 {offsets = [0, 18], sizes = [8, 384], strides = [1, 1]} : vector<8x768xf32> to vector<8x384xf32>
    %15 = vector.extract_strided_slice %6 {offsets = [0, 19], sizes = [8, 384], strides = [1, 1]} : vector<8x768xf32> to vector<8x384xf32>
    %16 = tpu.concatenate %7, %8, %9, %10, %11, %12, %13, %14, %15 in 0 : vector<8x384xf32>, vector<8x384xf32>, vector<8x384xf32>, vector<8x384xf32>, vector<8x384xf32>, vector<8x384xf32>, vector<8x384xf32>, vector<8x384xf32>, vector<8x384xf32> -> vector<72x384xf32>
    %cst = arith.constant dense<0.000000e+00> : vector<8x384xf32>
    %17 = tpu.matmul %5, %16, %cst {dimension_numbers = #tpu.dot_dimension_numbers<[1], [0], [0], [1], [0, 0, 1, 1], [], []>, precision = #tpu.contract_precision<fp32>} : vector<8x72xf32>, vector<72x384xf32>, vector<8x384xf32> -> vector<8x384xf32>
    %cst_6 = arith.constant 0.000000e+00 : f32
    %18 = vector.broadcast %cst_6 : f32 to vector<8x384xf32>
    %19 = arith.maximumf %17, %18 : vector<8x384xf32>
    %20 = arith.mulf %19, %4 : vector<8x384xf32>
    %c0_7 = arith.constant 0 : index
    %c0_8 = arith.constant 0 : index
    %21 = vector.load %arg4[%c0_7, %c0_8] : memref<8x72xf32, #tpu.memory_space<vmem>>, vector<8x72xf32>
    %22 = tpu.concatenate %20, %20 in 1 : vector<8x384xf32>, vector<8x384xf32> -> vector<8x768xf32>
    %23 = vector.extract_strided_slice %22 {offsets = [0, 365], sizes = [8, 384], strides = [1, 1]} : vector<8x768xf32> to vector<8x384xf32>
    %24 = vector.extract_strided_slice %22 {offsets = [0, 366], sizes = [8, 384], strides = [1, 1]} : vector<8x768xf32> to vector<8x384xf32>
    %25 = vector.extract_strided_slice %22 {offsets = [0, 367], sizes = [8, 384], strides = [1, 1]} : vector<8x768xf32> to vector<8x384xf32>
    %26 = vector.extract_strided_slice %22 {offsets = [0, 383], sizes = [8, 384], strides = [1, 1]} : vector<8x768xf32> to vector<8x384xf32>
    %27 = vector.extract_strided_slice %22 {offsets = [0, 0], sizes = [8, 384], strides = [1, 1]} : vector<8x768xf32> to vector<8x384xf32>
    %28 = vector.extract_strided_slice %22 {offsets = [0, 1], sizes = [8, 384], strides = [1, 1]} : vector<8x768xf32> to vector<8x384xf32>
    %29 = vector.extract_strided_slice %22 {offsets = [0, 17], sizes = [8, 384], strides = [1, 1]} : vector<8x768xf32> to vector<8x384xf32>
    %30 = vector.extract_strided_slice %22 {offsets = [0, 18], sizes = [8, 384], strides = [1, 1]} : vector<8x768xf32> to vector<8x384xf32>
    %31 = vector.extract_strided_slice %22 {offsets = [0, 19], sizes = [8, 384], strides = [1, 1]} : vector<8x768xf32> to vector<8x384xf32>
    %32 = tpu.concatenate %23, %24, %25, %26, %27, %28, %29, %30, %31 in 0 : vector<8x384xf32>, vector<8x384xf32>, vector<8x384xf32>, vector<8x384xf32>, vector<8x384xf32>, vector<8x384xf32>, vector<8x384xf32>, vector<8x384xf32>, vector<8x384xf32> -> vector<72x384xf32>
    %cst_9 = arith.constant dense<0.000000e+00> : vector<8x384xf32>
    %33 = tpu.matmul %21, %32, %cst_9 {dimension_numbers = #tpu.dot_dimension_numbers<[1], [0], [0], [1], [0, 0, 1, 1], [], []>, precision = #tpu.contract_precision<fp32>} : vector<8x72xf32>, vector<72x384xf32>, vector<8x384xf32> -> vector<8x384xf32>
    %cst_10 = arith.constant 0.000000e+00 : f32
    %34 = vector.broadcast %cst_10 : f32 to vector<8x384xf32>
    %35 = arith.maximumf %33, %34 : vector<8x384xf32>
    %36 = arith.mulf %35, %4 : vector<8x384xf32>
    %c0_11 = arith.constant 0 : index
    %c0_12 = arith.constant 0 : index
    %37 = vector.load %arg5[%c0_11, %c0_12] : memref<8x72xf32, #tpu.memory_space<vmem>>, vector<8x72xf32>
    %38 = tpu.concatenate %36, %36 in 1 : vector<8x384xf32>, vector<8x384xf32> -> vector<8x768xf32>
    %39 = vector.extract_strided_slice %38 {offsets = [0, 365], sizes = [8, 384], strides = [1, 1]} : vector<8x768xf32> to vector<8x384xf32>
    %40 = vector.extract_strided_slice %38 {offsets = [0, 366], sizes = [8, 384], strides = [1, 1]} : vector<8x768xf32> to vector<8x384xf32>
    %41 = vector.extract_strided_slice %38 {offsets = [0, 367], sizes = [8, 384], strides = [1, 1]} : vector<8x768xf32> to vector<8x384xf32>
    %42 = vector.extract_strided_slice %38 {offsets = [0, 383], sizes = [8, 384], strides = [1, 1]} : vector<8x768xf32> to vector<8x384xf32>
    %43 = vector.extract_strided_slice %38 {offsets = [0, 0], sizes = [8, 384], strides = [1, 1]} : vector<8x768xf32> to vector<8x384xf32>
    %44 = vector.extract_strided_slice %38 {offsets = [0, 1], sizes = [8, 384], strides = [1, 1]} : vector<8x768xf32> to vector<8x384xf32>
    %45 = vector.extract_strided_slice %38 {offsets = [0, 17], sizes = [8, 384], strides = [1, 1]} : vector<8x768xf32> to vector<8x384xf32>
    %46 = vector.extract_strided_slice %38 {offsets = [0, 18], sizes = [8, 384], strides = [1, 1]} : vector<8x768xf32> to vector<8x384xf32>
    %47 = vector.extract_strided_slice %38 {offsets = [0, 19], sizes = [8, 384], strides = [1, 1]} : vector<8x768xf32> to vector<8x384xf32>
    %48 = tpu.concatenate %39, %40, %41, %42, %43, %44, %45, %46, %47 in 0 : vector<8x384xf32>, vector<8x384xf32>, vector<8x384xf32>, vector<8x384xf32>, vector<8x384xf32>, vector<8x384xf32>, vector<8x384xf32>, vector<8x384xf32>, vector<8x384xf32> -> vector<72x384xf32>
    %cst_13 = arith.constant dense<0.000000e+00> : vector<8x384xf32>
    %49 = tpu.matmul %37, %48, %cst_13 {dimension_numbers = #tpu.dot_dimension_numbers<[1], [0], [0], [1], [0, 0, 1, 1], [], []>, precision = #tpu.contract_precision<fp32>} : vector<8x72xf32>, vector<72x384xf32>, vector<8x384xf32> -> vector<8x384xf32>
    %c0_14 = arith.constant 0 : index
    %c0_15 = arith.constant 0 : index
    %50 = vector.load %arg6[%c0_14, %c0_15] : memref<8x8xf32, #tpu.memory_space<vmem>>, vector<8x8xf32>
    %cst_16 = arith.constant dense<0.000000e+00> : vector<8x384xf32>
    %51 = tpu.matmul %50, %1, %cst_16 {dimension_numbers = #tpu.dot_dimension_numbers<[1], [0], [0], [1], [0, 0, 1, 1], [], []>, precision = #tpu.contract_precision<fp32>} : vector<8x8xf32>, vector<8x384xf32>, vector<8x384xf32> -> vector<8x384xf32>
    %52 = arith.addf %49, %51 : vector<8x384xf32>
    %cst_17 = arith.constant 0.000000e+00 : f32
    %53 = vector.broadcast %cst_17 : f32 to vector<8x384xf32>
    %54 = arith.maximumf %52, %53 : vector<8x384xf32>
    %c0_18 = arith.constant 0 : index
    %c0_19 = arith.constant 0 : index
    %c0_20 = arith.constant 0 : index
    %55 = vector.load %arg7[%c0_18, %c0_19, %c0_20] : memref<1x8x384xf32, #tpu.memory_space<vmem>>, vector<1x8x384xf32>
    %56 = vector.shape_cast %55 : vector<1x8x384xf32> to vector<8x384xf32>
    %57 = vector.shape_cast %54 : vector<8x384xf32> to vector<1x8x384xf32>
    tpu.vector_store %arg7[%c0_18, %c0_19, %c0_20], %57 {strides = array<i32>} : memref<1x8x384xf32, #tpu.memory_space<vmem>>, vector<1x8x384xf32>,
    return
  }
  func.func @transform_0(%arg0: i32) -> (i32, i32, i32) {
    %c0_i32 = arith.constant 0 : i32
    %c0_i32_0 = arith.constant 0 : i32
    %c0_i32_1 = arith.constant 0 : i32
    return %arg0, %c0_i32, %c0_i32_0 : i32, i32, i32
  }
  func.func @transform_1(%arg0: i32) -> (i32, i32) {
    %c0_i32 = arith.constant 0 : i32
    %c0_i32_0 = arith.constant 0 : i32
    %c0_i32_1 = arith.constant 0 : i32
    return %c0_i32, %c0_i32_0 : i32, i32
  }
  func.func @transform_2(%arg0: i32) -> (i32, i32) {
    %c0_i32 = arith.constant 0 : i32
    %c0_i32_0 = arith.constant 0 : i32
    %c0_i32_1 = arith.constant 0 : i32
    return %c0_i32, %c0_i32_0 : i32, i32
  }
  func.func @transform_3(%arg0: i32) -> (i32, i32) {
    %c0_i32 = arith.constant 0 : i32
    %c0_i32_0 = arith.constant 0 : i32
    %c0_i32_1 = arith.constant 0 : i32
    return %c0_i32, %c0_i32_0 : i32, i32
  }
  func.func @transform_4(%arg0: i32) -> (i32, i32) {
    %c0_i32 = arith.constant 0 : i32
    %c0_i32_0 = arith.constant 0 : i32
    %c0_i32_1 = arith.constant 0 : i32
    return %c0_i32, %c0_i32_0 : i32, i32
  }
  func.func @transform_5(%arg0: i32) -> (i32, i32) {
    %c0_i32 = arith.constant 0 : i32
    %c0_i32_0 = arith.constant 0 : i32
    %c0_i32_1 = arith.constant 0 : i32
    return %c0_i32, %c0_i32_0 : i32, i32
  }
  func.func @transform_6(%arg0: i32) -> (i32, i32, i32) {
    %c0_i32 = arith.constant 0 : i32
    %c0_i32_0 = arith.constant 0 : i32
    %c0_i32_1 = arith.constant 0 : i32
    return %arg0, %c0_i32, %c0_i32_0 : i32, i32, i32
  }
}

</mosaic_0001>

<bundles_post_ra>
// kernel: tpu_custom_call.1
= control target key start
LH: loop header
LB: loop body
LE: loop exit
PB: predicated region body
PF: predicated region fallthrough
CT: control target
= control target key end

     0   :  { %11 = vsyncpa [#allocation3], 0  ;;  %s9356_s0 = inlined_call_operand.hbm [shape: f32[2,8,384], index: 0, kind: input, shape index: {}]   ;;  %s9357_s1 = inlined_call_operand.hbm [shape: f32[1,384], index: 1, kind: input, shape index: {}]   ;;  %s9358_s2 = inlined_call_operand.hbm [shape: f32[8,72], index: 2, kind: input, shape index: {}]   ;;  %s9359_s3 = inlined_call_operand.vmem [shape: f32[8,72], index: 3, kind: input, shape index: {}]   ;;  %s9360_s4 = inlined_call_operand.hbm [shape: f32[8,72], index: 4, kind: input, shape index: {}]   ;;  %s9361_s5 = inlined_call_operand.vmem [shape: f32[8,8], index: 5, kind: input, shape index: {}]   ;;  %s9362_s6 = inlined_call_operand.hbm [shape: f32[2,8,384], index: 6, kind: output, shape index: {}]  }
   0x1   :  { %13 = vsyncpa [#allocation3 + $0x1], 0 }
   0x2   :  { %14 = vsyncpa [#allocation6], 0 }
   0x3   :  { %15 = vsyncpa [#allocation9], 0 }
   0x4   :  { %16 = vsyncpa [#allocation4], 0 }
   0x5   :  { %18 = vsyncpa [#allocation4 + $0x1], 0  ;;  %s7199_s21 = smov 0   ;;  %s7201_s22 = smov 0  }
   0x6   :  { %s7203_s23 = smov 0   ;;  %s7205_s24 = smov 0  }
   0x7 LB: > { %s7220_s25 = sadd.s32 4294967295, %s7145_s24   ;;  %s5659_s26 = sadd.s32 4294967294, %s7145_s24   ;;  %s7145_s24 = sphi %s7205_s24, %s9652_s24   ;;  %s7141_s23 = sphi %s7203_s23, %s9651_s23   ;;  %s7137_s22 = sphi %s7201_s22, %s9650_s22   ;;  %s7133_s21 = sphi %s7199_s21, %s9649_s21  }
   0x8   : > { %p44_p0 = scmp.ne.s32.totalorder %s7137_s22, %s7133_s21  ;;  %p9363_p1 = scmp.eq.s32.totalorder %s7220_s25, 0 }
   0x9   : > { %p179_p3 = scmp.eq.s32.totalorder %s5659_s26, 1  ;;  %p5660_p5 = scmp.ge.s32.totalorder %s7145_s24, 1 }
   0xa   : > { %p7229_p4 = por %p9363_p1, %p44_p0  ;;  %p186_p7 = scmp.lt.s32.totalorder %s7145_s24, 3 }
   0xb   : > { %p7234_p6 = por %p179_p3, %p44_p0  ;;  %s7147_s30 = smov [#allocation5]  }
   0xc   : > { %s9455_s27 = scalar_select %p7229_p4, 1, 0 }
   0xd   : > { %s9456_s28 = scalar_select %p7234_p6, 1, 0 }
   0xe   : > { %p7239_p8 = pnand %p5660_p5, %p186_p7  ;;  %s199_s7 = sshll.u32 %s7147_s30, 4  ;;  %s200_s7 = int_to_ptr.vmem [resolvable:$true] %s199_s7 }
   0xf   : > { %s7148_s8 = smov [#allocation7]   ;;  %s7149_s11 = smov [#allocation8]  }
  0x10   : > { %s9457_s29 = scalar_select %p7239_p8, 1, 0 }
  0x11   : > { %p6881_p10 = pneg %p7239_p8  ;;  %s210_s9 = sshll.u32 %s7148_s8, 4  ;;  %s7252_s9 = int_to_ptr.vmem [resolvable:$true] %s210_s9 }
  0x12   : > { %s224_s12 = sshll.u32 %s7149_s11, 4  ;;  %s6957_s15 = scalar_lea.hbm %s9357_s1, 48  ;;  %s7254_s12 = int_to_ptr.vmem [resolvable:$true] %s224_s12 }
  0x13   : > { %p7248_p11 = pnand %p6881_p10, %p9363_p1  ;;  %p6958_p12 = scmp.ne.s32.totalorder %s9357_s1, %s6957_s15 }
  0x14   : > { %p6964_p5 = scmp.lt.u32.totalorder %s6957_s15, %s9357_s1 }
  0x15   : > { %p7264_p13 = pneg %p7248_p11 }
  0x17   : > { %p6960_p0 = pnand %p7264_p13, %p6958_p12 }
  0x19   : > { %p6961_p3 = pneg %p6960_p0 }
  0x1b   : > { %p6966_p7 = pnand %p6964_p5, %p6961_p3 }
  0x1d   : > { %6969 = shalt.err (!%p6966_p7)
}
  0x1e   : > { %s6970_s26 = scalar_lea.vmem %s200_s7, 48  ;;  %s6977_s30 = scalar_lea.vmem %s200_s7, 64 }
  0x1f   : > { %p6971_p10 = scmp.ne.s32.totalorder %s200_s7, %s6970_s26  ;;  %p6978_p2 = scmp.lt.s32.totalorder %s200_s7, %s200_s7 }
  0x20   : > { %p6979_p6 = scmp.lt.s32.totalorder %s6977_s30, %s6970_s26 }
  0x21   : > { %p6973_p9 = pnand %p6971_p10, %p7264_p13 }
  0x22   : > { %p6980_p4 = por %p6979_p6, %p6978_p2 }
  0x23   : > { %p6974_p1 = pneg %p6973_p9 }
  0x25   : > { %p6981_p8 = pnand %p6980_p4, %p6974_p1 }
  0x27   : > { %6984 = shalt.err (!%p6981_p8)
}
  0x28   : > { %6884 = dma.hbm_to_vmem [thread:$0]  (!%p7248_p11), %s9357_s1, 48, %s200_s7, [#allocation6]  }
  0x29   : > { %s6985_s15 = scalar_lea.hbm %s9358_s2, 128 }
  0x2a   : > { %p6986_p9 = scmp.ne.s32.totalorder %s9358_s2, %s6985_s15  ;;  %p6992_p1 = scmp.lt.u32.totalorder %s6985_s15, %s9358_s2 }
  0x2c   : > { %p6988_p12 = pnand %p6986_p9, %p7264_p13 }
  0x2e   : > { %p6989_p2 = pneg %p6988_p12 }
  0x30   : > { %p6994_p4 = pnand %p6992_p1, %p6989_p2 }
  0x32   : > { %6997 = shalt.err (!%p6994_p4)
}
  0x33   : > { %s6998_s7 = scalar_lea.vmem %s7252_s9, 128  ;;  %p7006_p3 = scmp.lt.s32.totalorder %s7252_s9, %s7252_s9 }
  0x34   : > { %p6999_p6 = scmp.ne.s32.totalorder %s7252_s9, %s6998_s7  ;;  %p7007_p5 = scmp.lt.s32.totalorder %s6998_s7, %s6998_s7 }
  0x36   : > { %p7001_p8 = pnand %p6999_p6, %p7264_p13  ;;  %p7008_p7 = por %p7007_p5, %p7006_p3 }
  0x38   : > { %p7002_p0 = pneg %p7001_p8 }
  0x3a   : > { %p7009_p10 = pnand %p7008_p7, %p7002_p0 }
  0x3c   : > { %7012 = shalt.err (!%p7009_p10)
}
  0x3d   : > { %6887 = dma.hbm_to_vmem [thread:$0]  (!%p7248_p11), %s9358_s2, 128, %s7252_s9, [#allocation6]  }
  0x3e   : > { %s7013_s13 = scalar_lea.hbm %s9360_s4, 128 }
  0x3f   : > { %p7014_p9 = scmp.ne.s32.totalorder %s9360_s4, %s7013_s13  ;;  %p7020_p1 = scmp.lt.u32.totalorder %s7013_s13, %s9360_s4 }
  0x41   : > { %p7016_p12 = pnand %p7014_p9, %p7264_p13 }
  0x43   : > { %p7017_p2 = pneg %p7016_p12 }
  0x45   : > { %p7022_p4 = pnand %p7020_p1, %p7017_p2 }
  0x47   : > { %7025 = shalt.err (!%p7022_p4)
}
  0x48   : > { %s7026_s9 = scalar_lea.vmem %s7254_s12, 128  ;;  %p7034_p3 = scmp.lt.s32.totalorder %s7254_s12, %s7254_s12 }
  0x49   : > { %p7027_p6 = scmp.ne.s32.totalorder %s7254_s12, %s7026_s9  ;;  %p7035_p5 = scmp.lt.s32.totalorder %s7026_s9, %s7026_s9 }
  0x4b   : > { %p7029_p8 = pnand %p7027_p6, %p7264_p13  ;;  %p7036_p7 = por %p7035_p5, %p7034_p3 }
  0x4d   : > { %p7030_p0 = pneg %p7029_p8 }
  0x4f   : > { %p7037_p10 = pnand %p7036_p7, %p7030_p0 }
  0x51   : > { %7040 = shalt.err (!%p7037_p10)
}
  0x52   : > { %6890 = dma.hbm_to_vmem [thread:$0]  (!%p7248_p11), %s9360_s4, 128, %s7254_s12, [#allocation9]  }
  0x53   : > { %s7327_s18 = sadd.s32 1, %s7145_s24   ;;  %s31_s7 = sadd.s32 1, %s7141_s23 }
  0x54   : > { %s28_s10 = ssub.s32 %s7145_s24, %s7327_s18  ;;  %p38_p9 = scmp.ne.s32.totalorder %s7141_s23, %s7137_s22 }
  0x55   : > { %p29_p13 = scmp.eq.s32.totalorder %s28_s10, 0  ;;  %p39_p12 = scmp.eq.s32.totalorder %s7145_s24, 0 }
  0x56   : > { %p6902_p2 = scmp.lt.s32.totalorder %s7145_s24, 2  ;;  %p9460_p4 = scmp.eq.s32.totalorder %s7220_s25, 1 }
  0x57   : > { %s7337_s26 = scalar_select %p29_p13, %s7141_s23, %s31_s7  }
  0x58   : > { %p40_p1 = por %p39_p12, %p38_p9  ;;  %p7341_p6 = por %p9460_p4, %p38_p9 }
  0x59   : > { %s238_s8 = sand.u32 1, %s7141_s23   ;;  %s6862_s11 = smul.u32 384, %s7145_s24 }
  0x5a   : > { %s6861_s12 = smul.u32 24, %s238_s8  ;;  %p7347_p11 = pnand %p6902_p2, %p40_p1 }
  0x5b   : > { %s7354_s16 = scalar_lea.hbm %s9356_s0, %s6862_s11  ;;  %s239_s19 = scalar_lea.sflag [#allocation3], %s238_s8 }
  0x5c   : > { %s242_s17 = scalar_lea.vmem [#allocation2], %s6861_s12  ;;  %s7041_s20 = scalar_lea.hbm %s7354_s16, 384 }
  0x5d   : > { %s250_s9 = sshll.u32 %s242_s17, 4  ;;  %p7042_p8 = scmp.ne.s32.totalorder %s7354_s16, %s7041_s20  ;;  %s7356_s9 = int_to_ptr.vmem [resolvable:$true] %s250_s9 }
  0x5e   : > { %p7043_p0 = pneg %p7347_p11  ;;  %s7046_s11 = scalar_lea.hbm %s9356_s0, 768 }
  0x5f   : > { %p7047_p7 = scmp.lt.u32.totalorder %s7354_s16, %s9356_s0  ;;  %p7048_p10 = scmp.lt.u32.totalorder %s7046_s11, %s7041_s20 }
  0x60   : > { %p7044_p3 = pnand %p7043_p0, %p7042_p8  ;;  %p7050_p9 = scmp.lt.u32.totalorder %s7041_s20, %s7354_s16 }
  0x61   : > { %p7049_p13 = por %p7048_p10, %p7047_p7 }
  0x62   : > { %p7045_p5 = pneg %p7044_p3 }
  0x63   : > { %p7051_p12 = por %p7050_p9, %p7049_p13 }
  0x65   : > { %p7052_p2 = pnand %p7051_p12, %p7045_p5 }
  0x67   : > { %7055 = shalt.err (!%p7052_p2)
}
  0x68   : > { %s7056_s8 = scalar_lea.vmem %s7356_s9, 384  ;;  %s7150_s12 = smov [#allocation2]  }
  0x69   : > { %p7057_p1 = scmp.ne.s32.totalorder %s7356_s9, %s7056_s8  ;;  %s7061_s17 = sshll.u32 %s7150_s12, 4  ;;  %s7062_s17 = int_to_ptr.vmem [resolvable:$false] %s7061_s17 }
  0x6a   : > { %s7063_s10 = scalar_lea.vmem %s7062_s17, 768  ;;  %p7064_p3 = scmp.lt.s32.totalorder %s7356_s9, %s7062_s17 }
  0x6b   : > { %p7059_p4 = pnand %p7057_p1, %p7043_p0  ;;  %p7065_p7 = scmp.lt.s32.totalorder %s7063_s10, %s7056_s8 }
  0x6d   : > { %p7060_p8 = pneg %p7059_p4  ;;  %p7066_p10 = por %p7065_p7, %p7064_p3 }
  0x6f   : > { %p7067_p13 = pnand %p7066_p10, %p7060_p8 }
  0x71   : > { %7070 = shalt.err (!%p7067_p13)
}
  0x72   : > { %6894 = dma.hbm_to_vmem [thread:$0]  (!%p7347_p11), %s7354_s16, 384, %s7356_s9, %s239_s19  }
  0x73   : > { %p9463_p5 = scmp.ne.s32.totalorder %s9457_s29, 0 }
  0x75   : > { %259 = sbr.rel (%p9463_p5) target bundleno = 2012 (0x7dc), region = 44 }
  0x7c   : > { %s7386_s20 = sand.u32 1, %s7137_s22   ;;  %p9464_p0 = scmp.ne.s32.totalorder %s9455_s27, 0 }
  0x7d   : > { %s6863_s7 = smul.u32 24, %s7386_s20  ;;  %s262_s11 = scalar_lea.sflag [#allocation3], %s7386_s20 }
  0x7f   : > { %s7392_s14 = scalar_lea.vmem [#allocation2], %s6863_s7 }
  0x80   : > { %7116 = dma.done.wait (%p9464_p0), %s262_s11, 384  }
  0x81   : > { %7118 = vsyncadd (%p9464_p0), %s262_s11, 4294966912  ;;  %p9465_p11 = scmp.eq.s32.totalorder %s7220_s25, 0 }
  0x83   : > { %7120 = dma.done.wait (%p9465_p11), [#allocation6], 176   ;;  %p9466_p9 = pmov %p9465_p11 }
  0x85   : > { %7122 = vsyncadd (%p9466_p9), [#allocation6], 4294967120  ;;  %p9467_p12 = pmov %p9466_p9 }
  0x86   : > { %p9468_p2 = pmov %p9466_p9 }
  0x87   : > { %7124 = dma.done.wait (%p9467_p12), [#allocation9], 128  }
  0x88   : > { %7126 = vsyncadd (%p9468_p2), [#allocation9], 4294967168  ;;  %v308_v0 = vld [vmem:[%s7392_s14 + $0x10] sm:$0xff]  ;;  %v307_v1 = vld [vmem:[%s7392_s14 + $0x8] sm:$0xff]  ;;  %s7151_s29 = smov 127   ;;  %s7152_s27 = smov 126  }
  0x89   : > { %330 = vrot.lane.b32.xlu0 %v308_v0, %s7151_s29  ;;  %334 = vrot.lane.b32.xlu1 %v307_v1, %s7151_s29  ;;  %v306_v2 = vld [vmem:[%s7392_s14] sm:$0xff]  ;;  %s7153_s13 = smov 110   ;;  %s7154_s16 = smov 109   ;;  %v9374_v17 = vmov 0.0|0.0   ;;  %vm336_vm0 = vcmask 1039360   ;;  %vm346_vm1 = vcmask 1031168  }
  0x8a   : > { %s7155_s9 = smov 108   ;;  %s7156_s19 = smov 92   ;;  %6369 = vmatprep.subr.bf16.mxu1 %v9374_v17  ;;  %vm356_vm2 = vcmask 900096   ;;  %vm366_vm3 = vcmask 891904   ;;  %vm375_vm4 = vcmask 883712   ;;  %vm385_vm5 = vcmask 752640  }
  0x8b   : > { %s7157_s15 = smov 91   ;;  %s7158_s8 = smov 90   ;;  %vm395_vm6 = vcmask 744448   ;;  %vm405_vm7 = vcmask 736256   ;;  %v9376_v47 = vmov 0.0   ;;  %vm7162_vm8 = vmmov 0  }
  0x8c   : > { %s7159_s12 = smov 19   ;;  %620 = vmatprep.mubr.f32.mxu0 %v9376_v47  ;;  %5883 = vmatprep.mubr.msk.f32.mxu1 %vm7162_vm8, %v9376_v47  ;;  %vm479_vm9 = vcmask 154624   ;;  %vm534_vm10 = vcmask 588800   ;;  %vm3274_vm11 = vcmask 64512  }
  0x8d   : > { %340 = vrot.lane.b32.xlu1 %v308_v0, %s7152_s27  ;;  %332 = vrot.lane.b32.xlu0 %v306_v2, %s7151_s29 }
  0x91   : > { %344 = vrot.lane.b32.xlu1 %v307_v1, %s7152_s27  ;;  %342 = vrot.lane.b32.xlu0 %v306_v2, %s7152_s27 }
  0x95   : > { %352 = vrot.lane.b32.xlu1 %v306_v2, %s7153_s13  ;;  %350 = vrot.lane.b32.xlu0 %v308_v0, %s7153_s13 }
  0x99   : > { %360 = vrot.lane.b32.xlu1 %v306_v2, %s7154_s16  ;;  %354 = vrot.lane.b32.xlu0 %v307_v1, %s7153_s13 }
  0x9d   : > { %364 = vrot.lane.b32.xlu1 %v308_v0, %s7154_s16  ;;  %362 = vrot.lane.b32.xlu0 %v307_v1, %s7154_s16 }
  0xa1   : > { %371 = vrot.lane.b32.xlu1 %v307_v1, %s7155_s9  ;;  %369 = vrot.lane.b32.xlu0 %v306_v2, %s7155_s9 }
  0xa5   : > { %379 = vrot.lane.b32.xlu1 %v306_v2, %s7156_s19  ;;  %373 = vrot.lane.b32.xlu0 %v308_v0, %s7155_s9 }
  0xa9   : > { %383 = vrot.lane.b32.xlu1 %v308_v0, %s7156_s19  ;;  %381 = vrot.lane.b32.xlu0 %v307_v1, %s7156_s19 }
  0xad   : > { %391 = vrot.lane.b32.xlu1 %v307_v1, %s7157_s15  ;;  %389 = vrot.lane.b32.xlu0 %v306_v2, %s7157_s15 }
  0xb1   : > { %393 = vrot.lane.b32.xlu0 %v308_v0, %s7157_s15  ;;  %399 = vrot.lane.b32.xlu1 %v306_v2, %s7158_s8 }
  0xb5   : > { %401 = vrot.lane.b32.xlu0 %v307_v1, %s7158_s8  ;;  %403 = vrot.lane.b32.xlu1 %v308_v0, %s7158_s8 }
  0xb9   : > { %411 = vrot.lane.b32.xlu0 %v306_v2, %s7159_s12  ;;  %413 = vrot.lane.b32.xlu1 %v307_v1, %s7159_s12 }
  0xbd   : > { %409 = vrot.lane.b32.xlu0 %v308_v0, %s7159_s12 }
  0xfb   : > { %v331_v3 = vpop.permute.xlu0 %330  ;;  %v335_v4 = vpop.permute.xlu1 %334 }
  0xfc   : > { %421 = vrot.lane.b32.xlu0 %v331_v3, %s7159_s12  ;;  %v339_v21 = vsel %vm336_vm0, %v335_v4, %v331_v3 }
  0xff   : > { %v341_v5 = vpop.permute.xlu1 %340  ;;  %v333_v6 = vpop.permute.xlu0 %332 }
 0x100   : > { %429 = vrot.lane.b32.xlu1 %v341_v5, %s7159_s12  ;;  %v337_v23 = vsel %vm336_vm0, %v331_v3, %v333_v6  ;;  %v338_v25 = vsel %vm336_vm0, %v333_v6, %v335_v4 }
 0x103   : > { %v345_v7 = vpop.permute.xlu1 %344  ;;  %v343_v8 = vpop.permute.xlu0 %342 }
 0x104   : > { %v348_v24 = vsel %vm346_vm1, %v343_v8, %v345_v7  ;;  %v349_v27 = vsel %vm346_vm1, %v345_v7, %v341_v5  ;;  %v347_v28 = vsel %vm346_vm1, %v341_v5, %v343_v8 }
 0x107   : > { %v353_v9 = vpop.permute.xlu1 %352  ;;  %v351_v10 = vpop.permute.xlu0 %350 }
 0x108   : > { %437 = vrot.lane.b32.xlu0 %v351_v10, %s7159_s12  ;;  %v357_v31 = vsel %vm356_vm2, %v351_v10, %v353_v9 }
 0x10b   : > { %v361_v11 = vpop.permute.xlu1 %360  ;;  %v355_v12 = vpop.permute.xlu0 %354 }
 0x10c   : > { %439 = vrot.lane.b32.xlu1 %v361_v11, %s7159_s12  ;;  %v358_v26 = vsel %vm356_vm2, %v353_v9, %v355_v12  ;;  %v359_v29 = vsel %vm356_vm2, %v355_v12, %v351_v10 }
 0x10f   : > { %v365_v13 = vpop.permute.xlu1 %364  ;;  %v363_v14 = vpop.permute.xlu0 %362 }
 0x110   : > { %445 = vrot.lane.b32.xlu1 %v365_v13, %s7159_s12  ;;  %v367_v30 = vsel %vm366_vm3, %v361_v11, %v363_v14  ;;  %v368_v34 = vsel %vm366_vm3, %v363_v14, %v365_v13 }
 0x113   : > { %v372_v15 = vpop.permute.xlu1 %371  ;;  %v370_v16 = vpop.permute.xlu0 %369 }
 0x114   : > { %447 = vrot.lane.b32.xlu0 %v370_v16, %s7159_s12  ;;  %v376_v33 = vsel %vm375_vm4, %v370_v16, %v372_v15 }
 0x117   : > { %v380_v18 = vpop.permute.xlu1 %379  ;;  %v374_v19 = vpop.permute.xlu0 %373 }
 0x118   : > { %455 = vrot.lane.b32.xlu1 %v380_v18, %s7159_s12  ;;  %v377_v36 = vsel %vm375_vm4, %v372_v15, %v374_v19  ;;  %v378_v40 = vsel %vm375_vm4, %v374_v19, %v370_v16 }
 0x11b   : > { %v382_v20 = vpop.permute.xlu0 %381  ;;  %v384_v32 = vpop.permute.xlu1 %383 }
 0x11c   : > { %419 = vrot.lane.b32.xlu1 %v339_v21, %s7159_s12  ;;  %v386_v35 = vsel %vm385_vm5, %v380_v18, %v382_v20  ;;  %v388_v43 = vsel %vm385_vm5, %v384_v32, %v380_v18  ;;  %v387_v44 = vsel %vm385_vm5, %v382_v20, %v384_v32  ;;  %v326_v21 = vld [vmem:[#allocation7] sm:$0xff] }
 0x11f   : > { %v390_v22 = vpop.permute.xlu0 %389  ;;  %v392_v37 = vpop.permute.xlu1 %391 }
 0x120   : > { %415 = vrot.lane.b32.xlu1 %v337_v23, %s7159_s12  ;;  %463 = vrot.lane.b32.xlu0 %v390_v22, %s7159_s12  ;;  %v396_v39 = vsel %vm395_vm6, %v390_v22, %v392_v37 }
 0x123   : > { %v394_v38 = vpop.permute.xlu0 %393  ;;  %v400_v41 = vpop.permute.xlu1 %399 }
 0x124   : > { %425 = vrot.lane.b32.xlu1 %v348_v24, %s7159_s12  ;;  %417 = vrot.lane.b32.xlu0 %v338_v25, %s7159_s12  ;;  %v397_v45 = vsel %vm395_vm6, %v392_v37, %v394_v38  ;;  %v398_v48 = vsel %vm395_vm6, %v394_v38, %v390_v22 }
 0x127   : > { %v402_v42 = vpop.permute.xlu0 %401  ;;  %v404_v49 = vpop.permute.xlu1 %403 }
 0x128   : > { %433 = vrot.lane.b32.xlu1 %v358_v26, %s7159_s12  ;;  %427 = vrot.lane.b32.xlu0 %v349_v27, %s7159_s12  ;;  %v406_v46 = vsel %vm405_vm7, %v400_v41, %v402_v42  ;;  %v407_v50 = vsel %vm405_vm7, %v402_v42, %v404_v49  ;;  %v408_v51 = vsel %vm405_vm7, %v404_v49, %v400_v41 }
 0x12b   : > { %v414_v52 = vpop.permute.xlu1 %413  ;;  %v412_v53 = vpop.permute.xlu0 %411 }
 0x12c   : > { %423 = vrot.lane.b32.xlu1 %v347_v28, %s7159_s12  ;;  %435 = vrot.lane.b32.xlu0 %v359_v29, %s7159_s12  ;;  %v481_v7 = vsel %vm479_vm9, %v412_v53, %v414_v52  ;;  %v536_v28 = vsel %vm534_vm10, %v326_v21, 0 }
 0x12d   : > { %v538_v13 = vand.u32 4294901760, %v481_v7  ;;  %v7535_v37 = vand.u32 4294901760, %v536_v28 }
 0x12f   : > { %v410_v56 = vpop.permute.xlu0 %409 }
 0x130   : > { %441 = vrot.lane.b32.xlu1 %v367_v30, %s7159_s12  ;;  %431 = vrot.lane.b32.xlu0 %v357_v31, %s7159_s12  ;;  %v482_v61 = vsel %vm479_vm9, %v414_v52, %v410_v56  ;;  %v480_v6 = vsel %vm479_vm9, %v410_v56, %v412_v53 }
 0x131   : > { %v1212_v1 = vand.u32 4294901760, %v482_v61  ;;  %v540_v12 = vand.u32 4294901760, %v480_v6 }
 0x134   : > { %449 = vrot.lane.b32.xlu1 %v376_v33, %s7159_s12  ;;  %443 = vrot.lane.b32.xlu0 %v368_v34, %s7159_s12  ;;  %v7532_v33 = vsub.f32 %v481_v7, %v538_v13 }
 0x136   : > { %v9372_v53 = vand.u32 4294901760, %v7532_v33 }
 0x138   : > { %457 = vrot.lane.b32.xlu1 %v386_v35, %s7159_s12  ;;  %451 = vrot.lane.b32.xlu0 %v377_v36, %s7159_s12 }
 0x13c   : > { %465 = vrot.lane.b32.xlu1 %v396_v39, %s7159_s12  ;;  %453 = vrot.lane.b32.xlu0 %v378_v40, %s7159_s12 }
 0x140   : > { %461 = vrot.lane.b32.xlu1 %v388_v43, %s7159_s12  ;;  %459 = vrot.lane.b32.xlu0 %v387_v44, %s7159_s12  ;;  %v7551_v44 = vsub.f32 %v480_v6, %v540_v12  ;;  %v635_v6 = vsub.f32 %v7532_v33, %v9372_v53 }
 0x144   : > { %467 = vrot.lane.b32.xlu0 %v397_v45, %s7159_s12  ;;  %473 = vrot.lane.b32.xlu1 %v406_v46, %s7159_s12  ;;  %v7553_v45 = vsub.f32 %v482_v61, %v1212_v1 }
 0x148   : > { %469 = vrot.lane.b32.xlu0 %v398_v48, %s7159_s12  ;;  %471 = vrot.lane.b32.xlu1 %v400_v41, %s7159_s12 }
 0x14c   : > { %475 = vrot.lane.b32.xlu0 %v407_v50, %s7159_s12 }
 0x150   : > { %477 = vrot.lane.b32.xlu0 %v408_v51, %s7159_s12 }
 0x16e   : > { %v422_v58 = vpop.permute.xlu0 %421 }
 0x172   : > { %v430_v54 = vpop.permute.xlu1 %429 }
 0x17a   : > { %v438_v59 = vpop.permute.xlu0 %437 }
 0x17e   : > { %v7495_v55 = vpop.permute.xlu1 %439 }
 0x182   : > { %v7497_v57 = vpop.permute.xlu1 %445 }
 0x186   : > { %v7502_v62 = vpop.permute.xlu0 %447 }
 0x18a   : > { %v7499_v60 = vpop.permute.xlu1 %455 }
 0x18e   : > { %v420_v63 = vpop.permute.xlu1 %419 }
 0x18f   : > { %v485_v0 = vsel %vm479_vm9, %v420_v63, %v422_v58  ;;  %v9369_v58 = vand.u32 4294901760, %v7551_v44 }
 0x190   : > { %v1215_v2 = vand.u32 4294901760, %v485_v0 }
 0x192   : > { %v416_v3 = vpop.permute.xlu1 %415  ;;  %v7505_v4 = vpop.permute.xlu0 %463  ;;  %v7507_v5 = vpack.c.bf16 %v1215_v2, %v1212_v1  ;;  %v7537_v38 = vsub.f32 %v485_v0, %v1215_v2 }
 0x194   : > { %6371 = vmatpush3.bf16.msra.mxu1 %v7507_v5  ;;  %v9366_v51 = vand.u32 4294901760, %v7537_v38 }
 0x195   : > { %6372 = vmatprep.subr.bf16.mxu1 %v9374_v17 }
 0x196   : > { %v426_v8 = vpop.permute.xlu1 %425  ;;  %v418_v9 = vpop.permute.xlu0 %417  ;;  %v1306_v2 = vsub.f32 %v7537_v38, %v9366_v51 }
 0x197   : > { %v483_v10 = vsel %vm479_vm9, %v416_v3, %v418_v9  ;;  %v484_v11 = vsel %vm479_vm9, %v418_v9, %v420_v63 }
 0x198   : > { %v542_v14 = vand.u32 4294901760, %v484_v11  ;;  %v544_v15 = vand.u32 4294901760, %v483_v10 }
 0x19a   : > { %v434_v16 = vpop.permute.xlu1 %433  ;;  %v428_v18 = vpop.permute.xlu0 %427  ;;  %v7515_v19 = vpack.c.bf16 %v542_v14, %v538_v13  ;;  %v7517_v20 = vpack.c.bf16 %v544_v15, %v540_v12  ;;  %v7548_v42 = vsub.f32 %v484_v11, %v542_v14  ;;  %v7557_v48 = vsub.f32 %v483_v10, %v544_v15 }
 0x19b   : > { %v487_v22 = vsel %vm479_vm9, %v426_v8, %v428_v18  ;;  %v488_v23 = vsel %vm479_vm9, %v428_v18, %v430_v54  ;;  %v7565_v54 = vsub.f32 %v536_v28, %v7535_v37  ;;  %v641_v11 = vsub.f32 %v7551_v44, %v9369_v58 }
 0x19c   : > { %6274 = vmatprep.subr.bf16.mxu0 %v7515_v19  ;;  %v546_v31 = vand.u32 4294901760, %v487_v22  ;;  %v1218_v32 = vand.u32 4294901760, %v488_v23  ;;  %v9370_v56 = vand.u32 4294901760, %v7548_v42  ;;  %v9368_v61 = vand.u32 4294901760, %v7557_v48 }
 0x19d   : > { %6276 = vmatpush1.bf16.msra.mxu0 %v7517_v20  ;;  %v7586_v7 = vand.u32 4294901760, %v7565_v54 }
 0x19e   : > { %v424_v24 = vpop.permute.xlu1 %423  ;;  %v436_v25 = vpop.permute.xlu0 %435  ;;  %v647_v10 = vsub.f32 %v7548_v42, %v9370_v56 }
 0x19f   : > { %v7524_v26 = vsel %vm479_vm9, %v434_v16, %v436_v25  ;;  %v7527_v27 = vsel %vm479_vm9, %v436_v25, %v438_v59  ;;  %v486_v34 = vsel %vm479_vm9, %v424_v24, %v426_v8  ;;  %v9367_v59 = vand.u32 4294901760, %v7553_v45  ;;  %9469 = vst [vmem:[#allocation15_spill] sm:$0xff] %v7586_v7 }
 0x1a0   : > { %v550_v29 = vand.u32 4294901760, %v7524_v26  ;;  %v1221_v30 = vand.u32 4294901760, %v7527_v27  ;;  %v548_v46 = vand.u32 4294901760, %v486_v34  ;;  %v7588_v8 = vsub.f32 %v488_v23, %v1218_v32 }
 0x1a1   : > { %v1299_v12 = vsub.f32 %v7553_v45, %v9367_v59  ;;  %v7613_v24 = vsub.f32 %v487_v22, %v546_v31  ;;  %v624_v28 = vsub.f32 %v7565_v54, %v7586_v7 }
 0x1a2   : > { %v442_v35 = vpop.permute.xlu1 %441  ;;  %v432_v36 = vpop.permute.xlu0 %431  ;;  %v7544_v40 = vpack.c.bf16 %v550_v29, %v546_v31  ;;  %v7546_v41 = vpack.c.bf16 %v1221_v30, %v1218_v32  ;;  %v7606_v15 = vsub.f32 %v486_v34, %v548_v46  ;;  %v1307_v32 = vand.u32 4294901760, %v1306_v2 }
 0x1a3   : > { %v7540_v39 = vsel %vm479_vm9, %v432_v36, %v434_v16  ;;  %v1300_v59 = vand.u32 4294901760, %v1299_v12  ;;  %v7645_v56 = vand.u32 4294901760, %v624_v28 }
 0x1a4   : > { %v552_v43 = vand.u32 4294901760, %v7540_v39  ;;  %6278 = vmatprep.subr.bf16.mxu0 %v7544_v40  ;;  %6374 = vmatpush3.bf16.msra.mxu1 %v7546_v41 }
 0x1a5   : > { %6375 = vmatprep.subr.bf16.mxu1 %v9374_v17  ;;  %v7648_v12 = vpack.c.bf16 %v1307_v32, %v1300_v59 }
 0x1a6   : > { %v450_v49 = vpop.permute.xlu1 %449  ;;  %v444_v50 = vpop.permute.xlu0 %443  ;;  %v7561_v52 = vpack.c.bf16 %v552_v43, %v548_v46  ;;  %v7624_v46 = vsub.f32 %v7527_v27, %v1221_v30  ;;  %v7635_v27 = vsub.f32 %v7524_v26, %v550_v29  ;;  %v7638_v30 = vsub.f32 %v7540_v39, %v552_v43 }
 0x1a7   : > { %v7574_v63 = vsel %vm479_vm9, %v7502_v62, %v450_v49  ;;  %v7580_v3 = vsel %vm479_vm9, %v442_v35, %v444_v50  ;;  %v492_v62 = vsel %vm479_vm9, %v7495_v55, %v442_v35  ;;  %v653_v55 = vsub.f32 %v7557_v48, %v9368_v61 }
 0x1a8   : > { %6280 = vmatpush1.bf16.msra.mxu0 %v7561_v52  ;;  %v560_v13 = vand.u32 4294901760, %v7574_v63  ;;  %v7610_v16 = vsel %vm479_vm9, %v444_v50, %v7497_v57  ;;  %v554_v18 = vand.u32 4294901760, %v7580_v3  ;;  %v556_v25 = vand.u32 4294901760, %v492_v62 }
 0x1a9   : > { %v9371_v35 = vand.u32 4294901760, %v7588_v8  ;;  %v648_v57 = vand.u32 4294901760, %v647_v10  ;;  %v9373_v50 = vand.u32 4294901760, %v7606_v15  ;;  %v642_v61 = vand.u32 4294901760, %v641_v11 }
 0x1aa   : > { %v458_v0 = vpop.permute.xlu1 %457  ;;  %v452_v1 = vpop.permute.xlu0 %451  ;;  %v7628_v31 = vpack.c.bf16 %v560_v13, %v556_v25  ;;  %v9379_v29 = vand.u32 4294901760, %v7624_v46  ;;  %v7665_v59 = vsub.f32 %v492_v62, %v556_v25  ;;  %v9383_v53 = vand.u32 4294901760, %v7635_v27 }
 0x1ab   : > { %v496_v9 = vsel %vm479_vm9, %v450_v49, %v452_v1  ;;  %v1224_v49 = vand.u32 4294901760, %v7610_v16  ;;  %v7653_v26 = vsub.f32 %v7588_v8, %v9371_v35  ;;  %v498_v11 = vsel %vm479_vm9, %v7499_v60, %v458_v0 }
 0x1ac   : > { %v558_v14 = vand.u32 4294901760, %v496_v9  ;;  %v9382_v35 = vand.u32 4294901760, %v7638_v30  ;;  %v9474_v7 = vand.u32 4294901760, %v7665_v59 }
 0x1ae   : > { %v466_v21 = vpop.permute.xlu1 %465  ;;  %v454_v23 = vpop.permute.xlu0 %453  ;;  %v7621_v36 = vpack.c.bf16 %v558_v14, %v554_v18 }
 0x1af   : > { %v7619_v34 = vsel %vm479_vm9, %v452_v1, %v454_v23  ;;  %v636_v1 = vand.u32 4294901760, %v635_v6  ;;  %v654_v23 = vand.u32 4294901760, %v653_v55  ;;  %v501_v58 = vsel %vm479_vm9, %v7505_v4, %v466_v21 }
 0x1b0   : > { %v1227_v22 = vand.u32 4294901760, %v7619_v34  ;;  %6282 = vmatprep.subr.bf16.mxu0 %v7621_v36  ;;  %v9378_v6 = vand.u32 4294901760, %v7613_v24  ;;  %v7663_v4 = vsub.f32 %v7606_v15, %v9373_v50  ;;  %v7675_v50 = vsub.f32 %v496_v9, %v558_v14 }
 0x1b1   : > { %6284 = vmatpush1.bf16.msra.mxu0 %v7628_v31  ;;  %v7658_v43 = vpack.c.bf16 %v648_v57, %v636_v1  ;;  %v7670_v32 = vpack.c.bf16 %v654_v23, %v642_v61  ;;  %v568_v57 = vand.u32 4294901760, %v501_v58  ;;  %v7684_v61 = vsub.f32 %v7580_v3, %v554_v18 }
 0x1b2   : > { %v462_v2 = vpop.permute.xlu1 %461  ;;  %v460_v51 = vpop.permute.xlu0 %459  ;;  %v7641_v10 = vpack.c.bf16 %v1227_v22, %v1224_v49  ;;  %v659_v60 = vsub.f32 %v7613_v24, %v9378_v6  ;;  %v564_v23 = vand.u32 4294901760, %v498_v11  ;;  %v7691_v9 = vsub.f32 %v7624_v46, %v9379_v29 }
 0x1b3   : > { %v499_v39 = vsel %vm479_vm9, %v458_v0, %v460_v51  ;;  %v7681_v0 = vsub.f32 %v7574_v63, %v560_v13  ;;  %v677_v63 = vsub.f32 %v7638_v30, %v9382_v35  ;;  %v671_v18 = vsub.f32 %v7635_v27, %v9383_v53 }
 0x1b4   : > { %9470 = vst [vmem:[#allocation16_spill] sm:$0xff] %v7641_v10  ;;  %6377 = vmatpush3.bf16.msra.mxu1 %v7641_v10  ;;  %v562_v62 = vand.u32 4294901760, %v499_v39  ;;  %v7711_v35 = vsub.f32 %v7610_v16, %v1224_v49  ;;  %v7716_v53 = vsub.f32 %v7619_v34, %v1227_v22  ;;  %v7726_v16 = vsub.f32 %v7665_v59, %v9474_v7 }
 0x1b5   : > { %6378 = vmatprep.subr.bf16.mxu1 %v9374_v17  ;;  %v500_v17 = vsel %vm479_vm9, %v460_v51, %v462_v2  ;;  %v7700_v51 = vpack.c.bf16 %v568_v57, %v564_v23  ;;  %v7728_v49 = vsub.f32 %v501_v58, %v568_v57  ;;  %v678_v14 = vand.u32 4294901760, %v677_v63 }
 0x1b6   : > { %v474_v55 = vpop.permute.xlu1 %473  ;;  %v468_v28 = vpop.permute.xlu0 %467  ;;  %v1230_v2 = vand.u32 4294901760, %v500_v17  ;;  %v9475_v22 = vand.u32 4294901760, %v7675_v50  ;;  %v7742_v57 = vsub.f32 %v498_v11, %v564_v23  ;;  %v9477_v63 = vmov 0.0  }
 0x1b7   : > { %v502_v1 = vsel %vm479_vm9, %v466_v21, %v468_v28  ;;  %v666_v21 = vand.u32 4294901760, %v7663_v4  ;;  %9472 = vst [vmem:[#allocation18_spill] sm:$0xff] %v7700_v51  ;;  %v9392_v11 = vand.u32 4294901760, %v7728_v49 }
 0x1b8   : > { %v566_v25 = vand.u32 4294901760, %v502_v1  ;;  %v7756_v23 = vsub.f32 %v500_v17, %v1230_v2 }
 0x1ba   : > { %v470_v47 = vpop.permute.xlu0 %469  ;;  %v7694_v6 = vpack.c.bf16 %v566_v25, %v562_v62  ;;  %v472_v3 = vpop.permute.xlu1 %471  ;;  %v7705_v4 = vsub.f32 %v502_v1, %v566_v25  ;;  %v7718_v1 = vsub.f32 %v499_v39, %v562_v62  ;;  %v695_v39 = vsub.f32 %v7675_v50, %v9475_v22 }
 0x1bb   : > { %v503_v13 = vsel %vm479_vm9, %v468_v28, %v470_v47  ;;  %v660_v47 = vand.u32 4294901760, %v659_v60  ;;  %v504_v25 = vsel %vm479_vm9, %v472_v3, %v474_v55  ;;  %v672_v28 = vand.u32 4294901760, %v671_v18 }
 0x1bc   : > { %9471 = vst [vmem:[#allocation17_spill] sm:$0xff] %v7694_v6  ;;  %v1233_v29 = vand.u32 4294901760, %v503_v13  ;;  %6286 = vmatprep.subr.bf16.mxu0 %v7694_v6  ;;  %v9476_v3 = vand.u32 4294901760, %v7681_v0  ;;  %v9478_v62 = vand.u32 4294901760, %v7684_v61 }
 0x1bd   : > { %6288 = vmatpush1.bf16.msra.mxu0 %v7700_v51  ;;  %v6293_v18 = vpack.c.bf16 %v672_v28, %v660_v47  ;;  %v1314_v47 = vand.u32 4294901760, %v7653_v26  ;;  %v1321_v28 = vand.u32 4294901760, %v7691_v9  ;;  %v9482_v26 = vand.u32 4294901760, %v7711_v35 }
 0x1be   : > { %v476_v10 = vpop.permute.xlu0 %475  ;;  %v7721_v6 = vpack.c.bf16 %v1233_v29, %v1230_v2  ;;  %v701_v7 = vsub.f32 %v7681_v0, %v9476_v3  ;;  %v683_v51 = vsub.f32 %v7684_v61, %v9478_v62  ;;  %v696_v62 = vand.u32 4294901760, %v695_v39 }
 0x1bf   : > { %v505_v60 = vsel %vm479_vm9, %v474_v55, %v476_v10  ;;  %v7744_v55 = vand.u32 4294901760, %v504_v25  ;;  %v9479_v3 = vand.u32 4294901760, %v7705_v4  ;;  %v9393_v2 = vand.u32 4294901760, %v7742_v57 }
 0x1c0   : > { %9473 = vst [vmem:[#allocation19_spill] sm:$0xff] %v7721_v6  ;;  %v7731_v34 = vand.u32 4294901760, %v505_v60  ;;  %6380 = vmatpush3.bf16.msra.mxu1 %v7721_v6  ;;  %v7748_v6 = vsub.f32 %v503_v13, %v1233_v29  ;;  %v725_v9 = vsub.f32 %v7728_v49, %v9392_v11 }
 0x1c1   : > { %5881 = vmatprep.subr.mxu1 %v9477_v63  ;;  %v719_v17 = vsub.f32 %v7705_v4, %v9479_v3  ;;  %v9481_v3 = vand.u32 4294901760, %v7718_v1 }
 0x1c2   : > { %571 = vmatprep.subr.mxu0 %v7731_v34  ;;  %v478_v22 = vpop.permute.xlu0 %477  ;;  %v7761_v29 = vsub.f32 %v505_v60, %v7731_v34 }
 0x1c3   : > { %v506_v58 = vsel %vm479_vm9, %v476_v10, %v478_v22  ;;  %573 = vmatpush1.msra.mxu0 %v7744_v55  ;;  %v6295_v10 = vpack.c.bf16 %v678_v14, %v666_v21  ;;  %v684_v22 = vand.u32 4294901760, %v683_v51  ;;  %v1327_v21 = vsub.f32 %v7711_v35, %v9482_v26 }
 0x1c4   : > { %v7763_v13 = vand.u32 4294901760, %v506_v58  ;;  %6290 = vmatprep.subr.bf16.mxu0 %v7658_v43  ;;  %626 = vmatmul.mubr.f32.vlgmr.msra.gmra.mrb[0].mxu0 %v7645_v56  ;;  %v9480_v43 = vand.u32 4294901760, %v7716_v53  ;;  %v7790_v14 = vsub.f32 %v504_v25, %v7744_v55  ;;  %v702_v51 = vand.u32 4294901760, %v701_v7 }
 0x1c5   : > { %6292 = vmatpush1.bf16.msra.mxu0 %v7670_v32  ;;  %786 = vmatprep.mubr.f32.mxu0 %v9477_v63  ;;  %v707_v32 = vsub.f32 %v7718_v1, %v9481_v3  ;;  %v6297_v3 = vpack.c.bf16 %v696_v62, %v684_v22  ;;  %v720_v39 = vand.u32 4294901760, %v719_v17  ;;  %v713_v25 = vsub.f32 %v7742_v57, %v9393_v2 }
 0x1c6   : > { %v1334_v60 = vsub.f32 %v7716_v53, %v9480_v43  ;;  %6294 = vmatprep.subr.bf16.mxu0 %v6293_v18  ;;  %5882 = vmatpush3.msra.mxu1 %v7763_v13  ;;  %v9483_v43 = vmov 0.0|0.0   ;;  %v690_v7 = vand.u32 4294901760, %v7726_v16  ;;  %v7808_v17 = vsub.f32 %v506_v58, %v7763_v13 }
 0x1c7   : > { %6381 = vmatprep.subr.bf16.mxu1 %v9483_v43  ;;  %5884 = vmatmul.mubr.f32.vlgmr.msra.gmra.mrb[0].mxu1 %v7645_v56  ;;  %v6385_v56 = vpack.c.bf16 %v1321_v28, %v1314_v47  ;;  %v708_v22 = vand.u32 4294901760, %v707_v32  ;;  %v736_v26 = vand.u32 4294901760, %v7790_v14  ;;  %v726_v2 = vand.u32 4294901760, %v725_v9 }
 0x1c8   : > { %6383 = vmatpush3.bf16.msra.mxu1 %v7648_v12  ;;  %5904 = vmatprep.mubr.msk.f32.mxu1 %vm7162_vm8, %v9477_v63  ;;  %v1335_v11 = vand.u32 4294901760, %v1334_v60  ;;  %v9484_v12 = vand.u32 4294901760, %v7748_v6  ;;  %v6299_v18 = vpack.c.bf16 %v702_v51, %v690_v7  ;;  %v1328_v28 = vand.u32 4294901760, %v1327_v21 }
 0x1c9   : > { %6296 = vmatpush1.bf16.msra.mxu0 %v6295_v10  ;;  %6384 = vmatprep.subr.bf16.mxu1 %v9483_v43  ;;  %v9485_v10 = vand.u32 4294901760, %v7756_v23  ;;  %v6301_v16 = vpack.c.bf16 %v720_v39, %v708_v22  ;;  %v9486_v60 = vand.u32 4294901760, %v7761_v29  ;;  %v714_v58 = vand.u32 4294901760, %v713_v25 }
 0x1ca   : > { %v1348_v62 = vsub.f32 %v7748_v6, %v9484_v12  ;;  %6298 = vmatprep.subr.bf16.mxu0 %v6297_v3  ;;  %v1354_v3 = vand.u32 4294901760, %v7808_v17  ;;  %v6388_v9 = vpack.c.bf16 %v1335_v11, %v1328_v28  ;;  %v737_v51 = vsub.f32 %v7790_v14, %v736_v26 }
 0x1cb   : > { %v1341_v47 = vsub.f32 %v7756_v23, %v9485_v10  ;;  %v731_v12 = vsub.f32 %v7761_v29, %v9486_v60  ;;  %v6305_v11 = vpack.c.bf16 %v7548_v42, %v7532_v33  ;;  %v6394_v10 = vpack.c.bf16 %v7537_v38, %v7553_v45 }
 0x1cc   : > { %6386 = vmatpush3.bf16.msra.mxu1 %v6385_v56  ;;  %v1349_v32 = vand.u32 4294901760, %v1348_v62  ;;  %v6303_v56 = vpack.c.bf16 %v726_v2, %v714_v58  ;;  %v738_v7 = vand.u32 4294901760, %v737_v51  ;;  %v6307_v2 = vpack.c.bf16 %v7557_v48, %v7551_v44  ;;  %v9487_v51 = vld [vmem:[#allocation17_spill] sm:$0xff] }
 0x1cd   : > { %6300 = vmatpush1.bf16.msra.mxu0 %v6299_v18  ;;  %6387 = vmatprep.subr.bf16.mxu1 %v9483_v43  ;;  %v732_v39 = vand.u32 4294901760, %v731_v12  ;;  %v1342_v21 = vand.u32 4294901760, %v1341_v47  ;;  %v1355_v18 = vsub.f32 %v7808_v17, %v1354_v3  ;;  %v6309_v62 = vpack.c.bf16 %v7635_v27, %v7613_v24 }
 0x1ce   : > { %6302 = vmatprep.subr.bf16.mxu0 %v6301_v16  ;;  %v6311_v47 = vpack.c.bf16 %v7638_v30, %v7606_v15  ;;  %v6313_v16 = vpack.c.bf16 %v7675_v50, %v7684_v61  ;;  %v6397_v28 = vpack.c.bf16 %v7624_v46, %v7588_v8  ;;  %v6315_v60 = vpack.c.bf16 %v7681_v0, %v7665_v59 }
 0x1cf   : > { %v6391_v25 = vpack.c.bf16 %v1349_v32, %v1342_v21  ;;  %v1356_v22 = vand.u32 4294901760, %v1355_v18  ;;  %v6317_v12 = vpack.c.bf16 %v7705_v4, %v7718_v1  ;;  %v6400_v58 = vpack.c.bf16 %v7716_v53, %v7711_v35 }
 0x1d0   : > { %6389 = vmatpush3.bf16.msra.mxu1 %v6388_v9  ;;  %v6319_v32 = vpack.c.bf16 %v7728_v49, %v7742_v57  ;;  %v6403_v9 = vpack.c.bf16 %v7748_v6, %v7756_v23  ;;  %v9491_v21 = vand.u32 4294901760, %v7532_v33  ;;  %v9492_v18 = vand.u32 4294901760, %v7548_v42 }
 0x1d1   : > { %6304 = vmatpush1.bf16.msra.mxu0 %v6303_v56  ;;  %6390 = vmatprep.subr.bf16.mxu1 %v9483_v43  ;;  %v9489_v56 = vld [vmem:[#allocation18_spill] sm:$0xff]  ;;  %v9498_v42 = vand.u32 4294901760, %v7553_v45  ;;  %v9505_v45 = vand.u32 4294901760, %v7624_v46  ;;  %v9511_v46 = vand.u32 4294901760, %v7716_v53 }
 0x1d2   : > { %733 = vmatprep.subr.mxu0 %v732_v39  ;;  %v9490_v39 = vld [vmem:[#allocation19_spill] sm:$0xff] }
 0x1d4   : > { %6392 = vmatpush3.bf16.msra.mxu1 %v6391_v25  ;;  %v6337_v25 = vpack.c.bf16 %v9492_v18, %v9491_v21  ;;  %v9516_v18 = vand.u32 4294901760, %v7748_v6 }
 0x1d5   : > { %739 = vmatpush1.msra.mxu0 %v738_v7  ;;  %5902 = vmatprep.subr.mxu1 %v9477_v63  ;;  %v9493_v7 = vand.u32 4294901760, %v7551_v44  ;;  %v9499_v44 = vand.u32 4294901760, %v7537_v38  ;;  %v9504_v38 = vand.u32 4294901760, %v7588_v8  ;;  %v9510_v8 = vand.u32 4294901760, %v7711_v35 }
 0x1d6   : > { %6306 = vmatprep.subr.bf16.mxu0 %v6305_v11  ;;  %788 = vmatmul.mubr.f32.vlgmr.msra.gmra.mrb[0].mxu0 %v7535_v37  ;;  %v9494_v11 = vand.u32 4294901760, %v7557_v48 }
 0x1d7   : > { %6308 = vmatpush1.bf16.msra.mxu0 %v6307_v2  ;;  %894 = vmatprep.mubr.f32.mxu0 %v9477_v63  ;;  %v6418_v48 = vpack.c.bf16 %v9499_v44, %v9498_v42 }
 0x1d8   : > { %6310 = vmatprep.subr.bf16.mxu0 %v6309_v62  ;;  %5903 = vmatpush3.msra.mxu1 %v1356_v22  ;;  %v6339_v2 = vpack.c.bf16 %v9494_v11, %v9493_v7  ;;  %v9495_v62 = vld [vmem:[#allocation15_spill] sm:$0xff]  ;;  %v9496_v22 = vand.u32 4294901760, %v7613_v24  ;;  %v9500_v24 = vand.u32 4294901760, %v7606_v15  ;;  %v6421_v15 = vpack.c.bf16 %v9505_v45, %v9504_v38 }
 0x1d9   : > { %6393 = vmatprep.subr.bf16.mxu1 %v9483_v43  ;;  %5905 = vmatmul.mubr.f32.vlgmr.msra.gmra.mrb[0].mxu1 %v7535_v37 }
 0x1da   : > { %6395 = vmatpush3.bf16.msra.mxu1 %v6394_v10  ;;  %5925 = vmatprep.mubr.msk.f32.mxu1 %vm7162_vm8, %v9477_v63  ;;  %v9497_v10 = vand.u32 4294901760, %v7635_v27  ;;  %v9501_v27 = vand.u32 4294901760, %v7638_v30  ;;  %v9506_v30 = vand.u32 4294901760, %v7665_v59  ;;  %v9512_v59 = vand.u32 4294901760, %v7742_v57 }
 0x1db   : > { %6312 = vmatpush1.bf16.msra.mxu0 %v6311_v47  ;;  %6396 = vmatprep.subr.bf16.mxu1 %v9483_v43 }
 0x1dc   : > { %6314 = vmatprep.subr.bf16.mxu0 %v6313_v16  ;;  %v6341_v33 = vpack.c.bf16 %v9497_v10, %v9496_v22  ;;  %v6343_v47 = vpack.c.bf16 %v9501_v27, %v9500_v24  ;;  %v9502_v16 = vand.u32 4294901760, %v7684_v61 }
 0x1de   : > { %6398 = vmatpush3.bf16.msra.mxu1 %v6397_v28  ;;  %v9503_v28 = vand.u32 4294901760, %v7675_v50  ;;  %v9508_v50 = vand.u32 4294901760, %v7718_v1  ;;  %v9515_v1 = vand.u32 4294901760, %v7756_v23 }
 0x1df   : > { %6316 = vmatpush1.bf16.msra.mxu0 %v6315_v60  ;;  %6399 = vmatprep.subr.bf16.mxu1 %v9483_v43 }
 0x1e0   : > { %6318 = vmatprep.subr.bf16.mxu0 %v6317_v12  ;;  %v6345_v60 = vpack.c.bf16 %v9503_v28, %v9502_v16  ;;  %v9507_v12 = vand.u32 4294901760, %v7681_v0  ;;  %v9513_v0 = vand.u32 4294901760, %v7728_v49  ;;  %v6427_v35 = vpack.c.bf16 %v9516_v18, %v9515_v1 }
 0x1e2   : > { %6401 = vmatpush3.bf16.msra.mxu1 %v6400_v58  ;;  %v6347_v61 = vpack.c.bf16 %v9507_v12, %v9506_v30  ;;  %v9509_v58 = vand.u32 4294901760, %v7705_v4  ;;  %v6351_v21 = vpack.c.bf16 %v9513_v0, %v9512_v59  ;;  %v9514_v4 = vand.u32 4294901760, %v7761_v29 }
 0x1e3   : > { %6320 = vmatpush1.bf16.msra.mxu0 %v6319_v32  ;;  %6402 = vmatprep.subr.bf16.mxu1 %v9483_v43 }
 0x1e4   : > { %844 = vmatprep.subr.mxu0 %v7761_v29  ;;  %v6349_v32 = vpack.c.bf16 %v9509_v58, %v9508_v50 }
 0x1e6   : > { %6404 = vmatpush3.bf16.msra.mxu1 %v6403_v9  ;;  %v6424_v9 = vpack.c.bf16 %v9511_v46, %v9510_v8 }
 0x1e7   : > { %847 = vmatpush1.msra.mxu0 %v7790_v14  ;;  %5923 = vmatprep.subr.mxu1 %v9477_v63 }
 0x1e8   : > { %6322 = vmatprep.subr.bf16.mxu0 %v7515_v19  ;;  %897 = vmatmul.mubr.f32.vlgmr.msra.gmra.mrb[0].mxu0 %v7565_v54 }
 0x1e9   : > { %6324 = vmatpush1.bf16.msra.mxu0 %v7517_v20  ;;  %985 = vmatprep.mubr.f32.mxu0 %v9477_v63 }
 0x1ea   : > { %6326 = vmatprep.subr.bf16.mxu0 %v7544_v40  ;;  %5924 = vmatpush3.msra.mxu1 %v7808_v17 }
 0x1eb   : > { %6405 = vmatprep.subr.bf16.mxu1 %v9483_v43  ;;  %5926 = vmatmul.mubr.f32.vlgmr.msra.gmra.mrb[0].mxu1 %v7565_v54  ;;  %v9488_v54 = vld [vmem:[#allocation16_spill] sm:$0xff] }
 0x1ec   : > { %6407 = vmatpush3.bf16.msra.mxu1 %v7507_v5  ;;  %5946 = vmatprep.mubr.msk.f32.mxu1 %vm7162_vm8, %v9477_v63 }
 0x1ed   : > { %6328 = vmatpush1.bf16.msra.mxu0 %v7561_v52  ;;  %6408 = vmatprep.subr.bf16.mxu1 %v9483_v43 }
 0x1ee   : > { %6330 = vmatprep.subr.bf16.mxu0 %v7621_v36 }
 0x1f0   : > { %6410 = vmatpush3.bf16.msra.mxu1 %v7546_v41 }
 0x1f1   : > { %6332 = vmatpush1.bf16.msra.mxu0 %v7628_v31  ;;  %6411 = vmatprep.subr.bf16.mxu1 %v9483_v43 }
 0x1f2   : > { %6334 = vmatprep.subr.bf16.mxu0 %v9487_v51 }
 0x1f4   : > { %6413 = vmatpush3.bf16.msra.mxu1 %v9488_v54 }
 0x1f5   : > { %6336 = vmatpush1.bf16.msra.mxu0 %v9489_v56  ;;  %6414 = vmatprep.subr.bf16.mxu1 %v9483_v43 }
 0x1f6   : > { %936 = vmatprep.subr.mxu0 %v7731_v34 }
 0x1f8   : > { %6416 = vmatpush3.bf16.msra.mxu1 %v9490_v39 }
 0x1f9   : > { %938 = vmatpush1.msra.mxu0 %v7744_v55  ;;  %5944 = vmatprep.subr.mxu1 %v9477_v63 }
 0x1fa   : > { %6338 = vmatprep.subr.bf16.mxu0 %v6337_v25  ;;  %989 = vmatmul.mubr.f32.vlgmr.msra.gmra.mrb[0].mxu0 %v9495_v62 }
 0x1fb   : > { %6340 = vmatpush1.bf16.msra.mxu0 %v6339_v2  ;;  %1113 = vmatprep.mubr.f32.mxu0 %v9477_v63 }
 0x1fc   : > { %6342 = vmatprep.subr.bf16.mxu0 %v6341_v33  ;;  %5945 = vmatpush3.msra.mxu1 %v7763_v13 }
 0x1fd   : > { %6417 = vmatprep.subr.bf16.mxu1 %v9483_v43  ;;  %5947 = vmatmul.mubr.f32.vlgmr.msra.gmra.mrb[0].mxu1 %v9495_v62 }
 0x1fe   : > { %6419 = vmatpush3.bf16.msra.mxu1 %v6418_v48  ;;  %5967 = vmatprep.mubr.msk.f32.mxu1 %vm7162_vm8, %v9477_v63 }
 0x1ff   : > { %6344 = vmatpush1.bf16.msra.mxu0 %v6343_v47  ;;  %6420 = vmatprep.subr.bf16.mxu1 %v9483_v43 }
 0x200   : > { %6346 = vmatprep.subr.bf16.mxu0 %v6345_v60 }
 0x202   : > { %6422 = vmatpush3.bf16.msra.mxu1 %v6421_v15 }
 0x203   : > { %6348 = vmatpush1.bf16.msra.mxu0 %v6347_v61  ;;  %6423 = vmatprep.subr.bf16.mxu1 %v9483_v43 }
 0x204   : > { %6350 = vmatprep.subr.bf16.mxu0 %v6349_v32 }
 0x206   : > { %6425 = vmatpush3.bf16.msra.mxu1 %v6424_v9 }
 0x207   : > { %6352 = vmatpush1.bf16.msra.mxu0 %v6351_v21  ;;  %6426 = vmatprep.subr.bf16.mxu1 %v9483_v43 }
 0x208   : > { %1062 = vmatprep.subr.mxu0 %v9514_v4 }
 0x20a   : > { %6428 = vmatpush3.bf16.msra.mxu1 %v6427_v35 }
 0x20b   : > { %1066 = vmatpush1.msra.mxu0 %v736_v26  ;;  %5965 = vmatprep.subr.mxu1 %v9477_v63 }
 0x20c   : > { %6354 = vmatprep.subr.bf16.mxu0 %v7515_v19  ;;  %1115 = vmatmul.mubr.f32.vlgmr.msra.gmra.mrb[0].mxu0 %v7535_v37 }
 0x20d   : > { %6356 = vmatpush1.bf16.msra.mxu0 %v7517_v20  ;;  %1203 = vmatprep.mubr.f32.mxu0 %v9477_v63 }
 0x20e   : > { %6358 = vmatprep.subr.bf16.mxu0 %v7544_v40  ;;  %5966 = vmatpush3.msra.mxu1 %v1354_v3 }
 0x20f   : > { %6429 = vmatprep.subr.bf16.mxu1 %v9483_v43  ;;  %5968 = vmatmul.mubr.f32.vlgmr.msra.gmra.mrb[0].mxu1 %v7535_v37 }
 0x210   : > { %6431 = vmatpush3.bf16.msra.mxu1 %v7507_v5  ;;  %5988 = vmatprep.mubr.msk.f32.mxu1 %vm7162_vm8, %v9477_v63  ;;  %v311_v5 = vlaneseq }
 0x211   : > { %6360 = vmatpush1.bf16.msra.mxu0 %v7561_v52  ;;  %6432 = vmatprep.subr.bf16.mxu1 %v9483_v43 }
 0x212   : > { %6362 = vmatprep.subr.bf16.mxu0 %v7621_v36  ;;  %v312_v19 = vshrl.u32 %v311_v5, 7 }
 0x214   : > { %6434 = vmatpush3.bf16.msra.mxu1 %v7546_v41  ;;  %v321_v20 = vsub.s32 2, %v312_v19  ;;  %v309_v41 = vld [vmem:[#allocation5] sm:$0x7]  ;;  %v317_v23 = vsub.s32 1, %v312_v19 }
 0x215   : > { %6364 = vmatpush1.bf16.msra.mxu0 %v7628_v31  ;;  %6435 = vmatprep.subr.bf16.mxu1 %v9483_v43 }
 0x216   : > { %6366 = vmatprep.subr.bf16.mxu0 %v9487_v51  ;;  %v7984_v53 = vrot.slane %v309_v41, %v321_v20  ;;  %v8006_v29 = vrot.slane %v309_v41, %v317_v23 }
 0x218   : > { %6437 = vmatpush3.bf16.msra.mxu1 %v9488_v54  ;;  %9517 = vst [vmem:[#allocation17_spill] sm:$0xff] %v7984_v53  ;;  %9519 = vst [vmem:[#allocation18_spill] sm:$0xff] %v8006_v29 }
 0x219   : > { %6368 = vmatpush1.bf16.msra.mxu0 %v9489_v56  ;;  %6438 = vmatprep.subr.bf16.mxu1 %v9483_v43 }
 0x21a   : > { %1154 = vmatprep.subr.mxu0 %v7731_v34 }
 0x21c   : > { %6440 = vmatpush3.bf16.msra.mxu1 %v9490_v39 }
 0x21d   : > { %1156 = vmatpush1.msra.mxu0 %v7744_v55  ;;  %5986 = vmatprep.subr.mxu1 %v9477_v63 }
 0x21e   : > { %1205 = vmatmul.mubr.f32.vlgmr.msra.gmra.mrb[0].mxu0 %v7535_v37 }
 0x21f   : > { %2051 = vmatprep.mubr.f32.mxu0 %v9477_v63 }
 0x220   : > { %5987 = vmatpush3.msra.mxu1 %v7763_v13 }
 0x221   : > { %5989 = vmatmul.mubr.f32.vlgmr.msra.gmra.mrb[0].mxu1 %v7535_v37  ;;  %6537 = vmatprep.subr.bf16.mxu1 %v9483_v43  ;;  %v313_v37 = vsub.s32 0, %v312_v19 }
 0x222   : > { %6009 = vmatprep.mubr.msk.f32.mxu1 %vm7162_vm8, %v9477_v63 }
 0x223   : > { %v7993_v34 = vrot.slane %v309_v41, %v313_v37 }
 0x225   : > { %9518 = vst [vmem:[#allocation16_spill] sm:$0xff] %v7993_v34 }
 0x2f1   : > { %v1206_v40 = vpop.f32.mrb[0].mxu0 }
 0x2f2   : > { %v1208_v52 = vpop.f32.mrb[1].mxu0  ;;  %v1761_v57 = vmax.f32 %v1206_v40, 0.0 }
 0x2f3   : > { %v1762_v13 = vmax.f32 %v1208_v52, 0.0 }
 0x2f4   : > { %v1757_v36 = vpop.f32.mrb[0].mxu1  ;;  %v1764_v55 = vmul.f32 %v1761_v57, %v7993_v34 }
 0x2f5   : > { %v1763_v31 = vmax.f32 %v1757_v36, 0.0  ;;  %v5990_v6 = vpop.f32.mrb[1].mxu1  ;;  %v1765_v14 = vmul.f32 %v1762_v13, %v8006_v29 }
 0x2f7   : > { %v1766_v49 = vmul.f32 %v1763_v31, %v7984_v53 }
 0x2f9   : > { %1780 = vrot.lane.b32.xlu0 %v1766_v49, %s7152_s27  ;;  %1771 = vrot.lane.b32.xlu1 %v1766_v49, %s7151_s29 }
 0x2fd   : > { %1802 = vrot.lane.b32.xlu0 %v1766_v49, %s7154_s16  ;;  %1789 = vrot.lane.b32.xlu1 %v1766_v49, %s7153_s13 }
 0x301   : > { %1819 = vrot.lane.b32.xlu0 %v1766_v49, %s7156_s19  ;;  %1810 = vrot.lane.b32.xlu1 %v1766_v49, %s7155_s9 }
 0x305   : > { %1837 = vrot.lane.b32.xlu0 %v1766_v49, %s7158_s8  ;;  %1828 = vrot.lane.b32.xlu1 %v1766_v49, %s7157_s15 }
 0x309   : > { %1773 = vrot.lane.b32.xlu0 %v1764_v55, %s7151_s29  ;;  %1842 = vrot.lane.b32.xlu1 %v1766_v49, %s7159_s12 }
 0x30d   : > { %1791 = vrot.lane.b32.xlu0 %v1764_v55, %s7153_s13  ;;  %1782 = vrot.lane.b32.xlu1 %v1764_v55, %s7152_s27 }
 0x311   : > { %1798 = vrot.lane.b32.xlu0 %v1764_v55, %s7154_s16  ;;  %1806 = vrot.lane.b32.xlu1 %v1764_v55, %s7155_s9 }
 0x315   : > { %1815 = vrot.lane.b32.xlu0 %v1764_v55, %s7156_s19  ;;  %1824 = vrot.lane.b32.xlu1 %v1764_v55, %s7157_s15 }
 0x319   : > { %1833 = vrot.lane.b32.xlu0 %v1764_v55, %s7158_s8  ;;  %1844 = vrot.lane.b32.xlu1 %v1764_v55, %s7159_s12 }
 0x31d   : > { %1784 = vrot.lane.b32.xlu0 %v1765_v14, %s7152_s27  ;;  %1775 = vrot.lane.b32.xlu1 %v1765_v14, %s7151_s29 }
 0x321   : > { %1808 = vrot.lane.b32.xlu0 %v1765_v14, %s7155_s9  ;;  %1793 = vrot.lane.b32.xlu1 %v1765_v14, %s7153_s13 }
 0x325   : > { %1826 = vrot.lane.b32.xlu0 %v1765_v14, %s7157_s15  ;;  %1800 = vrot.lane.b32.xlu1 %v1765_v14, %s7154_s16 }
 0x329   : > { %1846 = vrot.lane.b32.xlu0 %v1765_v14, %s7159_s12  ;;  %1817 = vrot.lane.b32.xlu1 %v1765_v14, %s7156_s19 }
 0x32d   : > { %1835 = vrot.lane.b32.xlu1 %v1765_v14, %s7158_s8 }
 0x36b   : > { %v1781_v26 = vpop.permute.xlu0 %1780  ;;  %v1772_v17 = vpop.permute.xlu1 %1771 }
 0x36c   : > { %1862 = vrot.lane.b32.xlu0 %v1781_v26, %s7159_s12  ;;  %1854 = vrot.lane.b32.xlu1 %v1772_v17, %s7159_s12 }
 0x36f   : > { %v1803_v3 = vpop.permute.xlu0 %1802  ;;  %v1790_v51 = vpop.permute.xlu1 %1789 }
 0x370   : > { %1878 = vrot.lane.b32.xlu0 %v1803_v3, %s7159_s12  ;;  %1870 = vrot.lane.b32.xlu1 %v1790_v51, %s7159_s12 }
 0x373   : > { %v1820_v54 = vpop.permute.xlu0 %1819  ;;  %v1811_v56 = vpop.permute.xlu1 %1810 }
 0x377   : > { %v8024_v39 = vpop.permute.xlu0 %1837  ;;  %v1829_v25 = vpop.permute.xlu1 %1828 }
 0x37b   : > { %v1774_v7 = vpop.permute.xlu0 %1773  ;;  %v8026_v11 = vpop.permute.xlu1 %1842 }
 0x37c   : > { %v1777_v44 = vsel %vm336_vm0, %v1772_v17, %v1774_v7 }
 0x37f   : > { %v1792_v2 = vpop.permute.xlu0 %1791  ;;  %v1783_v62 = vpop.permute.xlu1 %1782 }
 0x380   : > { %v1795_v48 = vsel %vm356_vm2, %v1790_v51, %v1792_v2  ;;  %v1786_v27 = vsel %vm346_vm1, %v1781_v26, %v1783_v62 }
 0x383   : > { %v1799_v22 = vpop.permute.xlu0 %1798  ;;  %v1807_v10 = vpop.permute.xlu1 %1806 }
 0x384   : > { %1872 = vrot.lane.b32.xlu0 %v1799_v22, %s7159_s12  ;;  %1880 = vrot.lane.b32.xlu1 %v1807_v10, %s7159_s12  ;;  %v1814_v47 = vsel %vm375_vm4, %v1811_v56, %v1807_v10 }
 0x387   : > { %v1816_v33 = vpop.permute.xlu0 %1815  ;;  %v1825_v42 = vpop.permute.xlu1 %1824 }
 0x388   : > { %1888 = vrot.lane.b32.xlu0 %v1816_v33, %s7159_s12  ;;  %1896 = vrot.lane.b32.xlu1 %v1825_v42, %s7159_s12  ;;  %v1823_v28 = vsel %vm385_vm5, %v1820_v54, %v1816_v33  ;;  %v1832_v38 = vsel %vm395_vm6, %v1829_v25, %v1825_v42 }
 0x38b   : > { %v8036_v24 = vpop.permute.xlu1 %1844  ;;  %v1834_v16 = vpop.permute.xlu0 %1833 }
 0x38c   : > { %1848 = vrot.lane.b32.xlu0 %v1777_v44, %s7159_s12  ;;  %1864 = vrot.lane.b32.xlu1 %v1795_v48, %s7159_s12  ;;  %v1841_v52 = vsel %vm405_vm7, %v8024_v39, %v1834_v16 }
 0x38f   : > { %v1776_v60 = vpop.permute.xlu1 %1775  ;;  %v1785_v15 = vpop.permute.xlu0 %1784 }
 0x390   : > { %1856 = vrot.lane.b32.xlu0 %v1786_v27, %s7159_s12  ;;  %1886 = vrot.lane.b32.xlu1 %v1814_v47, %s7159_s12  ;;  %v1779_v45 = vsel %vm336_vm0, %v1776_v60, %v1772_v17  ;;  %v1778_v30 = vsel %vm336_vm0, %v1774_v7, %v1776_v60  ;;  %v1787_v61 = vsel %vm346_vm1, %v1783_v62, %v1785_v15 }
 0x391   : > { %v1788_v50 = vsel %vm346_vm1, %v1785_v15, %v1781_v26 }
 0x393   : > { %v1794_v12 = vpop.permute.xlu1 %1793  ;;  %v1809_v9 = vpop.permute.xlu0 %1808 }
 0x394   : > { %1894 = vrot.lane.b32.xlu0 %v1823_v28, %s7159_s12  ;;  %1902 = vrot.lane.b32.xlu1 %v1832_v38, %s7159_s12  ;;  %v1796_v58 = vsel %vm356_vm2, %v1792_v2, %v1794_v12  ;;  %v1797_v32 = vsel %vm356_vm2, %v1794_v12, %v1790_v51  ;;  %v1812_v0 = vsel %vm375_vm4, %v1807_v10, %v1809_v9  ;;  %v1767_v2 = vld [vmem:[%s9359_s3] sm:$0xff] }
 0x395   : > { %v1813_v21 = vsel %vm375_vm4, %v1809_v9, %v1811_v56  ;;  %v1912_v51 = vsel %vm479_vm9, %v8026_v11, %v8036_v24  ;;  %v1967_v44 = vsel %vm534_vm10, %v1767_v2, 0 }
 0x396   : > { %v1971_v7 = vand.u32 4294901760, %v1912_v51 }
 0x397   : > { %v1801_v8 = vpop.permute.xlu1 %1800  ;;  %v1827_v18 = vpop.permute.xlu0 %1826 }
 0x398   : > { %1852 = vrot.lane.b32.xlu0 %v1779_v45, %s7159_s12  ;;  %1850 = vrot.lane.b32.xlu1 %v1778_v30, %s7159_s12  ;;  %v1804_v46 = vsel %vm366_vm3, %v1799_v22, %v1801_v8  ;;  %v1805_v59 = vsel %vm366_vm3, %v1801_v8, %v1803_v3  ;;  %v1830_v5 = vsel %vm395_vm6, %v1825_v42, %v1827_v18  ;;  %v8121_v45 = vand.u32 4294901760, %v1967_v44 }
 0x399   : > { %v1831_v19 = vsel %vm395_vm6, %v1827_v18, %v1829_v25  ;;  %v8111_v48 = vsub.f32 %v1912_v51, %v1971_v7 }
 0x39a   : > { %v8133_v9 = vsub.f32 %v1967_v44, %v8121_v45 }
 0x39b   : > { %v1818_v4 = vpop.permute.xlu1 %1817  ;;  %v1847_v36 = vpop.permute.xlu0 %1846  ;;  %v9395_v12 = vand.u32 4294901760, %v8111_v48 }
 0x39c   : > { %1858 = vrot.lane.b32.xlu0 %v1787_v61, %s7159_s12  ;;  %1860 = vrot.lane.b32.xlu1 %v1788_v50, %s7159_s12  ;;  %v1821_v1 = vsel %vm385_vm5, %v1816_v33, %v1818_v4  ;;  %v1822_v35 = vsel %vm385_vm5, %v1818_v4, %v1820_v54  ;;  %v1913_v54 = vsel %vm479_vm9, %v8036_v24, %v1847_v36 }
 0x39d   : > { %v1914_v56 = vsel %vm479_vm9, %v1847_v36, %v8026_v11  ;;  %v1969_v62 = vand.u32 4294901760, %v1913_v54  ;;  %v8140_v4 = vsub.f32 %v8111_v48, %v9395_v12 }
 0x39e   : > { %v2643_v22 = vand.u32 4294901760, %v1914_v56 }
 0x39f   : > { %v1836_v20 = vpop.permute.xlu1 %1835  ;;  %v8115_v47 = vsub.f32 %v1913_v54, %v1969_v62 }
 0x3a0   : > { %1866 = vrot.lane.b32.xlu0 %v1796_v58, %s7159_s12  ;;  %1868 = vrot.lane.b32.xlu1 %v1797_v32, %s7159_s12  ;;  %v1839_v40 = vsel %vm405_vm7, %v1834_v16, %v1836_v20  ;;  %v1840_v41 = vsel %vm405_vm7, %v1836_v20, %v8024_v39 }
 0x3a1   : > { %v9396_v50 = vand.u32 4294901760, %v8115_v47 }
 0x3a3   : > { %v8154_v20 = vsub.f32 %v8115_v47, %v9396_v50 }
 0x3a4   : > { %1874 = vrot.lane.b32.xlu0 %v1804_v46, %s7159_s12  ;;  %1876 = vrot.lane.b32.xlu1 %v1805_v59, %s7159_s12 }
 0x3a8   : > { %1882 = vrot.lane.b32.xlu0 %v1812_v0, %s7159_s12  ;;  %1884 = vrot.lane.b32.xlu1 %v1813_v21, %s7159_s12 }
 0x3ac   : > { %1890 = vrot.lane.b32.xlu0 %v1821_v1, %s7159_s12  ;;  %1892 = vrot.lane.b32.xlu1 %v1822_v35, %s7159_s12 }
 0x3b0   : > { %1898 = vrot.lane.b32.xlu0 %v1830_v5, %s7159_s12  ;;  %1900 = vrot.lane.b32.xlu1 %v1831_v19, %s7159_s12 }
 0x3b4   : > { %1906 = vrot.lane.b32.xlu0 %v1839_v40, %s7159_s12  ;;  %1908 = vrot.lane.b32.xlu1 %v1840_v41, %s7159_s12 }
 0x3b8   : > { %1904 = vrot.lane.b32.xlu0 %v1834_v16, %s7159_s12  ;;  %1910 = vrot.lane.b32.xlu1 %v1841_v52, %s7159_s12  ;;  %v8117_v16 = vsub.f32 %v1914_v56, %v2643_v22 }
 0x3ba   : > { %v9399_v58 = vand.u32 4294901760, %v8117_v16 }
 0x3bc   : > { %v8146_v35 = vsub.f32 %v8117_v16, %v9399_v58 }
 0x3de   : > { %v1863_v31 = vpop.permute.xlu0 %1862  ;;  %v1855_v6 = vpop.permute.xlu1 %1854 }
 0x3e2   : > { %v8083_v49 = vpop.permute.xlu0 %1878  ;;  %v1871_v37 = vpop.permute.xlu1 %1870 }
 0x3f6   : > { %v8085_v57 = vpop.permute.xlu0 %1872  ;;  %v8087_v55 = vpop.permute.xlu1 %1880 }
 0x3fa   : > { %v8089_v23 = vpop.permute.xlu0 %1888  ;;  %v8091_v13 = vpop.permute.xlu1 %1896 }
 0x3fe   : > { %v1849_v14 = vpop.permute.xlu0 %1848  ;;  %v1865_v26 = vpop.permute.xlu1 %1864 }
 0x402   : > { %v1857_v17 = vpop.permute.xlu0 %1856  ;;  %v8093_v3 = vpop.permute.xlu1 %1886 }
 0x406   : > { %v8102_v39 = vpop.permute.xlu0 %1894  ;;  %v8104_v25 = vpop.permute.xlu1 %1902 }
 0x40a   : > { %v1853_v10 = vpop.permute.xlu0 %1852  ;;  %v1851_v42 = vpop.permute.xlu1 %1850 }
 0x40b   : > { %v1917_v33 = vsel %vm479_vm9, %v1853_v10, %v1855_v6  ;;  %v1915_v24 = vsel %vm479_vm9, %v1849_v14, %v1851_v42  ;;  %v1916_v27 = vsel %vm479_vm9, %v1851_v42, %v1853_v10 }
 0x40c   : > { %v2646_v11 = vand.u32 4294901760, %v1917_v33  ;;  %v1975_v60 = vand.u32 4294901760, %v1915_v24  ;;  %v1973_v15 = vand.u32 4294901760, %v1916_v27 }
 0x40e   : > { %v8119_v28 = vpack.c.bf16 %v2646_v11, %v2643_v22  ;;  %v1859_v38 = vpop.permute.xlu0 %1858  ;;  %v1861_v30 = vpop.permute.xlu1 %1860  ;;  %v8130_v8 = vpack.c.bf16 %v1975_v60, %v1971_v7  ;;  %v8135_v0 = vpack.c.bf16 %v1973_v15, %v1969_v62  ;;  %v8156_v40 = vsub.f32 %v1917_v33, %v2646_v11 }
 0x40f   : > { %v1918_v61 = vsel %vm479_vm9, %v1857_v17, %v1859_v38  ;;  %v1920_v32 = vsel %vm479_vm9, %v1861_v30, %v1863_v31  ;;  %v8158_v41 = vsub.f32 %v1916_v27, %v1973_v15  ;;  %v8160_v52 = vsub.f32 %v1915_v24, %v1975_v60 }
 0x410   : > { %6539 = vmatpush3.bf16.msra.mxu1 %v8119_v28  ;;  %9520 = vst [vmem:[#allocation19_spill] sm:$0xff] %v8130_v8  ;;  %v1979_v59 = vand.u32 4294901760, %v1918_v61  ;;  %9521 = vst [vmem:[#allocation15_spill] sm:$0xff] %v8135_v0  ;;  %v2649_v1 = vand.u32 4294901760, %v1920_v32  ;;  %6442 = vmatprep.subr.bf16.mxu0 %v8135_v0  ;;  %v8164_v31 = vand.u32 4294901760, %v8133_v9  ;;  %v9397_v10 = vand.u32 4294901760, %v8156_v40 }
 0x411   : > { %6540 = vmatprep.subr.bf16.mxu1 %v9483_v43  ;;  %6444 = vmatpush1.bf16.msra.mxu0 %v8130_v8  ;;  %v9394_v33 = vand.u32 4294901760, %v8160_v52  ;;  %v9402_v24 = vand.u32 4294901760, %v8158_v41 }
 0x412   : > { %v1867_v46 = vpop.permute.xlu0 %1866  ;;  %v1869_v21 = vpop.permute.xlu1 %1868  ;;  %9522 = vst [vmem:[#allocation20_spill] sm:$0xff] %v8164_v31  ;;  %v8166_v6 = vsub.f32 %v1918_v61, %v1979_v59  ;;  %v8169_v51 = vsub.f32 %v1920_v32, %v2649_v1  ;;  %v2055_v11 = vsub.f32 %v8133_v9, %v8164_v31 }
 0x413   : > { %v1921_v18 = vsel %vm479_vm9, %v1865_v26, %v1867_v46  ;;  %v1922_v5 = vsel %vm479_vm9, %v1867_v46, %v1869_v21  ;;  %v1923_v19 = vsel %vm479_vm9, %v1869_v21, %v1871_v37  ;;  %v1919_v37 = vsel %vm479_vm9, %v1859_v38, %v1861_v30 }
 0x414   : > { %v1983_v14 = vand.u32 4294901760, %v1921_v18  ;;  %v2652_v26 = vand.u32 4294901760, %v1923_v19  ;;  %v1981_v54 = vand.u32 4294901760, %v1922_v5  ;;  %v1977_v42 = vand.u32 4294901760, %v1919_v37 }
 0x415   : > { %v9398_v27 = vand.u32 4294901760, %v8166_v6  ;;  %v9400_v15 = vand.u32 4294901760, %v8169_v51 }
 0x416   : > { %v1875_v36 = vpop.permute.xlu0 %1874  ;;  %v1877_v17 = vpop.permute.xlu1 %1876  ;;  %v8173_v2 = vpack.c.bf16 %v2652_v26, %v2649_v1  ;;  %v8184_v60 = vpack.c.bf16 %v1983_v14, %v1979_v59  ;;  %v8190_v30 = vsub.f32 %v1921_v18, %v1983_v14  ;;  %v8192_v32 = vpack.c.bf16 %v1981_v54, %v1977_v42 }
 0x417   : > { %v1924_v62 = vsel %vm479_vm9, %v8085_v57, %v1875_v36  ;;  %v1926_v57 = vsel %vm479_vm9, %v1877_v17, %v8083_v49  ;;  %v8195_v46 = vsub.f32 %v1923_v19, %v2652_v26  ;;  %v1925_v59 = vsel %vm479_vm9, %v1875_v36, %v1877_v17 }
 0x418   : > { %9523 = vst [vmem:[#allocation21_spill] sm:$0xff] %v8173_v2  ;;  %9524 = vst [vmem:[#allocation22_spill] sm:$0xff] %v8184_v60  ;;  %6542 = vmatpush3.bf16.msra.mxu1 %v8173_v2  ;;  %v1987_v61 = vand.u32 4294901760, %v1924_v62  ;;  %v8206_v1 = vsub.f32 %v8156_v40, %v9397_v10  ;;  %v8211_v18 = vsub.f32 %v8160_v52, %v9394_v33  ;;  %v2655_v19 = vand.u32 4294901760, %v1926_v57 }
 0x419   : > { %9525 = vst [vmem:[#allocation23_spill] sm:$0xff] %v8192_v32  ;;  %6543 = vmatprep.subr.bf16.mxu1 %v9483_v43  ;;  %6446 = vmatprep.subr.bf16.mxu0 %v8192_v32  ;;  %v8219_v26 = vsub.f32 %v1919_v37, %v1977_v42  ;;  %v8228_v12 = vsub.f32 %v8169_v51, %v9400_v15  ;;  %v9529_v29 = vand.u32 4294901760, %v8190_v30 }
 0x41a   : > { %v1883_v44 = vpop.permute.xlu0 %1882  ;;  %v1885_v38 = vpop.permute.xlu1 %1884  ;;  %6448 = vmatpush1.bf16.msra.mxu0 %v8184_v60  ;;  %v8231_v10 = vsub.f32 %v1924_v62, %v1987_v61  ;;  %v8233_v37 = vsub.f32 %v1922_v5, %v1981_v54  ;;  %v8245_v15 = vsub.f32 %v8158_v41, %v9402_v24  ;;  %v8247_v62 = vand.u32 4294901760, %v2055_v11 }
 0x41b   : > { %v1927_v21 = vsel %vm479_vm9, %v8087_v55, %v1883_v44  ;;  %v8201_v49 = vsel %vm479_vm9, %v1883_v44, %v1885_v38  ;;  %v8217_v55 = vsub.f32 %v8166_v6, %v9398_v27  ;;  %v1929_v17 = vsel %vm479_vm9, %v1885_v38, %v8093_v3 }
 0x41c   : > { %v1991_v36 = vand.u32 4294901760, %v1927_v21  ;;  %v1989_v44 = vand.u32 4294901760, %v8201_v49  ;;  %v1985_v27 = vand.u32 4294901760, %v1925_v59  ;;  %v2658_v3 = vand.u32 4294901760, %v1929_v17 }
 0x41d   : > { %v8238_v38 = vsub.f32 %v1926_v57, %v2655_v19  ;;  %v8259_v24 = vsub.f32 %v8190_v30, %v9529_v29  ;;  %v9530_v5 = vand.u32 4294901760, %v8195_v46 }
 0x41e   : > { %v1891_v14 = vpop.permute.xlu0 %1890  ;;  %v1893_v33 = vpop.permute.xlu1 %1892  ;;  %v8236_v58 = vpack.c.bf16 %v1991_v36, %v1987_v61  ;;  %v8240_v56 = vpack.c.bf16 %v1989_v44, %v1985_v27  ;;  %v8252_v7 = vpack.c.bf16 %v2658_v3, %v2655_v19  ;;  %v8281_v34 = vsub.f32 %v1925_v59, %v1985_v27 }
 0x41f   : > { %v8267_v19 = vsub.f32 %v8195_v46, %v9530_v5  ;;  %v1930_v61 = vsel %vm479_vm9, %v8089_v23, %v1891_v14  ;;  %v1931_v54 = vsel %vm479_vm9, %v1891_v14, %v1893_v33  ;;  %v1932_v5 = vsel %vm479_vm9, %v1893_v33, %v8102_v39 }
 0x420   : > { %9526 = vst [vmem:[#allocation24_spill] sm:$0xff] %v8236_v58  ;;  %9527 = vst [vmem:[#allocation25_spill] sm:$0xff] %v8240_v56  ;;  %6450 = vmatprep.subr.bf16.mxu0 %v8240_v56  ;;  %6545 = vmatpush3.bf16.msra.mxu1 %v8252_v7  ;;  %v8283_v53 = vsub.f32 %v1927_v21, %v1991_v36  ;;  %v9531_v23 = vand.u32 4294901760, %v8231_v10  ;;  %v8293_v39 = vsub.f32 %v1929_v17, %v2658_v3 }
 0x421   : > { %9528 = vst [vmem:[#allocation26_spill] sm:$0xff] %v8252_v7  ;;  %6452 = vmatpush1.bf16.msra.mxu0 %v8236_v58  ;;  %6546 = vmatprep.subr.bf16.mxu1 %v9483_v43  ;;  %v1995_v58 = vand.u32 4294901760, %v1930_v61  ;;  %v1993_v27 = vand.u32 4294901760, %v1931_v54  ;;  %v2661_v59 = vand.u32 4294901760, %v1932_v5  ;;  %v2752_v36 = vand.u32 4294901760, %v8267_v19 }
 0x422   : > { %v1899_v22 = vpop.permute.xlu0 %1898  ;;  %v1901_v57 = vpop.permute.xlu1 %1900  ;;  %v8291_v14 = vsub.f32 %v8231_v10, %v9531_v23  ;;  %v9532_v7 = vand.u32 4294901760, %v8238_v38 }
 0x423   : > { %v1933_v42 = vsel %vm479_vm9, %v8091_v13, %v1899_v22  ;;  %v1934_v29 = vsel %vm479_vm9, %v1899_v22, %v1901_v57  ;;  %v1935_v22 = vsel %vm479_vm9, %v1901_v57, %v8104_v25  ;;  %v8302_v57 = vsub.f32 %v8201_v49, %v1989_v44 }
 0x424   : > { %v1999_v13 = vand.u32 4294901760, %v1933_v42  ;;  %v1997_v33 = vand.u32 4294901760, %v1934_v29  ;;  %v2664_v21 = vand.u32 4294901760, %v1935_v22  ;;  %v8299_v25 = vsub.f32 %v8238_v38, %v9532_v7 }
 0x425   : > { %v8318_v44 = vsub.f32 %v1931_v54, %v1993_v27  ;;  %v8320_v8 = vsub.f32 %v1932_v5, %v2661_v59  ;;  %v8333_v54 = vsub.f32 %v1930_v61, %v1995_v58 }
 0x426   : > { %v1907_v11 = vpop.permute.xlu0 %1906  ;;  %v1909_v50 = vpop.permute.xlu1 %1908  ;;  %v8307_v56 = vpack.c.bf16 %v1999_v13, %v1995_v58  ;;  %v8309_v60 = vpack.c.bf16 %v2664_v21, %v2661_v59  ;;  %v8312_v32 = vsub.f32 %v1935_v22, %v2664_v21  ;;  %v8316_v49 = vpack.c.bf16 %v1997_v33, %v1993_v27 }
 0x427   : > { %v1937_v23 = vsel %vm479_vm9, %v1907_v11, %v1909_v50  ;;  %v8327_v22 = vsub.f32 %v1933_v42, %v1999_v13  ;;  %v8329_v21 = vsub.f32 %v1934_v29, %v1997_v33  ;;  %v9535_v29 = vand.u32 4294901760, %v8293_v39 }
 0x428   : > { %9533 = vst [vmem:[#allocation27_spill] sm:$0xff] %v8307_v56  ;;  %v8314_v7 = vand.u32 4294901760, %v1937_v23  ;;  %6548 = vmatpush3.bf16.msra.mxu1 %v8309_v60  ;;  %6454 = vmatprep.subr.bf16.mxu0 %v8316_v49  ;;  %v9536_v58 = vand.u32 4294901760, %v8219_v26  ;;  %v9537_v59 = vand.u32 4294901760, %v8146_v35  ;;  %v9542_v35 = vand.u32 4294901760, %v8211_v18 }
 0x429   : > { %6007 = vmatprep.subr.mxu1 %v9477_v63  ;;  %6456 = vmatpush1.bf16.msra.mxu0 %v8307_v56  ;;  %v2765_v13 = vsub.f32 %v8293_v39, %v9535_v29  ;;  %v9539_v29 = vand.u32 4294901760, %v8233_v37  ;;  %v2155_v33 = vand.u32 4294901760, %v8327_v22  ;;  %v2149_v2 = vand.u32 4294901760, %v8329_v21 }
 0x42a   : > { %v1905_v31 = vpop.permute.xlu0 %1904  ;;  %v1911_v19 = vpop.permute.xlu1 %1910  ;;  %2002 = vmatprep.subr.mxu0 %v8314_v7  ;;  %v2090_v61 = vsub.f32 %v8219_v26, %v9536_v58  ;;  %v9540_v58 = vand.u32 4294901760, %v8154_v20  ;;  %v9544_v20 = vand.u32 4294901760, %v8302_v57  ;;  %v9545_v18 = vand.u32 4294901760, %v8312_v32 }
 0x42b   : > { %v1936_v17 = vsel %vm479_vm9, %v1905_v31, %v1907_v11  ;;  %v1938_v3 = vsel %vm479_vm9, %v1909_v50, %v1911_v19  ;;  %v2079_v50 = vand.u32 4294901760, %v8245_v15  ;;  %v9534_v11 = vand.u32 4294901760, %v8283_v53 }
 0x42c   : > { %v8336_v5 = vand.u32 4294901760, %v1936_v17  ;;  %v8338_v31 = vand.u32 4294901760, %v1938_v3  ;;  %v9538_v19 = vand.u32 4294901760, %v8206_v1  ;;  %v2102_v0 = vsub.f32 %v8233_v37, %v9539_v29 }
 0x42d   : > { %v2132_v42 = vsub.f32 %v8283_v53, %v9534_v11  ;;  %v6457_v27 = vpack.c.bf16 %v2079_v50, %v9540_v58  ;;  %v9541_v15 = vand.u32 4294901760, %v8140_v4  ;;  %v2091_v1 = vand.u32 4294901760, %v2090_v61 }
 0x42e   : > { %6008 = vmatpush3.msra.mxu1 %v8338_v31  ;;  %v6550_v11 = vpack.c.bf16 %v9538_v19, %v9537_v59  ;;  %2004 = vmatpush1.msra.mxu0 %v8336_v5  ;;  %v2103_v59 = vand.u32 4294901760, %v2102_v0  ;;  %v9543_v19 = vand.u32 4294901760, %v8281_v34  ;;  %v2126_v50 = vsub.f32 %v8302_v57, %v9544_v20 }
 0x42f   : > { %6549 = vmatprep.subr.bf16.mxu1 %v9483_v43  ;;  %v6459_v56 = vpack.c.bf16 %v9542_v35, %v9541_v15  ;;  %6010 = vmatmul.mubr.f32.vlgmr.msra.gmra.mrb[2].mxu1 %v8247_v62  ;;  %v2766_v58 = vand.u32 4294901760, %v2765_v13  ;;  %v2143_v4 = vand.u32 4294901760, %v8333_v54  ;;  %v2779_v15 = vsub.f32 %v8312_v32, %v9545_v18 }
 0x430   : > { %6551 = vmatpush3.bf16.msra.mxu1 %v6550_v11  ;;  %v2114_v29 = vsub.f32 %v8281_v34, %v9543_v19  ;;  %v8384_v35 = vsub.f32 %v1937_v23, %v8314_v7  ;;  %6458 = vmatprep.subr.bf16.mxu0 %v6457_v27  ;;  %v8388_v0 = vsub.f32 %v1938_v3, %v8338_v31  ;;  %v9546_v13 = vand.u32 4294901760, %v8228_v12 }
 0x431   : > { %2057 = vmatmul.mubr.f32.vlgmr.msra.gmra.mrb[2].mxu0 %v8247_v62  ;;  %v6461_v61 = vpack.c.bf16 %v2103_v59, %v2091_v1  ;;  %6552 = vmatprep.subr.bf16.mxu1 %v9483_v43  ;;  %v2127_v19 = vand.u32 4294901760, %v2126_v50  ;;  %v9547_v20 = vand.u32 4294901760, %v8320_v8  ;;  %v9548_v27 = vand.u32 4294901760, %v8318_v44 }
 0x432   : > { %6460 = vmatpush1.bf16.msra.mxu0 %v6459_v56  ;;  %v6553_v11 = vpack.c.bf16 %v2752_v36, %v9546_v13  ;;  %v2115_v23 = vand.u32 4294901760, %v2114_v29  ;;  %v2150_v56 = vsub.f32 %v8329_v21, %v2149_v2  ;;  %2217 = vmatprep.mubr.f32.mxu0 %v9477_v63  ;;  %v2133_v3 = vand.u32 4294901760, %v2132_v42 }
 0x433   : > { %v2772_v18 = vsub.f32 %v8320_v8, %v9547_v20  ;;  %v2138_v62 = vsub.f32 %v8318_v44, %v9548_v27  ;;  %v2156_v12 = vsub.f32 %v8327_v22, %v2155_v33  ;;  %v8407_v36 = vsub.f32 %v1936_v17, %v8336_v5  ;;  %6462 = vmatprep.subr.bf16.mxu0 %v6461_v61 }
 0x434   : > { %v9549_v1 = vand.u32 4294901760, %v8217_v55  ;;  %v9550_v59 = vand.u32 4294901760, %v8259_v24  ;;  %6554 = vmatpush3.bf16.msra.mxu1 %v6553_v11  ;;  %v2121_v50 = vand.u32 4294901760, %v8291_v14  ;;  %v6465_v13 = vpack.c.bf16 %v2127_v19, %v2115_v23  ;;  %6030 = vmatprep.mubr.msk.f32.mxu1 %vm7162_vm8, %v9477_v63 }
 0x435   : > { %6555 = vmatprep.subr.bf16.mxu1 %v9483_v43  ;;  %v2151_v42 = vand.u32 4294901760, %v2150_v56  ;;  %v2161_v20 = vand.u32 4294901760, %v8384_v35  ;;  %v2144_v17 = vsub.f32 %v8333_v54, %v2143_v4  ;;  %v2780_v55 = vand.u32 4294901760, %v2779_v15 }
 0x436   : > { %v6463_v29 = vpack.c.bf16 %v9550_v59, %v9549_v1  ;;  %v2785_v24 = vand.u32 4294901760, %v8388_v0  ;;  %v9551_v61 = vand.u32 4294901760, %v8299_v25  ;;  %v2139_v11 = vand.u32 4294901760, %v2138_v62 }
 0x437   : > { %v2773_v19 = vand.u32 4294901760, %v2772_v18  ;;  %v2157_v23 = vand.u32 4294901760, %v2156_v12  ;;  %v2167_v27 = vand.u32 4294901760, %v8407_v36  ;;  %v6467_v56 = vpack.c.bf16 %v2133_v3, %v2121_v50 }
 0x438   : > { %6464 = vmatpush1.bf16.msra.mxu0 %v6463_v29  ;;  %v6556_v14 = vpack.c.bf16 %v2766_v58, %v9551_v61  ;;  %v6469_v1 = vpack.c.bf16 %v2151_v42, %v2139_v11  ;;  %v2162_v15 = vsub.f32 %v8384_v35, %v2161_v20  ;;  %v2145_v59 = vand.u32 4294901760, %v2144_v17 }
 0x439   : > { %6466 = vmatprep.subr.bf16.mxu0 %v6465_v13  ;;  %v2786_v25 = vsub.f32 %v8388_v0, %v2785_v24  ;;  %v6559_v58 = vpack.c.bf16 %v2780_v55, %v2773_v19  ;;  %v2168_v18 = vsub.f32 %v8407_v36, %v2167_v27  ;;  %v6562_v29 = vpack.c.bf16 %v8156_v40, %v8117_v16 }
 0x43a   : > { %6557 = vmatpush3.bf16.msra.mxu1 %v6556_v14  ;;  %v6471_v62 = vpack.c.bf16 %v2157_v23, %v2145_v59  ;;  %v2163_v3 = vand.u32 4294901760, %v2162_v15  ;;  %v6473_v13 = vpack.c.bf16 %v8158_v41, %v8115_v47  ;;  %v6475_v42 = vpack.c.bf16 %v8160_v52, %v8111_v48  ;;  %v9552_v15 = vld [vmem:[#allocation15_spill] sm:$0xff] }
 0x43b   : > { %6558 = vmatprep.subr.bf16.mxu1 %v9483_v43  ;;  %v2787_v12 = vand.u32 4294901760, %v2786_v25  ;;  %v2169_v50 = vand.u32 4294901760, %v2168_v18  ;;  %v6477_v17 = vpack.c.bf16 %v8233_v37, %v8219_v26  ;;  %v6565_v55 = vpack.c.bf16 %v8195_v46, %v8169_v51  ;;  %v9553_v59 = vld [vmem:[#allocation19_spill] sm:$0xff]  ;;  %v9556_v18 = vld [vmem:[#allocation22_spill] sm:$0xff] }
 0x43c   : > { %6468 = vmatpush1.bf16.msra.mxu0 %v6467_v56  ;;  %v6479_v61 = vpack.c.bf16 %v8190_v30, %v8166_v6  ;;  %v6481_v14 = vpack.c.bf16 %v8302_v57, %v8281_v34  ;;  %v6568_v11 = vpack.c.bf16 %v8293_v39, %v8238_v38  ;;  %v6483_v19 = vpack.c.bf16 %v8283_v53, %v8231_v10  ;;  %v9554_v25 = vld [vmem:[#allocation23_spill] sm:$0xff] }
 0x43d   : > { %6470 = vmatprep.subr.bf16.mxu0 %v6469_v1  ;;  %v6485_v23 = vpack.c.bf16 %v8329_v21, %v8318_v44  ;;  %v6571_v56 = vpack.c.bf16 %v8312_v32, %v8320_v8  ;;  %v6487_v1 = vpack.c.bf16 %v8327_v22, %v8333_v54  ;;  %v9585_v21 = vld [vmem:[#allocation18_spill] sm:$0xff] }
 0x43e   : > { %6560 = vmatpush3.bf16.msra.mxu1 %v6559_v58  ;;  %v9555_v58 = vld [vmem:[#allocation21_spill] sm:$0xff] }
 0x43f   : > { %6028 = vmatprep.subr.mxu1 %v9477_v63 }
 0x440   : > { %6472 = vmatpush1.bf16.msra.mxu0 %v6471_v62  ;;  %v9557_v62 = vld [vmem:[#allocation25_spill] sm:$0xff] }
 0x441   : > { %2164 = vmatprep.subr.mxu0 %v2163_v3  ;;  %v9559_v3 = vld [vmem:[#allocation24_spill] sm:$0xff] }
 0x442   : > { %6029 = vmatpush3.msra.mxu1 %v2787_v12  ;;  %v9560_v12 = vld [vmem:[#allocation27_spill] sm:$0xff] }
 0x443   : > { %6561 = vmatprep.subr.bf16.mxu1 %v9483_v43  ;;  %6031 = vmatmul.mubr.f32.vlgmr.msra.gmra.mrb[2].mxu1 %v8121_v45 }
 0x444   : > { %2170 = vmatpush1.msra.mxu0 %v2169_v50  ;;  %6563 = vmatpush3.bf16.msra.mxu1 %v6562_v29  ;;  %v9561_v29 = vand.u32 4294901760, %v8117_v16  ;;  %v9562_v50 = vand.u32 4294901760, %v8156_v40  ;;  %v9569_v16 = vand.u32 4294901760, %v8233_v37  ;;  %v9575_v37 = vand.u32 4294901760, %v8302_v57 }
 0x445   : > { %6474 = vmatprep.subr.bf16.mxu0 %v6473_v13  ;;  %2219 = vmatmul.mubr.f32.vlgmr.msra.gmra.mrb[2].mxu0 %v8121_v45 }
 0x446   : > { %6476 = vmatpush1.bf16.msra.mxu0 %v6475_v42  ;;  %6564 = vmatprep.subr.bf16.mxu1 %v9483_v43  ;;  %v6586_v13 = vpack.c.bf16 %v9562_v50, %v9561_v29  ;;  %v9563_v42 = vand.u32 4294901760, %v8115_v47  ;;  %v9568_v47 = vand.u32 4294901760, %v8219_v26  ;;  %v9574_v26 = vand.u32 4294901760, %v8281_v34 }
 0x447   : > { %6478 = vmatprep.subr.bf16.mxu0 %v6477_v17  ;;  %2325 = vmatprep.mubr.f32.mxu0 %v9477_v63  ;;  %v9564_v17 = vand.u32 4294901760, %v8158_v41  ;;  %v9570_v41 = vand.u32 4294901760, %v8169_v51  ;;  %v9577_v29 = vand.u32 4294901760, %v8293_v39  ;;  %v9579_v50 = vand.u32 4294901760, %v8283_v53 }
 0x448   : > { %6566 = vmatpush3.bf16.msra.mxu1 %v6565_v55  ;;  %6051 = vmatprep.mubr.msk.f32.mxu1 %vm7162_vm8, %v9477_v63  ;;  %v6509_v40 = vpack.c.bf16 %v9569_v16, %v9568_v47  ;;  %v6513_v51 = vpack.c.bf16 %v9575_v37, %v9574_v26  ;;  %v9580_v34 = vand.u32 4294901760, %v8318_v44  ;;  %v9582_v39 = vand.u32 4294901760, %v8312_v32 }
 0x449   : > { %6567 = vmatprep.subr.bf16.mxu1 %v9483_v43  ;;  %v6505_v55 = vpack.c.bf16 %v9564_v17, %v9563_v42  ;;  %v6519_v53 = vpack.c.bf16 %v2155_v33, %v2143_v4  ;;  %v6955_v33 = vld [vmem:[%s7392_s14 + $0x10] sm:$0xff] }
 0x44a   : > { %6480 = vmatpush1.bf16.msra.mxu0 %v6479_v61  ;;  %v9565_v61 = vld [vmem:[#allocation20_spill] sm:$0xff]  ;;  %v6517_v57 = vpack.c.bf16 %v2149_v2, %v9580_v34  ;;  %v8627_v4 = vand.u32 4294901760, %v6955_v33 }
 0x44b   : > { %6482 = vmatprep.subr.bf16.mxu0 %v6481_v14  ;;  %v9566_v14 = vand.u32 4294901760, %v8111_v48 }
 0x44c   : > { %6569 = vmatpush3.bf16.msra.mxu1 %v6568_v11  ;;  %v9567_v11 = vand.u32 4294901760, %v8160_v52  ;;  %v9572_v52 = vand.u32 4294901760, %v8166_v6 }
 0x44d   : > { %6570 = vmatprep.subr.bf16.mxu1 %v9483_v43 }
 0x44e   : > { %6484 = vmatpush1.bf16.msra.mxu0 %v6483_v19  ;;  %v6507_v19 = vpack.c.bf16 %v9567_v11, %v9566_v14 }
 0x44f   : > { %6486 = vmatprep.subr.bf16.mxu0 %v6485_v23  ;;  %v9571_v23 = vand.u32 4294901760, %v8195_v46  ;;  %v9576_v46 = vand.u32 4294901760, %v8238_v38  ;;  %v9581_v38 = vand.u32 4294901760, %v8320_v8 }
 0x450   : > { %6572 = vmatpush3.bf16.msra.mxu1 %v6571_v56  ;;  %v9573_v56 = vand.u32 4294901760, %v8190_v30  ;;  %v9578_v30 = vand.u32 4294901760, %v8231_v10 }
 0x451   : > { %6049 = vmatprep.subr.mxu1 %v9477_v63  ;;  %v6589_v48 = vpack.c.bf16 %v9571_v23, %v9570_v41  ;;  %v6592_v6 = vpack.c.bf16 %v9577_v29, %v9576_v46  ;;  %v6595_v42 = vpack.c.bf16 %v9582_v39, %v9581_v38 }
 0x452   : > { %6488 = vmatpush1.bf16.msra.mxu0 %v6487_v1  ;;  %v6511_v1 = vpack.c.bf16 %v9573_v56, %v9572_v52 }
 0x453   : > { %2275 = vmatprep.subr.mxu0 %v8384_v35  ;;  %v6956_v35 = vld [vmem:[%s7392_s14] sm:$0xff] }
 0x454   : > { %6050 = vmatpush3.msra.mxu1 %v8388_v0  ;;  %v8630_v0 = vand.u32 4294901760, %v6956_v35 }
 0x455   : > { %6573 = vmatprep.subr.bf16.mxu1 %v9483_v43  ;;  %6052 = vmatmul.mubr.f32.vlgmr.msra.gmra.mrb[2].mxu1 %v8133_v9 }
 0x456   : > { %2278 = vmatpush1.msra.mxu0 %v8407_v36  ;;  %6575 = vmatpush3.bf16.msra.mxu1 %v8119_v28  ;;  %v3273_v36 = vld [vmem:[%s9361_s5] sm:$0xff] }
 0x457   : > { %6490 = vmatprep.subr.bf16.mxu0 %v9552_v15  ;;  %2328 = vmatmul.mubr.f32.vlgmr.msra.gmra.mrb[2].mxu0 %v8133_v9  ;;  %v9558_v9 = vld [vmem:[#allocation26_spill] sm:$0xff] }
 0x458   : > { %6492 = vmatpush1.bf16.msra.mxu0 %v9553_v59  ;;  %6576 = vmatprep.subr.bf16.mxu1 %v9483_v43 }
 0x459   : > { %6494 = vmatprep.subr.bf16.mxu0 %v9554_v25  ;;  %2416 = vmatprep.mubr.f32.mxu0 %v9477_v63 }
 0x45a   : > { %6578 = vmatpush3.bf16.msra.mxu1 %v9555_v58  ;;  %6072 = vmatprep.mubr.msk.f32.mxu1 %vm7162_vm8, %v9477_v63 }
 0x45b   : > { %6579 = vmatprep.subr.bf16.mxu1 %v9483_v43 }
 0x45c   : > { %6496 = vmatpush1.bf16.msra.mxu0 %v9556_v18 }
 0x45d   : > { %6498 = vmatprep.subr.bf16.mxu0 %v9557_v62 }
 0x45e   : > { %6581 = vmatpush3.bf16.msra.mxu1 %v9558_v9 }
 0x45f   : > { %6582 = vmatprep.subr.bf16.mxu1 %v9483_v43 }
 0x460   : > { %6500 = vmatpush1.bf16.msra.mxu0 %v9559_v3 }
 0x461   : > { %6502 = vmatprep.subr.bf16.mxu0 %v8316_v49 }
 0x462   : > { %6584 = vmatpush3.bf16.msra.mxu1 %v8309_v60 }
 0x463   : > { %6070 = vmatprep.subr.mxu1 %v9477_v63 }
 0x464   : > { %6504 = vmatpush1.bf16.msra.mxu0 %v9560_v12 }
 0x465   : > { %2367 = vmatprep.subr.mxu0 %v8314_v7 }
 0x466   : > { %6071 = vmatpush3.msra.mxu1 %v8338_v31 }
 0x467   : > { %6585 = vmatprep.subr.bf16.mxu1 %v9483_v43  ;;  %6073 = vmatmul.mubr.f32.vlgmr.msra.gmra.mrb[2].mxu1 %v9565_v61 }
 0x468   : > { %2369 = vmatpush1.msra.mxu0 %v8336_v5  ;;  %6587 = vmatpush3.bf16.msra.mxu1 %v6586_v13  ;;  %v6515_v13 = vpack.c.bf16 %v9579_v50, %v9578_v30 }
 0x469   : > { %6506 = vmatprep.subr.bf16.mxu0 %v6505_v55  ;;  %2420 = vmatmul.mubr.f32.vlgmr.msra.gmra.mrb[2].mxu0 %v9565_v61 }
 0x46a   : > { %6508 = vmatpush1.bf16.msra.mxu0 %v6507_v19  ;;  %6588 = vmatprep.subr.bf16.mxu1 %v9483_v43 }
 0x46b   : > { %6510 = vmatprep.subr.bf16.mxu0 %v6509_v40  ;;  %2544 = vmatprep.mubr.f32.mxu0 %v9477_v63 }
 0x46c   : > { %6590 = vmatpush3.bf16.msra.mxu1 %v6589_v48  ;;  %6093 = vmatprep.mubr.msk.f32.mxu1 %vm7162_vm8, %v9477_v63 }
 0x46d   : > { %6591 = vmatprep.subr.bf16.mxu1 %v9483_v43 }
 0x46e   : > { %6512 = vmatpush1.bf16.msra.mxu0 %v6511_v1 }
 0x46f   : > { %6514 = vmatprep.subr.bf16.mxu0 %v6513_v51 }
 0x470   : > { %6593 = vmatpush3.bf16.msra.mxu1 %v6592_v6 }
 0x471   : > { %6594 = vmatprep.subr.bf16.mxu1 %v9483_v43 }
 0x472   : > { %6516 = vmatpush1.bf16.msra.mxu0 %v6515_v13 }
 0x473   : > { %6518 = vmatprep.subr.bf16.mxu0 %v6517_v57 }
 0x474   : > { %6596 = vmatpush3.bf16.msra.mxu1 %v6595_v42 }
 0x475   : > { %6091 = vmatprep.subr.mxu1 %v9477_v63 }
 0x476   : > { %6520 = vmatpush1.bf16.msra.mxu0 %v6519_v53 }
 0x477   : > { %2493 = vmatprep.subr.mxu0 %v2161_v20  ;;  %v3276_v20 = vsel %vm3274_vm11, %v3273_v36, 0 }
 0x478   : > { %6092 = vmatpush3.msra.mxu1 %v2785_v24  ;;  %v8637_v24 = vand.u32 4294901760, %v3276_v20 }
 0x479   : > { %6597 = vmatprep.subr.bf16.mxu1 %v9483_v43  ;;  %6094 = vmatmul.mubr.f32.vlgmr.msra.gmra.mrb[2].mxu1 %v8121_v45 }
 0x47a   : > { %2497 = vmatpush1.msra.mxu0 %v2167_v27  ;;  %6599 = vmatpush3.bf16.msra.mxu1 %v8119_v28 }
 0x47b   : > { %6522 = vmatprep.subr.bf16.mxu0 %v9552_v15  ;;  %2546 = vmatmul.mubr.f32.vlgmr.msra.gmra.mrb[2].mxu0 %v8121_v45  ;;  %v8641_v15 = vsub.f32 %v6955_v33, %v8627_v4 }
 0x47c   : > { %6524 = vmatpush1.bf16.msra.mxu0 %v9553_v59  ;;  %6600 = vmatprep.subr.bf16.mxu1 %v9483_v43  ;;  %v8644_v59 = vsub.f32 %v6956_v35, %v8630_v0 }
 0x47d   : > { %6526 = vmatprep.subr.bf16.mxu0 %v9554_v25  ;;  %2634 = vmatprep.mubr.f32.mxu0 %v9477_v63  ;;  %v3346_v25 = vsub.f32 %v3276_v20, %v8637_v24 }
 0x47e   : > { %6602 = vmatpush3.bf16.msra.mxu1 %v9555_v58  ;;  %6114 = vmatprep.mubr.msk.f32.mxu1 %vm7162_vm8, %v9477_v63 }
 0x47f   : > { %6603 = vmatprep.subr.bf16.mxu1 %v9483_v43 }
 0x480   : > { %6528 = vmatpush1.bf16.msra.mxu0 %v9556_v18  ;;  %v3822_v18 = vand.u32 4294901760, %v8641_v15 }
 0x481   : > { %6530 = vmatprep.subr.bf16.mxu0 %v9557_v62  ;;  %v3364_v62 = vand.u32 4294901760, %v8644_v59 }
 0x482   : > { %6605 = vmatpush3.bf16.msra.mxu1 %v9558_v9  ;;  %v3347_v9 = vand.u32 4294901760, %v3346_v25 }
 0x483   : > { %6606 = vmatprep.subr.bf16.mxu1 %v9483_v43  ;;  %v3365_v17 = vsub.f32 %v8644_v59, %v3364_v62 }
 0x484   : > { %6532 = vmatpush1.bf16.msra.mxu0 %v9559_v3  ;;  %v3348_v55 = vsub.f32 %v3346_v25, %v3347_v9 }
 0x485   : > { %6534 = vmatprep.subr.bf16.mxu0 %v8316_v49  ;;  %v9584_v49 = vld [vmem:[#allocation16_spill] sm:$0xff]  ;;  %v3366_v16 = vand.u32 4294901760, %v3365_v17 }
 0x486   : > { %6608 = vmatpush3.bf16.msra.mxu1 %v8309_v60  ;;  %v9583_v60 = vld [vmem:[#allocation17_spill] sm:$0xff]  ;;  %v3349_v47 = vand.u32 4294901760, %v3348_v55 }
 0x487   : > { %6112 = vmatprep.subr.mxu1 %v9477_v63 }
 0x488   : > { %6536 = vmatpush1.bf16.msra.mxu0 %v9560_v12  ;;  %v3823_v12 = vsub.f32 %v8641_v15, %v3822_v18 }
 0x489   : > { %2585 = vmatprep.subr.mxu0 %v8314_v7 }
 0x48a   : > { %6113 = vmatpush3.msra.mxu1 %v8338_v31  ;;  %v3824_v19 = vand.u32 4294901760, %v3823_v12 }
 0x48b   : > { %6115 = vmatmul.mubr.f32.vlgmr.msra.gmra.mrb[2].mxu1 %v8121_v45  ;;  %6117 = vmatprep.subr.mxu1 %v9477_v63 }
 0x48c   : > { %2587 = vmatpush1.msra.mxu0 %v8336_v5  ;;  %6119 = vmatprep.mubr.msk.f32.mxu1 %vm7162_vm8, %v9477_v63  ;;  %v6954_v5 = vld [vmem:[%s7392_s14 + $0x8] sm:$0xff]  ;;  %s6864_s14 = smul.u32 384, %s7220_s25  ;;  %s5546_s25 = scalar_lea.sflag [#allocation4], %s7386_s20 }
 0x48d   : > { %2636 = vmatmul.mubr.f32.vlgmr.msra.gmra.mrb[2].mxu0 %v8121_v45  ;;  %v8624_v31 = vand.u32 4294901760, %v6954_v5  ;;  %6118 = vmatpush3.msra.mxu1 %v8627_v4 }
 0x48e   : > { %3344 = vmatprep.mubr.f32.mxu0 %v9477_v63  ;;  %6122 = vmatprep.subr.mxu1 %v9477_v63 }
 0x48f   : > { %3279 = vmatprep.subr.mxu0 %v8624_v31  ;;  %v3357_v27 = vsub.f32 %v6954_v5, %v8624_v31  ;;  %6120 = vmatmul.mubr.f32.vlgmr.msra.gmra.mrb[4].mxu1 %v3349_v47 }
 0x490   : > { %3281 = vmatpush1.msra.mxu0 %v8630_v0  ;;  %6123 = vmatpush3.msra.mxu1 %v3824_v19 }
 0x491   : > { %v3358_v58 = vand.u32 4294901760, %v3357_v27  ;;  %3350 = vmatmul.mubr.f32.vlgmr.msra.gmra.mrb[4].mxu0 %v3349_v47  ;;  %6124 = vmatprep.mubr.msk.f32.mxu1 %vm7162_vm8, %v9477_v63 }
 0x492   : > { %3430 = vmatprep.mubr.f32.mxu0 %v9477_v63  ;;  %6127 = vmatprep.subr.mxu1 %v9477_v63 }
 0x493   : > { %v3359_v3 = vsub.f32 %v3357_v27, %v3358_v58 }
 0x495   : > { %v3360_v61 = vand.u32 4294901760, %v3359_v3 }
 0x497   : > { %3361 = vmatprep.subr.mxu0 %v3360_v61  ;;  %6125 = vmatmul.mubr.f32.vlgmr.msra.gmra.mrb[4].mxu1 %v8637_v24 }
 0x498   : > { %3367 = vmatpush1.msra.mxu0 %v3366_v16  ;;  %6128 = vmatpush3.msra.mxu1 %v8641_v15 }
 0x499   : > { %3440 = vmatprep.subr.mxu0 %v3357_v27  ;;  %3432 = vmatmul.mubr.f32.vlgmr.msra.gmra.mrb[4].mxu0 %v8637_v24 }
 0x49a   : > { %6129 = vmatprep.mubr.msk.f32.mxu1 %vm7162_vm8, %v9477_v63  ;;  %3443 = vmatpush1.msra.mxu0 %v8644_v59 }
 0x49b   : > { %3506 = vmatprep.mubr.f32.mxu0 %v9477_v63  ;;  %6132 = vmatprep.subr.mxu1 %v9477_v63 }
 0x49c   : > { %3516 = vmatprep.subr.mxu0 %v8624_v31 }
 0x49f   : > { %6130 = vmatmul.mubr.f32.vlgmr.msra.gmra.mrb[4].mxu1 %v3346_v25 }
 0x4a0   : > { %6133 = vmatpush3.msra.mxu1 %v8627_v4  ;;  %6134 = vmatprep.mubr.msk.f32.mxu1 %vm7162_vm8, %v9477_v63 }
 0x4a1   : > { %3509 = vmatmul.mubr.f32.vlgmr.msra.gmra.mrb[4].mxu0 %v3346_v25  ;;  %6137 = vmatprep.subr.mxu1 %v9477_v63 }
 0x4a2   : > { %3518 = vmatpush1.msra.mxu0 %v8630_v0  ;;  %3581 = vmatprep.mubr.f32.mxu0 %v9477_v63 }
 0x4a3   : > { %3594 = vmatprep.subr.mxu0 %v3358_v58 }
 0x4a7   : > { %6135 = vmatmul.mubr.f32.vlgmr.msra.gmra.mrb[4].mxu1 %v3347_v9 }
 0x4a8   : > { %6138 = vmatpush3.msra.mxu1 %v3822_v18  ;;  %6139 = vmatprep.mubr.msk.f32.mxu1 %vm7162_vm8, %v9477_v63 }
 0x4a9   : > { %3585 = vmatmul.mubr.f32.vlgmr.msra.gmra.mrb[4].mxu0 %v3347_v9  ;;  %6142 = vmatprep.subr.mxu1 %v9477_v63 }
 0x4aa   : > { %3598 = vmatpush1.msra.mxu0 %v3364_v62  ;;  %3661 = vmatprep.mubr.f32.mxu0 %v9477_v63 }
 0x4ab   : > { %3670 = vmatprep.subr.mxu0 %v8624_v31 }
 0x4af   : > { %6140 = vmatmul.mubr.f32.vlgmr.msra.gmra.mrb[4].mxu1 %v8637_v24 }
 0x4b0   : > { %6143 = vmatpush3.msra.mxu1 %v8627_v4  ;;  %6144 = vmatprep.mubr.msk.f32.mxu1 %vm7162_vm8, %v9477_v63 }
 0x4b1   : > { %3663 = vmatmul.mubr.f32.vlgmr.msra.gmra.mrb[4].mxu0 %v8637_v24  ;;  %6705 = vmatprep.subr.bf16.mxu1 %v9483_v43 }
 0x4b2   : > { %3672 = vmatpush1.msra.mxu0 %v8630_v0  ;;  %3735 = vmatprep.mubr.f32.mxu0 %v9477_v63 }
 0x4b7   : > { %6145 = vmatmul.mubr.f32.vlgmr.msra.gmra.mrb[4].mxu1 %v8637_v24 }
 0x4b8   : > { %6165 = vmatprep.mubr.msk.f32.mxu1 %vm7162_vm8, %v9477_v63 }
 0x4b9   : > { %3737 = vmatmul.mubr.f32.vlgmr.msra.gmra.mrb[4].mxu0 %v8637_v24 }
 0x4ba   : > { %4398 = vmatprep.mubr.f32.mxu0 %v9477_v63 }
 0x55e   : > { %v3188_v28 = vpop.f32.mrb[2].mxu1 }
 0x55f   : > { %v3194_v8 = vmax.f32 %v3188_v28, 0.0  ;;  %v6116_v2 = vpop.f32.mrb[3].mxu1 }
 0x560   : > { %v2637_v10 = vpop.f32.mrb[2].mxu0 }
 0x561   : > { %v3197_v32 = vmul.f32 %v3194_v8, %v9583_v60  ;;  %v2639_v7 = vpop.f32.mrb[3].mxu0  ;;  %v3192_v45 = vmax.f32 %v2637_v10, 0.0 }
 0x562   : > { %v3193_v22 = vmax.f32 %v2639_v7, 0.0 }
 0x563   : > { %3211 = vrot.lane.b32.xlu1 %v3197_v32, %s7152_s27  ;;  %3202 = vrot.lane.b32.xlu0 %v3197_v32, %s7151_s29  ;;  %v3195_v44 = vmul.f32 %v3192_v45, %v9584_v49 }
 0x564   : > { %v3196_v54 = vmul.f32 %v3193_v22, %v9585_v21 }
 0x567   : > { %3233 = vrot.lane.b32.xlu1 %v3197_v32, %s7154_s16  ;;  %3220 = vrot.lane.b32.xlu0 %v3197_v32, %s7153_s13 }
 0x56b   : > { %3250 = vrot.lane.b32.xlu1 %v3197_v32, %s7156_s19  ;;  %3241 = vrot.lane.b32.xlu0 %v3197_v32, %s7155_s9 }
 0x56f   : > { %3268 = vrot.lane.b32.xlu1 %v3197_v32, %s7158_s8  ;;  %3259 = vrot.lane.b32.xlu0 %v3197_v32, %s7157_s15 }
 0x573   : > { %3204 = vrot.lane.b32.xlu1 %v3195_v44, %s7151_s29  ;;  %4189 = vrot.lane.b32.xlu0 %v3197_v32, %s7159_s12 }
 0x577   : > { %3222 = vrot.lane.b32.xlu1 %v3195_v44, %s7153_s13  ;;  %3213 = vrot.lane.b32.xlu0 %v3195_v44, %s7152_s27 }
 0x57b   : > { %3229 = vrot.lane.b32.xlu1 %v3195_v44, %s7154_s16  ;;  %3237 = vrot.lane.b32.xlu0 %v3195_v44, %s7155_s9 }
 0x57f   : > { %3246 = vrot.lane.b32.xlu1 %v3195_v44, %s7156_s19  ;;  %3255 = vrot.lane.b32.xlu0 %v3195_v44, %s7157_s15 }
 0x583   : > { %3264 = vrot.lane.b32.xlu1 %v3195_v44, %s7158_s8  ;;  %4191 = vrot.lane.b32.xlu0 %v3195_v44, %s7159_s12 }
 0x587   : > { %3215 = vrot.lane.b32.xlu1 %v3196_v54, %s7152_s27  ;;  %3206 = vrot.lane.b32.xlu0 %v3196_v54, %s7151_s29  ;;  %s305_s27 = scalar_lea.vmem [#allocation10], %s6863_s7 }
 0x58b   : > { %3239 = vrot.lane.b32.xlu1 %v3196_v54, %s7155_s9  ;;  %3224 = vrot.lane.b32.xlu0 %v3196_v54, %s7153_s13  ;;  %s5560_s13 = sshll.u32 %s305_s27, 4  ;;  %s9314_s13 = int_to_ptr.vmem [resolvable:$true] %s5560_s13 }
 0x58c   : > { %s7071_s7 = scalar_lea.vmem %s9314_s13, 384 }
 0x58d   : > { %p7072_p1 = scmp.ne.s32.totalorder %s9314_s13, %s7071_s7 }
 0x58f   : > { %3257 = vrot.lane.b32.xlu1 %v3196_v54, %s7157_s15  ;;  %3231 = vrot.lane.b32.xlu0 %v3196_v54, %s7154_s16  ;;  %p7073_p4 = pnand %p7072_p1, %p7341_p6  ;;  %s7163_s15 = smov [#allocation10]  }
 0x591   : > { %p7074_p8 = pneg %p7073_p4 }
 0x593   : > { %4193 = vrot.lane.b32.xlu1 %v3196_v54, %s7159_s12  ;;  %3248 = vrot.lane.b32.xlu0 %v3196_v54, %s7156_s19  ;;  %s9312_s19 = scalar_lea.hbm %s9362_s6, %s6864_s14 }
 0x597   : > { %3266 = vrot.lane.b32.xlu0 %v3196_v54, %s7158_s8  ;;  %s7075_s8 = sshll.u32 %s7163_s15, 4  ;;  %s7076_s8 = int_to_ptr.vmem [resolvable:$false] %s7075_s8 }
 0x598   : > { %p7078_p3 = scmp.lt.s32.totalorder %s9314_s13, %s7076_s8 }
 0x5d5   : > { %v8653_v14 = vpop.permute.xlu1 %3211  ;;  %v8655_v11 = vpop.permute.xlu0 %3202 }
 0x5d6   : > { %4209 = vrot.lane.b32.xlu1 %v8653_v14, %s7159_s12  ;;  %4201 = vrot.lane.b32.xlu0 %v8655_v11, %s7159_s12 }
 0x5d9   : > { %v8661_v40 = vpop.permute.xlu1 %3233  ;;  %v8663_v41 = vpop.permute.xlu0 %3220 }
 0x5da   : > { %4225 = vrot.lane.b32.xlu1 %v8661_v40, %s7159_s12  ;;  %4217 = vrot.lane.b32.xlu0 %v8663_v41, %s7159_s12 }
 0x5dd   : > { %v8673_v23 = vpop.permute.xlu1 %3250  ;;  %v8675_v48 = vpop.permute.xlu0 %3241 }
 0x5e1   : > { %v8679_v52 = vpop.permute.xlu1 %3268  ;;  %v8681_v56 = vpop.permute.xlu0 %3259 }
 0x5e5   : > { %v3205_v1 = vpop.permute.xlu1 %3204  ;;  %v8690_v26 = vpop.permute.xlu0 %4189 }
 0x5e6   : > { %v3208_v50 = vsel %vm336_vm0, %v8655_v11, %v3205_v1 }
 0x5e9   : > { %v3223_v37 = vpop.permute.xlu1 %3222  ;;  %v3214_v51 = vpop.permute.xlu0 %3213 }
 0x5ea   : > { %v3226_v13 = vsel %vm356_vm2, %v8663_v41, %v3223_v37  ;;  %v3217_v38 = vsel %vm346_vm1, %v8653_v14, %v3214_v51 }
 0x5ed   : > { %v3230_v46 = vpop.permute.xlu1 %3229  ;;  %v8698_v29 = vpop.permute.xlu0 %3237 }
 0x5ee   : > { %4219 = vrot.lane.b32.xlu1 %v3230_v46, %s7159_s12  ;;  %4227 = vrot.lane.b32.xlu0 %v8698_v29, %s7159_s12  ;;  %v3245_v39 = vsel %vm375_vm4, %v8675_v48, %v8698_v29 }
 0x5f1   : > { %v8703_v6 = vpop.permute.xlu1 %3246  ;;  %v8705_v30 = vpop.permute.xlu0 %3255 }
 0x5f2   : > { %4235 = vrot.lane.b32.xlu1 %v8703_v6, %s7159_s12  ;;  %4243 = vrot.lane.b32.xlu0 %v8705_v30, %s7159_s12  ;;  %v3254_v53 = vsel %vm385_vm5, %v8673_v23, %v8703_v6  ;;  %v3263_v8 = vsel %vm395_vm6, %v8681_v56, %v8705_v30 }
 0x5f5   : > { %v8720_v34 = vpop.permute.xlu0 %4191  ;;  %v3265_v42 = vpop.permute.xlu1 %3264 }
 0x5f6   : > { %v8725_v57 = vsel %vm479_vm9, %v8690_v26, %v8720_v34  ;;  %4195 = vrot.lane.b32.xlu1 %v3208_v50, %s7159_s12  ;;  %4211 = vrot.lane.b32.xlu0 %v3226_v13, %s7159_s12  ;;  %v3272_v25 = vsel %vm405_vm7, %v8679_v52, %v3265_v42 }
 0x5f9   : > { %v3207_v28 = vpop.permute.xlu0 %3206  ;;  %v3216_v10 = vpop.permute.xlu1 %3215 }
 0x5fa   : > { %4203 = vrot.lane.b32.xlu1 %v3217_v38, %s7159_s12  ;;  %4233 = vrot.lane.b32.xlu0 %v3245_v39, %s7159_s12  ;;  %v3210_v2 = vsel %vm336_vm0, %v3207_v28, %v8655_v11  ;;  %v3209_v60 = vsel %vm336_vm0, %v3205_v1, %v3207_v28  ;;  %v3218_v7 = vsel %vm346_vm1, %v3214_v51, %v3216_v10 }
 0x5fb   : > { %v3219_v45 = vsel %vm346_vm1, %v3216_v10, %v8653_v14 }
 0x5fd   : > { %v3225_v32 = vpop.permute.xlu0 %3224  ;;  %v3240_v54 = vpop.permute.xlu1 %3239 }
 0x5fe   : > { %4241 = vrot.lane.b32.xlu1 %v3254_v53, %s7159_s12  ;;  %4249 = vrot.lane.b32.xlu0 %v3263_v8, %s7159_s12  ;;  %v3227_v49 = vsel %vm356_vm2, %v3223_v37, %v3225_v32  ;;  %v3228_v44 = vsel %vm356_vm2, %v3225_v32, %v8663_v41  ;;  %v3243_v31 = vsel %vm375_vm4, %v8698_v29, %v3240_v54 }
 0x5ff   : > { %v3244_v33 = vsel %vm375_vm4, %v3240_v54, %v8675_v48  ;;  %v4318_v48 = vand.u32 4294901760, %v8725_v57 }
 0x601   : > { %v3232_v22 = vpop.permute.xlu0 %3231  ;;  %v3258_v0 = vpop.permute.xlu1 %3257 }
 0x602   : > { %4199 = vrot.lane.b32.xlu1 %v3210_v2, %s7159_s12  ;;  %4197 = vrot.lane.b32.xlu0 %v3209_v60, %s7159_s12  ;;  %v3235_v21 = vsel %vm366_vm3, %v3230_v46, %v3232_v22  ;;  %v3236_v5 = vsel %vm366_vm3, %v3232_v22, %v8661_v40  ;;  %v3261_v20 = vsel %vm395_vm6, %v8705_v30, %v3258_v0 }
 0x603   : > { %v3262_v24 = vsel %vm395_vm6, %v3258_v0, %v8681_v56 }
 0x605   : > { %v3249_v4 = vpop.permute.xlu0 %3248  ;;  %v4194_v58 = vpop.permute.xlu1 %4193 }
 0x606   : > { %4205 = vrot.lane.b32.xlu1 %v3218_v7, %s7159_s12  ;;  %4207 = vrot.lane.b32.xlu0 %v3219_v45, %s7159_s12  ;;  %v3252_v35 = vsel %vm385_vm5, %v8703_v6, %v3249_v4  ;;  %v3253_v36 = vsel %vm385_vm5, %v3249_v4, %v8673_v23  ;;  %v4260_v16 = vsel %vm479_vm9, %v8720_v34, %v4194_v58 }
 0x607   : > { %v4261_v40 = vsel %vm479_vm9, %v4194_v58, %v8690_v26  ;;  %v4316_v56 = vand.u32 4294901760, %v4260_v16  ;;  %v8828_v6 = vsub.f32 %v8725_v57, %v4318_v48 }
 0x608   : > { %v4990_v1 = vand.u32 4294901760, %v4261_v40 }
 0x609   : > { %v3267_v27 = vpop.permute.xlu0 %3266  ;;  %v8832_v13 = vsub.f32 %v4260_v16, %v4316_v56  ;;  %v9427_v57 = vand.u32 4294901760, %v8828_v6 }
 0x60a   : > { %4213 = vrot.lane.b32.xlu1 %v3227_v49, %s7159_s12  ;;  %4215 = vrot.lane.b32.xlu0 %v3228_v44, %s7159_s12  ;;  %v3270_v15 = vsel %vm405_vm7, %v3265_v42, %v3267_v27  ;;  %v3271_v59 = vsel %vm405_vm7, %v3267_v27, %v8679_v52  ;;  %v3198_v52 = vld [vmem:[#allocation8] sm:$0xff]  ;;  %v8834_v34 = vsub.f32 %v4261_v40, %v4990_v1 }
 0x60b   : > { %v4314_v29 = vsel %vm534_vm10, %v3198_v52, 0  ;;  %v9428_v10 = vand.u32 4294901760, %v8832_v13  ;;  %v8857_v54 = vsub.f32 %v8828_v6, %v9427_v57 }
 0x60c   : > { %v8838_v53 = vand.u32 4294901760, %v4314_v29  ;;  %v9431_v60 = vand.u32 4294901760, %v8834_v34 }
 0x60d   : > { %v8871_v0 = vsub.f32 %v8832_v13, %v9428_v10 }
 0x60e   : > { %4221 = vrot.lane.b32.xlu1 %v3235_v21, %s7159_s12  ;;  %4223 = vrot.lane.b32.xlu0 %v3236_v5, %s7159_s12  ;;  %v8850_v49 = vsub.f32 %v4314_v29, %v8838_v53 }
 0x612   : > { %4229 = vrot.lane.b32.xlu1 %v3243_v31, %s7159_s12  ;;  %4231 = vrot.lane.b32.xlu0 %v3244_v33, %s7159_s12  ;;  %v8863_v33 = vsub.f32 %v8834_v34, %v9431_v60 }
 0x616   : > { %4237 = vrot.lane.b32.xlu1 %v3252_v35, %s7159_s12  ;;  %4239 = vrot.lane.b32.xlu0 %v3253_v36, %s7159_s12 }
 0x61a   : > { %4245 = vrot.lane.b32.xlu1 %v3261_v20, %s7159_s12  ;;  %4247 = vrot.lane.b32.xlu0 %v3262_v24, %s7159_s12 }
 0x61e   : > { %4253 = vrot.lane.b32.xlu1 %v3270_v15, %s7159_s12  ;;  %4255 = vrot.lane.b32.xlu0 %v3271_v59, %s7159_s12  ;;  %v8881_v15 = vand.u32 4294901760, %v8850_v49 }
 0x620   : > { %9588 = vst [vmem:[#allocation23_spill] sm:$0xff] %v8881_v15 }
 0x622   : > { %4251 = vrot.lane.b32.xlu1 %v3265_v42, %s7159_s12  ;;  %4257 = vrot.lane.b32.xlu0 %v3272_v25, %s7159_s12  ;;  %s7077_s12 = scalar_lea.vmem %s7076_s8, 768 }
 0x623   : > { %p7079_p7 = scmp.lt.s32.totalorder %s7077_s12, %s7071_s7 }
 0x625   : > { %p7080_p10 = por %p7079_p7, %p7078_p3 }
 0x627   : > { %p7081_p13 = pnand %p7080_p10, %p7074_p8 }
 0x648   : > { %v4210_v18 = vpop.permute.xlu1 %4209  ;;  %v4202_v62 = vpop.permute.xlu0 %4201 }
 0x64c   : > { %v8804_v9 = vpop.permute.xlu1 %4225  ;;  %v4218_v3 = vpop.permute.xlu0 %4217 }
 0x660   : > { %v8806_v12 = vpop.permute.xlu1 %4219  ;;  %v8808_v17 = vpop.permute.xlu0 %4227 }
 0x664   : > { %v8810_v55 = vpop.permute.xlu1 %4235  ;;  %v8812_v61 = vpop.permute.xlu0 %4243 }
 0x668   : > { %v4196_v14 = vpop.permute.xlu1 %4195  ;;  %v4212_v11 = vpop.permute.xlu0 %4211 }
 0x66c   : > { %v4204_v19 = vpop.permute.xlu1 %4203  ;;  %v8814_v47 = vpop.permute.xlu0 %4233 }
 0x670   : > { %v8820_v41 = vpop.permute.xlu1 %4241  ;;  %v8822_v23 = vpop.permute.xlu0 %4249 }
 0x674   : > { %v4200_v37 = vpop.permute.xlu1 %4199  ;;  %v4198_v46 = vpop.permute.xlu0 %4197 }
 0x675   : > { %v4264_v51 = vsel %vm479_vm9, %v4200_v37, %v4202_v62  ;;  %v4262_v26 = vsel %vm479_vm9, %v4196_v14, %v4198_v46  ;;  %v4263_v50 = vsel %vm479_vm9, %v4198_v46, %v4200_v37 }
 0x676   : > { %v4993_v30 = vand.u32 4294901760, %v4264_v51  ;;  %v4322_v39 = vand.u32 4294901760, %v4262_v26  ;;  %v4320_v28 = vand.u32 4294901760, %v4263_v50 }
 0x678   : > { %v8836_v38 = vpack.c.bf16 %v4993_v30, %v4990_v1  ;;  %v4206_v42 = vpop.permute.xlu1 %4205  ;;  %v4208_v8 = vpop.permute.xlu0 %4207  ;;  %v8847_v7 = vpack.c.bf16 %v4322_v39, %v4318_v48  ;;  %v8852_v22 = vpack.c.bf16 %v4320_v28, %v4316_v56  ;;  %v8873_v36 = vsub.f32 %v4264_v51, %v4993_v30 }
 0x679   : > { %v4265_v2 = vsel %vm479_vm9, %v4204_v19, %v4206_v42  ;;  %v4267_v32 = vsel %vm479_vm9, %v4208_v8, %v4210_v18  ;;  %v8875_v20 = vsub.f32 %v4263_v50, %v4320_v28  ;;  %v8877_v24 = vsub.f32 %v4262_v26, %v4322_v39 }
 0x67a   : > { %6707 = vmatpush3.bf16.msra.mxu1 %v8836_v38  ;;  %9586 = vst [vmem:[#allocation15_spill] sm:$0xff] %v8847_v7  ;;  %v4326_v44 = vand.u32 4294901760, %v4265_v2  ;;  %9587 = vst [vmem:[#allocation19_spill] sm:$0xff] %v8852_v22  ;;  %v4996_v5 = vand.u32 4294901760, %v4267_v32  ;;  %6610 = vmatprep.subr.bf16.mxu0 %v8852_v22  ;;  %v4266_v25 = vsel %vm479_vm9, %v4206_v42, %v4208_v8  ;;  %v9429_v52 = vand.u32 4294901760, %v8873_v36 }
 0x67b   : > { %6708 = vmatprep.subr.bf16.mxu1 %v9483_v43  ;;  %6612 = vmatpush1.bf16.msra.mxu0 %v8847_v7  ;;  %v9425_v56 = vand.u32 4294901760, %v8877_v24  ;;  %v4324_v1 = vand.u32 4294901760, %v4266_v25  ;;  %v4402_v51 = vsub.f32 %v8850_v49, %v8881_v15  ;;  %v9432_v46 = vand.u32 4294901760, %v8875_v20 }
 0x67c   : > { %v4214_v45 = vpop.permute.xlu1 %4213  ;;  %v4216_v21 = vpop.permute.xlu0 %4215  ;;  %v8883_v59 = vsub.f32 %v4265_v2, %v4326_v44  ;;  %v8887_v14 = vsub.f32 %v4267_v32, %v4996_v5 }
 0x67d   : > { %v4268_v31 = vsel %vm479_vm9, %v4212_v11, %v4214_v45  ;;  %v4269_v4 = vsel %vm479_vm9, %v4214_v45, %v4216_v21  ;;  %v4270_v35 = vsel %vm479_vm9, %v4216_v21, %v4218_v3  ;;  %v8923_v45 = vsub.f32 %v8873_v36, %v9429_v52 }
 0x67e   : > { %v4330_v58 = vand.u32 4294901760, %v4268_v31  ;;  %v4999_v18 = vand.u32 4294901760, %v4270_v35  ;;  %v4328_v11 = vand.u32 4294901760, %v4269_v4  ;;  %v9426_v29 = vand.u32 4294901760, %v8883_v59 }
 0x67f   : > { %v9430_v50 = vand.u32 4294901760, %v8887_v14 }
 0x680   : > { %v4222_v27 = vpop.permute.xlu1 %4221  ;;  %v4224_v62 = vpop.permute.xlu0 %4223  ;;  %v8890_v16 = vpack.c.bf16 %v4999_v18, %v4996_v5  ;;  %v8901_v30 = vpack.c.bf16 %v4330_v58, %v4326_v44  ;;  %v8907_v39 = vsub.f32 %v4268_v31, %v4330_v58  ;;  %v8909_v28 = vpack.c.bf16 %v4328_v11, %v4324_v1 }
 0x681   : > { %v4271_v40 = vsel %vm479_vm9, %v8806_v12, %v4222_v27  ;;  %v4273_v12 = vsel %vm479_vm9, %v4224_v62, %v8804_v9  ;;  %v8912_v8 = vsub.f32 %v4270_v35, %v4999_v18  ;;  %v4272_v2 = vsel %vm479_vm9, %v4222_v27, %v4224_v62 }
 0x682   : > { %9589 = vst [vmem:[#allocation21_spill] sm:$0xff] %v8890_v16  ;;  %9590 = vst [vmem:[#allocation22_spill] sm:$0xff] %v8901_v30  ;;  %6710 = vmatpush3.bf16.msra.mxu1 %v8890_v16  ;;  %v4334_v42 = vand.u32 4294901760, %v4271_v40  ;;  %v8928_v44 = vsub.f32 %v8877_v24, %v9425_v56  ;;  %v5002_v21 = vand.u32 4294901760, %v4273_v12  ;;  %6614 = vmatprep.subr.bf16.mxu0 %v8909_v28 }
 0x683   : > { %9591 = vst [vmem:[#allocation25_spill] sm:$0xff] %v8909_v28  ;;  %6711 = vmatprep.subr.bf16.mxu1 %v9483_v43  ;;  %v8936_v35 = vsub.f32 %v4266_v25, %v4324_v1  ;;  %6616 = vmatpush1.bf16.msra.mxu0 %v8901_v30  ;;  %v8945_v62 = vsub.f32 %v8887_v14, %v9430_v50  ;;  %v9434_v1 = vand.u32 4294901760, %v8912_v8 }
 0x684   : > { %v4230_v37 = vpop.permute.xlu1 %4229  ;;  %v4232_v26 = vpop.permute.xlu0 %4231  ;;  %v8948_v56 = vsub.f32 %v4271_v40, %v4334_v42  ;;  %v8950_v25 = vsub.f32 %v4269_v4, %v4328_v11  ;;  %v8962_v50 = vsub.f32 %v8875_v20, %v9432_v46  ;;  %v8964_v40 = vand.u32 4294901760, %v4402_v51 }
 0x685   : > { %v4274_v32 = vsel %vm479_vm9, %v8808_v17, %v4230_v37  ;;  %v8918_v9 = vsel %vm479_vm9, %v4230_v37, %v4232_v26  ;;  %v8934_v17 = vsub.f32 %v8883_v59, %v9426_v29  ;;  %v4276_v27 = vsel %vm479_vm9, %v4232_v26, %v8814_v47 }
 0x686   : > { %v4338_v5 = vand.u32 4294901760, %v4274_v32  ;;  %v4336_v58 = vand.u32 4294901760, %v8918_v9  ;;  %v9433_v37 = vand.u32 4294901760, %v8907_v39  ;;  %v4332_v29 = vand.u32 4294901760, %v4272_v2 }
 0x687   : > { %v5005_v47 = vand.u32 4294901760, %v4276_v27  ;;  %v8955_v26 = vsub.f32 %v4273_v12, %v5002_v21 }
 0x688   : > { %v4238_v31 = vpop.permute.xlu1 %4237  ;;  %v4240_v18 = vpop.permute.xlu0 %4239  ;;  %v8953_v57 = vpack.c.bf16 %v4338_v5, %v4334_v42  ;;  %v8957_v10 = vpack.c.bf16 %v4336_v58, %v4332_v29  ;;  %v8976_v46 = vsub.f32 %v8907_v39, %v9433_v37  ;;  %v8998_v42 = vsub.f32 %v4272_v2, %v4332_v29 }
 0x689   : > { %v8969_v60 = vpack.c.bf16 %v5005_v47, %v5002_v21  ;;  %v8984_v21 = vsub.f32 %v8912_v8, %v9434_v1  ;;  %v4277_v4 = vsel %vm479_vm9, %v8810_v55, %v4238_v31  ;;  %v4278_v11 = vsel %vm479_vm9, %v4238_v31, %v4240_v18 }
 0x68a   : > { %9592 = vst [vmem:[#allocation26_spill] sm:$0xff] %v8953_v57  ;;  %9593 = vst [vmem:[#allocation24_spill] sm:$0xff] %v8957_v10  ;;  %6618 = vmatprep.subr.bf16.mxu0 %v8957_v10  ;;  %v4279_v1 = vsel %vm479_vm9, %v4240_v18, %v8820_v41  ;;  %v9000_v51 = vsub.f32 %v4274_v32, %v4338_v5  ;;  %v9595_v55 = vand.u32 4294901760, %v8948_v56  ;;  %v4340_v29 = vand.u32 4294901760, %v4278_v11 }
 0x68b   : > { %9594 = vst [vmem:[#allocation27_spill] sm:$0xff] %v8969_v60  ;;  %6713 = vmatpush3.bf16.msra.mxu1 %v8969_v60  ;;  %6620 = vmatpush1.bf16.msra.mxu0 %v8953_v57  ;;  %v9010_v41 = vsub.f32 %v4276_v27, %v5005_v47  ;;  %v4342_v57 = vand.u32 4294901760, %v4277_v4  ;;  %v5008_v2 = vand.u32 4294901760, %v4279_v1  ;;  %v5099_v5 = vand.u32 4294901760, %v8984_v21 }
 0x68c   : > { %v4246_v52 = vpop.permute.xlu1 %4245  ;;  %v4248_v12 = vpop.permute.xlu0 %4247  ;;  %6714 = vmatprep.subr.bf16.mxu1 %v9483_v43  ;;  %v9008_v31 = vsub.f32 %v8948_v56, %v9595_v55  ;;  %v9596_v60 = vand.u32 4294901760, %v8955_v26 }
 0x68d   : > { %v4280_v3 = vsel %vm479_vm9, %v8812_v61, %v4246_v52  ;;  %v4281_v37 = vsel %vm479_vm9, %v4246_v52, %v4248_v12  ;;  %v4282_v52 = vsel %vm479_vm9, %v4248_v12, %v8822_v23  ;;  %v9019_v12 = vsub.f32 %v8918_v9, %v4336_v58 }
 0x68e   : > { %v4346_v61 = vand.u32 4294901760, %v4280_v3  ;;  %v4344_v18 = vand.u32 4294901760, %v4281_v37  ;;  %v5011_v32 = vand.u32 4294901760, %v4282_v52  ;;  %v9016_v23 = vsub.f32 %v8955_v26, %v9596_v60 }
 0x68f   : > { %v9035_v58 = vsub.f32 %v4278_v11, %v4340_v29  ;;  %v9037_v7 = vsub.f32 %v4279_v1, %v5008_v2  ;;  %v9050_v1 = vsub.f32 %v4277_v4, %v4342_v57 }
 0x690   : > { %v4254_v19 = vpop.permute.xlu1 %4253  ;;  %v4256_v48 = vpop.permute.xlu0 %4255  ;;  %v9024_v10 = vpack.c.bf16 %v4346_v61, %v4342_v57  ;;  %v9026_v30 = vpack.c.bf16 %v5011_v32, %v5008_v2  ;;  %v9029_v28 = vsub.f32 %v4282_v52, %v5011_v32  ;;  %v9033_v9 = vpack.c.bf16 %v4344_v18, %v4340_v29 }
 0x691   : > { %v4284_v55 = vsel %vm479_vm9, %v4254_v19, %v4256_v48  ;;  %v9044_v52 = vsub.f32 %v4280_v3, %v4346_v61  ;;  %v9046_v32 = vsub.f32 %v4281_v37, %v4344_v18  ;;  %v9599_v37 = vand.u32 4294901760, %v9010_v41 }
 0x692   : > { %9597 = vst [vmem:[#allocation20_spill] sm:$0xff] %v9024_v10  ;;  %v9031_v60 = vand.u32 4294901760, %v4284_v55  ;;  %6716 = vmatpush3.bf16.msra.mxu1 %v9026_v30  ;;  %6622 = vmatprep.subr.bf16.mxu0 %v9033_v9  ;;  %v9600_v57 = vand.u32 4294901760, %v8936_v35  ;;  %v9601_v2 = vand.u32 4294901760, %v8863_v33  ;;  %v9606_v33 = vand.u32 4294901760, %v8928_v44 }
 0x693   : > { %6163 = vmatprep.subr.mxu1 %v9477_v63  ;;  %6624 = vmatpush1.bf16.msra.mxu0 %v9024_v10  ;;  %v5112_v61 = vsub.f32 %v9010_v41, %v9599_v37  ;;  %v9603_v37 = vand.u32 4294901760, %v8950_v25  ;;  %v4502_v18 = vand.u32 4294901760, %v9044_v52  ;;  %v4496_v16 = vand.u32 4294901760, %v9046_v32 }
 0x694   : > { %v4252_v15 = vpop.permute.xlu1 %4251  ;;  %v4258_v21 = vpop.permute.xlu0 %4257  ;;  %4349 = vmatprep.subr.mxu0 %v9031_v60  ;;  %v4437_v4 = vsub.f32 %v8936_v35, %v9600_v57  ;;  %v9604_v57 = vand.u32 4294901760, %v8871_v0  ;;  %v9608_v0 = vand.u32 4294901760, %v9019_v12  ;;  %v9609_v44 = vand.u32 4294901760, %v9029_v28 }
 0x695   : > { %v4283_v27 = vsel %vm479_vm9, %v4252_v15, %v4254_v19  ;;  %v4285_v47 = vsel %vm479_vm9, %v4256_v48, %v4258_v21  ;;  %v4426_v19 = vand.u32 4294901760, %v8962_v50  ;;  %v9598_v48 = vand.u32 4294901760, %v9000_v51 }
 0x696   : > { %v9053_v11 = vand.u32 4294901760, %v4283_v27  ;;  %v9055_v15 = vand.u32 4294901760, %v4285_v47  ;;  %v9602_v21 = vand.u32 4294901760, %v8923_v45  ;;  %v4449_v22 = vsub.f32 %v8950_v25, %v9603_v37 }
 0x697   : > { %v4479_v3 = vsub.f32 %v9000_v51, %v9598_v48  ;;  %v6625_v29 = vpack.c.bf16 %v4426_v19, %v9604_v57  ;;  %v9605_v50 = vand.u32 4294901760, %v8857_v54  ;;  %v4438_v45 = vand.u32 4294901760, %v4437_v4 }
 0x698   : > { %6164 = vmatpush3.msra.mxu1 %v9055_v15  ;;  %v6718_v48 = vpack.c.bf16 %v9602_v21, %v9601_v2  ;;  %4351 = vmatpush1.msra.mxu0 %v9053_v11  ;;  %v4450_v2 = vand.u32 4294901760, %v4449_v22  ;;  %v9607_v21 = vand.u32 4294901760, %v8998_v42  ;;  %v4473_v19 = vsub.f32 %v9019_v12, %v9608_v0 }
 0x699   : > { %6717 = vmatprep.subr.bf16.mxu1 %v9483_v43  ;;  %v6627_v10 = vpack.c.bf16 %v9606_v33, %v9605_v50  ;;  %6166 = vmatmul.mubr.f32.vlgmr.msra.gmra.mrb[4].mxu1 %v8964_v40  ;;  %v5113_v57 = vand.u32 4294901760, %v5112_v61  ;;  %v4490_v54 = vand.u32 4294901760, %v9050_v1  ;;  %v5126_v50 = vsub.f32 %v9029_v28, %v9609_v44 }
 0x69a   : > { %6719 = vmatpush3.bf16.msra.mxu1 %v6718_v48  ;;  %v4461_v37 = vsub.f32 %v8998_v42, %v9607_v21  ;;  %v9101_v33 = vsub.f32 %v4284_v55, %v9031_v60  ;;  %6626 = vmatprep.subr.bf16.mxu0 %v6625_v29  ;;  %v9105_v22 = vsub.f32 %v4285_v47, %v9055_v15  ;;  %v9610_v61 = vand.u32 4294901760, %v8945_v62 }
 0x69b   : > { %4404 = vmatmul.mubr.f32.vlgmr.msra.gmra.mrb[4].mxu0 %v8964_v40  ;;  %v6629_v4 = vpack.c.bf16 %v4450_v2, %v4438_v45  ;;  %6720 = vmatprep.subr.bf16.mxu1 %v9483_v43  ;;  %v4474_v21 = vand.u32 4294901760, %v4473_v19  ;;  %v9611_v0 = vand.u32 4294901760, %v9037_v7  ;;  %v9612_v29 = vand.u32 4294901760, %v9035_v58 }
 0x69c   : > { %6628 = vmatpush1.bf16.msra.mxu0 %v6627_v10  ;;  %v6721_v48 = vpack.c.bf16 %v5099_v5, %v9610_v61  ;;  %v4462_v55 = vand.u32 4294901760, %v4461_v37  ;;  %v4497_v10 = vsub.f32 %v9046_v32, %v4496_v16  ;;  %4564 = vmatprep.mubr.f32.mxu0 %v9477_v63  ;;  %v4480_v47 = vand.u32 4294901760, %v4479_v3 }
 0x69d   : > { %v5119_v44 = vsub.f32 %v9037_v7, %v9611_v0  ;;  %v4485_v40 = vsub.f32 %v9035_v58, %v9612_v29  ;;  %v4503_v62 = vsub.f32 %v9044_v52, %v4502_v18  ;;  %v9124_v5 = vsub.f32 %v4283_v27, %v9053_v11  ;;  %6630 = vmatprep.subr.bf16.mxu0 %v6629_v4 }
 0x69e   : > { %v9613_v45 = vand.u32 4294901760, %v8934_v17  ;;  %v9614_v2 = vand.u32 4294901760, %v8976_v46  ;;  %6722 = vmatpush3.bf16.msra.mxu1 %v6721_v48  ;;  %v4468_v19 = vand.u32 4294901760, %v9008_v31  ;;  %v6633_v61 = vpack.c.bf16 %v4474_v21, %v4462_v55  ;;  %6186 = vmatprep.mubr.msk.f32.mxu1 %vm7162_vm8, %v9477_v63 }
 0x69f   : > { %6723 = vmatprep.subr.bf16.mxu1 %v9483_v43  ;;  %v4498_v3 = vand.u32 4294901760, %v4497_v10  ;;  %v4508_v0 = vand.u32 4294901760, %v9101_v33  ;;  %v4491_v27 = vsub.f32 %v9050_v1, %v4490_v54  ;;  %v5127_v17 = vand.u32 4294901760, %v5126_v50 }
 0x6a0   : > { %v6631_v37 = vpack.c.bf16 %v9614_v2, %v9613_v45  ;;  %v5132_v46 = vand.u32 4294901760, %v9105_v22  ;;  %v9615_v4 = vand.u32 4294901760, %v9016_v23  ;;  %v4486_v48 = vand.u32 4294901760, %v4485_v40 }
 0x6a1   : > { %v5120_v21 = vand.u32 4294901760, %v5119_v44  ;;  %v4504_v55 = vand.u32 4294901760, %v4503_v62  ;;  %v4514_v29 = vand.u32 4294901760, %v9124_v5  ;;  %v6635_v10 = vpack.c.bf16 %v4480_v47, %v4468_v19 }
 0x6a2   : > { %6632 = vmatpush1.bf16.msra.mxu0 %v6631_v37  ;;  %v6724_v31 = vpack.c.bf16 %v5113_v57, %v9615_v4  ;;  %v6637_v45 = vpack.c.bf16 %v4498_v3, %v4486_v48  ;;  %v4509_v50 = vsub.f32 %v9101_v33, %v4508_v0  ;;  %v4492_v2 = vand.u32 4294901760, %v4491_v27 }
 0x6a3   : > { %6634 = vmatprep.subr.bf16.mxu0 %v6633_v61  ;;  %v5133_v23 = vsub.f32 %v9105_v22, %v5132_v46  ;;  %v6727_v57 = vpack.c.bf16 %v5127_v17, %v5120_v21  ;;  %v4515_v44 = vsub.f32 %v9124_v5, %v4514_v29  ;;  %v6730_v37 = vpack.c.bf16 %v8873_v36, %v8834_v34 }
 0x6a4   : > { %6725 = vmatpush3.bf16.msra.mxu1 %v6724_v31  ;;  %v6639_v40 = vpack.c.bf16 %v4504_v55, %v4492_v2  ;;  %v4510_v47 = vand.u32 4294901760, %v4509_v50  ;;  %v6641_v61 = vpack.c.bf16 %v8875_v20, %v8832_v13  ;;  %v6643_v3 = vpack.c.bf16 %v8877_v24, %v8828_v6  ;;  %v9616_v50 = vld [vmem:[#allocation19_spill] sm:$0xff] }
 0x6a5   : > { %6726 = vmatprep.subr.bf16.mxu1 %v9483_v43  ;;  %v5134_v62 = vand.u32 4294901760, %v5133_v23  ;;  %v4516_v19 = vand.u32 4294901760, %v4515_v44  ;;  %v6645_v27 = vpack.c.bf16 %v8950_v25, %v8936_v35  ;;  %v6733_v17 = vpack.c.bf16 %v8912_v8, %v8887_v14  ;;  %v9617_v2 = vld [vmem:[#allocation15_spill] sm:$0xff]  ;;  %v9618_v23 = vld [vmem:[#allocation25_spill] sm:$0xff]  ;;  %v9620_v44 = vld [vmem:[#allocation22_spill] sm:$0xff] }
 0x6a6   : > { %6636 = vmatpush1.bf16.msra.mxu0 %v6635_v10  ;;  %v6647_v4 = vpack.c.bf16 %v8907_v39, %v8883_v59  ;;  %v6649_v31 = vpack.c.bf16 %v9019_v12, %v8998_v42  ;;  %v6736_v48 = vpack.c.bf16 %v9010_v41, %v8955_v26  ;;  %v6651_v21 = vpack.c.bf16 %v9000_v51, %v8948_v56 }
 0x6a7   : > { %6638 = vmatprep.subr.bf16.mxu0 %v6637_v45  ;;  %v6653_v55 = vpack.c.bf16 %v9046_v32, %v9035_v58  ;;  %v6739_v10 = vpack.c.bf16 %v9029_v28, %v9037_v7  ;;  %v6655_v45 = vpack.c.bf16 %v9044_v52, %v9050_v1 }
 0x6a8   : > { %6728 = vmatpush3.bf16.msra.mxu1 %v6727_v57  ;;  %v9619_v57 = vld [vmem:[#allocation21_spill] sm:$0xff] }
 0x6a9   : > { %6184 = vmatprep.subr.mxu1 %v9477_v63 }
 0x6aa   : > { %6640 = vmatpush1.bf16.msra.mxu0 %v6639_v40  ;;  %v9621_v40 = vld [vmem:[#allocation24_spill] sm:$0xff] }
 0x6ab   : > { %4511 = vmatprep.subr.mxu0 %v4510_v47  ;;  %v9623_v47 = vld [vmem:[#allocation26_spill] sm:$0xff] }
 0x6ac   : > { %6185 = vmatpush3.msra.mxu1 %v5134_v62  ;;  %v9624_v62 = vld [vmem:[#allocation20_spill] sm:$0xff] }
 0x6ad   : > { %6729 = vmatprep.subr.bf16.mxu1 %v9483_v43  ;;  %6187 = vmatmul.mubr.f32.vlgmr.msra.gmra.mrb[4].mxu1 %v8838_v53 }
 0x6ae   : > { %4517 = vmatpush1.msra.mxu0 %v4516_v19  ;;  %6731 = vmatpush3.bf16.msra.mxu1 %v6730_v37  ;;  %v9625_v37 = vand.u32 4294901760, %v8834_v34  ;;  %v9626_v19 = vand.u32 4294901760, %v8873_v36  ;;  %v9633_v34 = vand.u32 4294901760, %v8950_v25  ;;  %v9639_v25 = vand.u32 4294901760, %v9019_v12 }
 0x6af   : > { %6642 = vmatprep.subr.bf16.mxu0 %v6641_v61  ;;  %4566 = vmatmul.mubr.f32.vlgmr.msra.gmra.mrb[4].mxu0 %v8838_v53 }
 0x6b0   : > { %6644 = vmatpush1.bf16.msra.mxu0 %v6643_v3  ;;  %6732 = vmatprep.subr.bf16.mxu1 %v9483_v43  ;;  %v6754_v61 = vpack.c.bf16 %v9626_v19, %v9625_v37  ;;  %v9627_v3 = vand.u32 4294901760, %v8832_v13  ;;  %v9632_v13 = vand.u32 4294901760, %v8936_v35  ;;  %v9638_v35 = vand.u32 4294901760, %v8998_v42 }
 0x6b1   : > { %6646 = vmatprep.subr.bf16.mxu0 %v6645_v27  ;;  %4672 = vmatprep.mubr.f32.mxu0 %v9477_v63  ;;  %v9628_v27 = vand.u32 4294901760, %v8875_v20  ;;  %v9634_v20 = vand.u32 4294901760, %v8887_v14  ;;  %v9641_v37 = vand.u32 4294901760, %v9010_v41  ;;  %v9643_v19 = vand.u32 4294901760, %v9000_v51 }
 0x6b2   : > { %6734 = vmatpush3.bf16.msra.mxu1 %v6733_v17  ;;  %6207 = vmatprep.mubr.msk.f32.mxu1 %vm7162_vm8, %v9477_v63  ;;  %v6677_v36 = vpack.c.bf16 %v9633_v34, %v9632_v13  ;;  %v6681_v14 = vpack.c.bf16 %v9639_v25, %v9638_v35  ;;  %v9644_v42 = vand.u32 4294901760, %v9035_v58  ;;  %v9646_v41 = vand.u32 4294901760, %v9029_v28 }
 0x6b3   : > { %6735 = vmatprep.subr.bf16.mxu1 %v9483_v43  ;;  %v6673_v17 = vpack.c.bf16 %v9628_v27, %v9627_v3 }
 0x6b4   : > { %6648 = vmatpush1.bf16.msra.mxu0 %v6647_v4  ;;  %v9629_v4 = vld [vmem:[#allocation23_spill] sm:$0xff]  ;;  %v6685_v12 = vpack.c.bf16 %v4496_v16, %v9644_v42 }
 0x6b5   : > { %6650 = vmatprep.subr.bf16.mxu0 %v6649_v31  ;;  %v9630_v31 = vand.u32 4294901760, %v8828_v6 }
 0x6b6   : > { %6737 = vmatpush3.bf16.msra.mxu1 %v6736_v48  ;;  %v9631_v48 = vand.u32 4294901760, %v8877_v24  ;;  %v9636_v24 = vand.u32 4294901760, %v8883_v59 }
 0x6b7   : > { %6738 = vmatprep.subr.bf16.mxu1 %v9483_v43 }
 0x6b8   : > { %6652 = vmatpush1.bf16.msra.mxu0 %v6651_v21  ;;  %v6675_v21 = vpack.c.bf16 %v9631_v48, %v9630_v31 }
 0x6b9   : > { %6654 = vmatprep.subr.bf16.mxu0 %v6653_v55  ;;  %v9635_v55 = vand.u32 4294901760, %v8912_v8  ;;  %v9640_v8 = vand.u32 4294901760, %v8955_v26  ;;  %v9645_v26 = vand.u32 4294901760, %v9037_v7 }
 0x6ba   : > { %6740 = vmatpush3.bf16.msra.mxu1 %v6739_v10  ;;  %v9637_v10 = vand.u32 4294901760, %v8907_v39  ;;  %v9642_v39 = vand.u32 4294901760, %v8948_v56  ;;  %v6687_v56 = vpack.c.bf16 %v4502_v18, %v4490_v54 }
 0x6bb   : > { %6205 = vmatprep.subr.mxu1 %v9477_v63  ;;  %v6757_v6 = vpack.c.bf16 %v9635_v55, %v9634_v20  ;;  %v6760_v59 = vpack.c.bf16 %v9641_v37, %v9640_v8  ;;  %v6763_v3 = vpack.c.bf16 %v9646_v41, %v9645_v26 }
 0x6bc   : > { %6656 = vmatpush1.bf16.msra.mxu0 %v6655_v45  ;;  %v6679_v45 = vpack.c.bf16 %v9637_v10, %v9636_v24 }
 0x6bd   : > { %4622 = vmatprep.subr.mxu0 %v9101_v33 }
 0x6be   : > { %6206 = vmatpush3.msra.mxu1 %v9105_v22 }
 0x6bf   : > { %6741 = vmatprep.subr.bf16.mxu1 %v9483_v43  ;;  %6208 = vmatmul.mubr.f32.vlgmr.msra.gmra.mrb[4].mxu1 %v8850_v49 }
 0x6c0   : > { %4625 = vmatpush1.msra.mxu0 %v9124_v5  ;;  %6743 = vmatpush3.bf16.msra.mxu1 %v8836_v38 }
 0x6c1   : > { %6658 = vmatprep.subr.bf16.mxu0 %v9616_v50  ;;  %4675 = vmatmul.mubr.f32.vlgmr.msra.gmra.mrb[4].mxu0 %v8850_v49  ;;  %v9622_v49 = vld [vmem:[#allocation27_spill] sm:$0xff] }
 0x6c2   : > { %6660 = vmatpush1.bf16.msra.mxu0 %v9617_v2  ;;  %6744 = vmatprep.subr.bf16.mxu1 %v9483_v43 }
 0x6c3   : > { %6662 = vmatprep.subr.bf16.mxu0 %v9618_v23  ;;  %4763 = vmatprep.mubr.f32.mxu0 %v9477_v63 }
 0x6c4   : > { %6746 = vmatpush3.bf16.msra.mxu1 %v9619_v57  ;;  %6228 = vmatprep.mubr.msk.f32.mxu1 %vm7162_vm8, %v9477_v63 }
 0x6c5   : > { %6747 = vmatprep.subr.bf16.mxu1 %v9483_v43 }
 0x6c6   : > { %6664 = vmatpush1.bf16.msra.mxu0 %v9620_v44 }
 0x6c7   : > { %6666 = vmatprep.subr.bf16.mxu0 %v9621_v40 }
 0x6c8   : > { %6749 = vmatpush3.bf16.msra.mxu1 %v9622_v49 }
 0x6c9   : > { %6750 = vmatprep.subr.bf16.mxu1 %v9483_v43 }
 0x6ca   : > { %6668 = vmatpush1.bf16.msra.mxu0 %v9623_v47 }
 0x6cb   : > { %6670 = vmatprep.subr.bf16.mxu0 %v9033_v9 }
 0x6cc   : > { %6752 = vmatpush3.bf16.msra.mxu1 %v9026_v30 }
 0x6cd   : > { %6226 = vmatprep.subr.mxu1 %v9477_v63 }
 0x6ce   : > { %6672 = vmatpush1.bf16.msra.mxu0 %v9624_v62 }
 0x6cf   : > { %4714 = vmatprep.subr.mxu0 %v9031_v60 }
 0x6d0   : > { %6227 = vmatpush3.msra.mxu1 %v9055_v15 }
 0x6d1   : > { %6753 = vmatprep.subr.bf16.mxu1 %v9483_v43  ;;  %6229 = vmatmul.mubr.f32.vlgmr.msra.gmra.mrb[4].mxu1 %v9629_v4 }
 0x6d2   : > { %4716 = vmatpush1.msra.mxu0 %v9053_v11  ;;  %6755 = vmatpush3.bf16.msra.mxu1 %v6754_v61  ;;  %v6683_v61 = vpack.c.bf16 %v9643_v19, %v9642_v39 }
 0x6d3   : > { %6674 = vmatprep.subr.bf16.mxu0 %v6673_v17  ;;  %4767 = vmatmul.mubr.f32.vlgmr.msra.gmra.mrb[4].mxu0 %v9629_v4 }
 0x6d4   : > { %6676 = vmatpush1.bf16.msra.mxu0 %v6675_v21  ;;  %6756 = vmatprep.subr.bf16.mxu1 %v9483_v43 }
 0x6d5   : > { %6678 = vmatprep.subr.bf16.mxu0 %v6677_v36  ;;  %4891 = vmatprep.mubr.f32.mxu0 %v9477_v63 }
 0x6d6   : > { %6758 = vmatpush3.bf16.msra.mxu1 %v6757_v6  ;;  %6249 = vmatprep.mubr.msk.f32.mxu1 %vm7162_vm8, %v9477_v63 }
 0x6d7   : > { %6759 = vmatprep.subr.bf16.mxu1 %v9483_v43 }
 0x6d8   : > { %6680 = vmatpush1.bf16.msra.mxu0 %v6679_v45 }
 0x6d9   : > { %6682 = vmatprep.subr.bf16.mxu0 %v6681_v14 }
 0x6da   : > { %6761 = vmatpush3.bf16.msra.mxu1 %v6760_v59 }
 0x6db   : > { %6762 = vmatprep.subr.bf16.mxu1 %v9483_v43 }
 0x6dc   : > { %6684 = vmatpush1.bf16.msra.mxu0 %v6683_v61 }
 0x6dd   : > { %6686 = vmatprep.subr.bf16.mxu0 %v6685_v12 }
 0x6de   : > { %6764 = vmatpush3.bf16.msra.mxu1 %v6763_v3 }
 0x6df   : > { %6247 = vmatprep.subr.mxu1 %v9477_v63 }
 0x6e0   : > { %6688 = vmatpush1.bf16.msra.mxu0 %v6687_v56 }
 0x6e1   : > { %4840 = vmatprep.subr.mxu0 %v4508_v0 }
 0x6e2   : > { %6248 = vmatpush3.msra.mxu1 %v5132_v46 }
 0x6e3   : > { %6765 = vmatprep.subr.bf16.mxu1 %v9483_v43  ;;  %6250 = vmatmul.mubr.f32.vlgmr.msra.gmra.mrb[4].mxu1 %v8838_v53 }
 0x6e4   : > { %4844 = vmatpush1.msra.mxu0 %v4514_v29  ;;  %6767 = vmatpush3.bf16.msra.mxu1 %v8836_v38 }
 0x6e5   : > { %6690 = vmatprep.subr.bf16.mxu0 %v9616_v50  ;;  %4893 = vmatmul.mubr.f32.vlgmr.msra.gmra.mrb[4].mxu0 %v8838_v53 }
 0x6e6   : > { %6692 = vmatpush1.bf16.msra.mxu0 %v9617_v2  ;;  %6768 = vmatprep.subr.bf16.mxu1 %v9483_v43 }
 0x6e7   : > { %6694 = vmatprep.subr.bf16.mxu0 %v9618_v23  ;;  %4981 = vmatprep.mubr.f32.mxu0 %v9477_v63 }
 0x6e8   : > { %6770 = vmatpush3.bf16.msra.mxu1 %v9619_v57  ;;  %6270 = vmatprep.mubr.msk.f32.mxu1 %vm7162_vm8, %v9477_v63 }
 0x6e9   : > { %6771 = vmatprep.subr.bf16.mxu1 %v9483_v43 }
 0x6ea   : > { %6696 = vmatpush1.bf16.msra.mxu0 %v9620_v44 }
 0x6eb   : > { %6698 = vmatprep.subr.bf16.mxu0 %v9621_v40 }
 0x6ec   : > { %6773 = vmatpush3.bf16.msra.mxu1 %v9622_v49 }
 0x6ed   : > { %6774 = vmatprep.subr.bf16.mxu1 %v9483_v43 }
 0x6ee   : > { %6700 = vmatpush1.bf16.msra.mxu0 %v9623_v47 }
 0x6ef   : > { %6702 = vmatprep.subr.bf16.mxu0 %v9033_v9 }
 0x6f0   : > { %6776 = vmatpush3.bf16.msra.mxu1 %v9026_v30 }
 0x6f1   : > { %6268 = vmatprep.subr.mxu1 %v9477_v63 }
 0x6f2   : > { %6704 = vmatpush1.bf16.msra.mxu0 %v9624_v62 }
 0x6f3   : > { %4932 = vmatprep.subr.mxu0 %v9031_v60 }
 0x6f4   : > { %6269 = vmatpush3.msra.mxu1 %v9055_v15 }
 0x6f5   : > { %6271 = vmatmul.mubr.f32.vlgmr.msra.gmra.mrb[4].mxu1 %v8838_v53 }
 0x6f6   : > { %4934 = vmatpush1.msra.mxu0 %v9053_v11 }
 0x6f7   : > { %4983 = vmatmul.mubr.f32.vlgmr.msra.gmra.mrb[4].mxu0 %v8838_v53 }
 0x7c8   : > { %v5535_v43 = vpop.f32.mrb[4].mxu1 }
 0x7c9   : > { %v5541_v38 = vmax.f32 %v5535_v43, 0.0  ;;  %v6272_v7 = vpop.f32.mrb[5].mxu1 }
 0x7ca   : > { %v4984_v63 = vpop.f32.mrb[4].mxu0 }
 0x7cb   : > { %v5539_v16 = vmax.f32 %v4984_v63, 0.0  ;;  %5544 = vst [vmem:[%s305_s27 + $0x10] sm:$0xff] %v5541_v38  ;;  %v4986_v30 = vpop.f32.mrb[5].mxu0 }
 0x7cc   : > { %v5540_v28 = vmax.f32 %v4986_v30, 0.0 }
 0x7cd   : > { %5542 = vst [vmem:[%s305_s27] sm:$0xff] %v5539_v16 }
 0x7ce   : > { %5543 = vst [vmem:[%s305_s27 + $0x8] sm:$0xff] %v5540_v28 }
 0x7cf   : > { %7084 = shalt.err (!%p7081_p13)
}
 0x7d0   : > { %s7085_s20 = scalar_lea.hbm %s9312_s19, 384  ;;  %s7089_s11 = scalar_lea.hbm %s9362_s6, 768 }
 0x7d1   : > { %p7086_p5 = scmp.ne.s32.totalorder %s9312_s19, %s7085_s20  ;;  %p7090_p9 = scmp.lt.u32.totalorder %s9312_s19, %s9362_s6 }
 0x7d2   : > { %p7091_p12 = scmp.lt.u32.totalorder %s7089_s11, %s7085_s20  ;;  %p7093_p1 = scmp.lt.u32.totalorder %s7085_s20, %s9312_s19 }
 0x7d3   : > { %p7087_p0 = pnand %p7086_p5, %p7341_p6 }
 0x7d4   : > { %p7092_p2 = por %p7091_p12, %p7090_p9 }
 0x7d5   : > { %p7088_p11 = pneg %p7087_p0 }
 0x7d6   : > { %p7094_p4 = por %p7093_p1, %p7092_p2 }
 0x7d8   : > { %p7095_p8 = pnand %p7094_p4, %p7088_p11 }
 0x7da   : > { %7098 = shalt.err (!%p7095_p8)
}
 0x7db   : > { %6879 = dma.vmem_to_hbm [thread:$0]  (%p7341_p6), %s9314_s13, 384, %s9312_s19, %s5546_s25  }
 0x7dc PF: > { %s5572_s27 = sand.u32 1, %s7133_s21   ;;  %p9647_p3 = scmp.ne.s32.totalorder %s9456_s28, 0 }
 0x7dd   : > { %p9648_p7 = scmp.ge.s32.totalorder %s7145_s24, 2  ;;  %s5573_s16 = scalar_lea.sflag [#allocation4], %s5572_s27 }
 0x7df   : > { %p6896_p10 = pnand %p9648_p7, %p9647_p3 }
 0x7e1   : > { %7128 = dma.done.wait (!%p6896_p10), %s5573_s16, 384  }
 0x7e2   : > { %7130 = vsyncadd (!%p6896_p10), %s5573_s16, 4294966912  ;;  %p21_p13 = scmp.ge.s32.totalorder %s7327_s18, 4   ;;  %s9649_s21 = smov %s7137_s22 }
 0x7e3   : > { %s9650_s22 = smov %s7141_s23  ;;  %s9651_s23 = smov %s7337_s26 }
 0x7e4   : > { %s9652_s24 = smov %s7327_s18  ;;  %23 = sbr.rel (!%p21_p13) target bundleno = 7 (0x7), region = 101 }
 0x7eb   :  { %5578 = vsyncpa [#allocation3], 1 }
 0x7ec   :  { %5580 = vsyncpa [#allocation3 + $0x1], 1 }
 0x7ed   :  { %5581 = vsyncpa [#allocation6], 1 }
 0x7ee   :  { %5582 = vsyncpa [#allocation9], 1 }
 0x7ef   :  { %5583 = vsyncpa [#allocation4], 1 }
 0x7f0   :  { %5585 = vsyncpa [#allocation4 + $0x1], 1 }

</bundles_post_ra>
